<compile_context>
chip_gen: v7x
topology: tpu7x:2x2x1
jax: 0.10.0
libtpu: 0.0.40
codegen_flags: <defaults>
</compile_context>

<pallas_src>
import functools
import math

import jax
import jax.numpy as jnp
from jax.experimental import pallas as pl
from jax.experimental.pallas import tpu as pltpu


def _pair_matrix():
    # Base-pairing weights, bases ordered (A, U, C, G): AU/UA + CG/GC + UG/GU.
    return jnp.array(
        [[0.0, 1.0, 0.0, 0.0],
         [1.0, 0.0, 0.0, 1.0],
         [0.0, 0.0, 0.0, 1.0],
         [0.0, 1.0, 1.0, 0.0]], dtype=jnp.float32)


def soft_sign(x, k):
    # e2efold soft_sign(x, k) = 1 / (1 + exp(-2*k*x))
    return jax.nn.sigmoid(2.0 * k * x)


def _lag_pp_mixed_kernel(s_ref, w_ref, alpha_ref, rhoa_ref, beta_ref,
                         pairw_ref, u_ref, x_ref, out_ref,
                         usym_sc, m_sc, ahat_sc, rs_sc, lmbd_sc, *, k):
    t = pl.program_id(1)
    s = s_ref[0]

    # ----- one-time per-batch setup --------------------------------------
    @pl.when(t == 0)
    def _init():
        u_in = u_ref[0]          # (L, L)
        x = x_ref[0]             # (L, 4)
        L = u_in.shape[0]

        # constraint_matrix_batch: m[i, j] = x_i^T W x_j, band |i-j|<=3 zeroed
        xw = jax.lax.dot_general(x, pairw_ref[...], (((1,), (1,)), ((), ())),
                                 preferred_element_type=jnp.float32)   # (L, 4)
        m = jax.lax.dot_general(xw, x, (((1,), (1,)), ((), ())),
                                preferred_element_type=jnp.float32)    # (L, L)
        row = jax.lax.broadcasted_iota(jnp.int32, (L, L), 0)
        col = jax.lax.broadcasted_iota(jnp.int32, (L, L), 1)
        m = jnp.where(jnp.abs(row - col) <= 3, 0.0, m)

        # u <- soft_sign(u - s) * u ; a_hat <- sigmoid(u) * soft_sign(u - s)
        u_t = soft_sign(u_in - s, k) * u_in
        a_hat = jax.nn.sigmoid(u_t) * soft_sign(u_t - s, k)

        a_sq = a_hat * a_hat
        a0 = 0.5 * (a_sq + jnp.transpose(a_sq)) * m
        rs0 = jnp.sum(a0, axis=-1, keepdims=True) - 1.0                # (L, 1)
        lmbd0 = w_ref[0] * jax.nn.relu(rs0)                            # w * relu(.)

        m_sc[...] = m
        usym_sc[...] = -0.5 * (u_t + jnp.transpose(u_t))   # hoisted symmetric -u/2
        ahat_sc[...] = a_hat
        rs_sc[...] = rs0
        lmbd_sc[...] = lmbd0

    # ----- one Lagrangian update step (update_rule for step t) -----------
    alpha_t = alpha_ref[t]   # alpha * lr_decay_alpha^t
    rhoa_t = rhoa_ref[t]     # rho * alpha * lr_decay_alpha^t
    beta_t = beta_ref[t]     # beta * lr_decay_beta^t

    c = lmbd_sc[...] * soft_sign(rs_sc[...], k)            # (L, 1)
    # grad_a + grad_aᵀ == -(u+uᵀ)/2 + c + cᵀ  (exact algebra, transpose hoisted)
    sym = usym_sc[...] + c + jnp.transpose(c)              # (L, L)
    grad = ahat_sc[...] * m_sc[...] * sym

    a_hat = ahat_sc[...] - alpha_t * grad
    a_hat = jax.nn.relu(jnp.abs(a_hat) - rhoa_t)           # rho_mode == 'fix'
    a_hat = jnp.clip(a_hat, -1.0, 1.0)

    a_sq = a_hat * a_hat
    a = 0.5 * (a_sq + jnp.transpose(a_sq)) * m_sc[...]     # contact_a
    rs = jnp.sum(a, axis=-1, keepdims=True) - 1.0          # carried to next step

    ahat_sc[...] = a_hat
    rs_sc[...] = rs
    lmbd_sc[...] = lmbd_sc[...] + beta_t * jax.nn.relu(rs)

    out_ref[0, 0, :, :] = a


def lag_pp_mixed(u, x, s, w, rho, alpha, beta, lr_decay_alpha, lr_decay_beta,
                 *, steps, k):
    """Returns (steps, B, L, L) f32 == stack(a_t_list[1:]) of Lag_PP_mixed."""
    B, L, _ = u.shape

    # Pad L to a multiple of 128 for lane-dense loads/stores. Zero padding of x
    # keeps m (and hence a / grad) exactly zero in the padded region.
    Lp = max(128, ((L + 127) // 128) * 128)
    if Lp != L:
        u = jnp.pad(u, ((0, 0), (0, Lp - L), (0, Lp - L)))
        x = jnp.pad(x, ((0, 0), (0, Lp - L), (0, 0)))

    t_idx = jnp.arange(steps, dtype=jnp.float32)
    alpha_t = (alpha * lr_decay_alpha ** t_idx).astype(jnp.float32)
    rhoa_t = (rho * alpha_t).astype(jnp.float32)
    beta_t = (beta * lr_decay_beta ** t_idx).astype(jnp.float32)
    s_arr = jnp.asarray(s, jnp.float32).reshape((1,))
    w_arr = jnp.asarray(w, jnp.float32).reshape((1,))

    kernel = functools.partial(_lag_pp_mixed_kernel, k=k)
    out = pl.pallas_call(
        kernel,
        out_shape=jax.ShapeDtypeStruct((steps, B, Lp, Lp), jnp.float32),
        grid=(B, steps),
        in_specs=[
            pl.BlockSpec(memory_space=pltpu.SMEM),                # s      (1,)
            pl.BlockSpec(memory_space=pltpu.SMEM),                # w      (1,)
            pl.BlockSpec(memory_space=pltpu.SMEM),                # alpha_t (steps,)
            pl.BlockSpec(memory_space=pltpu.SMEM),                # rho*alpha_t
            pl.BlockSpec(memory_space=pltpu.SMEM),                # beta_t
            pl.BlockSpec((4, 4), lambda b, t: (0, 0)),            # pair matrix
            pl.BlockSpec((1, Lp, Lp), lambda b, t: (b, 0, 0)),    # u
            pl.BlockSpec((1, Lp, 4), lambda b, t: (b, 0, 0)),     # x
        ],
        out_specs=pl.BlockSpec((1, 1, Lp, Lp), lambda b, t: (t, b, 0, 0)),
        scratch_shapes=[
            pltpu.VMEM((Lp, Lp), jnp.float32),   # -(u+u^T)/2
            pltpu.VMEM((Lp, Lp), jnp.float32),   # m
            pltpu.VMEM((Lp, Lp), jnp.float32),   # a_hat
            pltpu.VMEM((Lp, 1), jnp.float32),    # row_sum(a) - 1
            pltpu.VMEM((Lp, 1), jnp.float32),    # lambda
        ],
        compiler_params=pltpu.CompilerParams(
            dimension_semantics=("parallel", "arbitrary")),
    )(s_arr, w_arr, alpha_t, rhoa_t, beta_t, _pair_matrix(), u, x)

    if Lp != L:
        out = out[:, :, :L, :L]
    return out


# --------------------------- pure-JAX reference ---------------------------

def lag_pp_mixed_reference(u, x, s, w, rho, alpha, beta, da, db, steps, k):
    pw = _pair_matrix()
    B, L, _ = u.shape
    m = jnp.einsum('bif,fg,bjg->bij', x, pw, x)
    row = jax.lax.broadcasted_iota(jnp.int32, (L, L), 0)
    col = jax.lax.broadcasted_iota(jnp.int32, (L, L), 1)
    m = jnp.where((jnp.abs(row - col) <= 3)[None], 0.0, m)

    def contact_a(a_hat, m):
        a = a_hat * a_hat
        a = (a + jnp.swapaxes(a, -1, -2)) * 0.5
        return a * m

    u = soft_sign(u - s, k) * u
    a_hat = jax.nn.sigmoid(u) * soft_sign(u - s, k)
    a = contact_a(a_hat, m)
    lmbd = w * jax.nn.relu(jnp.sum(a, axis=-1) - 1.0)

    outs = []
    for t in range(steps):
        grad_a = -u / 2.0 + (lmbd * soft_sign(jnp.sum(a, axis=-1) - 1.0, k))[..., None]
        grad = a_hat * m * (grad_a + jnp.swapaxes(grad_a, -1, -2))
        a_hat = a_hat - alpha * (da ** t) * grad
        a_hat = jax.nn.relu(jnp.abs(a_hat) - rho * alpha * (da ** t))
        a_hat = jnp.clip(a_hat, -1.0, 1.0)
        a = contact_a(a_hat, m)
        lmbd = lmbd + beta * (db ** t) * jax.nn.relu(jnp.sum(a, axis=-1) - 1.0)
        outs.append(a)
    return jnp.stack(outs, axis=0)


# --------------------------------- main ------------------------------------

if __name__ == "__main__":
    B, L, steps, k = 2, 16, 3, 1.0

    key = jax.random.PRNGKey(0)
    ku, kx, kw = jax.random.split(key, 3)
    # utility matrix with values around/above s = log 9
    u = 5.0 * jax.random.normal(ku, (B, L, L), dtype=jnp.float32)
    # one-hot sequence encoding (A/U/C/G)
    seq = jax.random.randint(kx, (B, L), 0, 4)
    x = jax.nn.one_hot(seq, 4, dtype=jnp.float32)

    # Lag_PP_mixed learnable parameters at their __init__ values
    # (deterministic where torch is deterministic; randn for `w`).
    s = math.log(9.0)                       # nn.Parameter([log(9)])
    w = float(jax.random.normal(kw, ()))    # nn.Parameter(torch.randn(1))
    rho = 1.0                               # nn.Parameter([1.0])
    alpha = 0.01                            # nn.Parameter([0.01])
    beta = 0.1                              # nn.Parameter([0.1])
    lr_decay_alpha = 0.99                   # nn.Parameter([0.99])
    lr_decay_beta = 0.99                    # nn.Parameter([0.99])

    out = lag_pp_mixed(u, x, s, w, rho, alpha, beta,
                       lr_decay_alpha, lr_decay_beta, steps=steps, k=k)
    out = jax.block_until_ready(out)

    ref = lag_pp_mixed_reference(u, x, s, w, rho, alpha, beta,
                                 lr_decay_alpha, lr_decay_beta, steps, k)
    assert out.shape == (steps, B, L, L)
    assert jnp.allclose(out, ref, atol=1e-5, rtol=1e-4), "mismatch vs JAX reference"

    print("KERNEL_OK")
</pallas_src>

<mosaic_0001>
module attributes {stable_mosaic.version = 11 : i64} {
  func.func @_lag_pp_mixed_kernel(%arg0: i32, %arg1: i32, %arg2: memref<1xf32, #tpu.memory_space<smem>>, %arg3: memref<1xf32, #tpu.memory_space<smem>>, %arg4: memref<3xf32, #tpu.memory_space<smem>>, %arg5: memref<3xf32, #tpu.memory_space<smem>>, %arg6: memref<3xf32, #tpu.memory_space<smem>>, %arg7: memref<4x4xf32, #tpu.memory_space<vmem>>, %arg8: memref<1x128x128xf32, #tpu.memory_space<vmem>>, %arg9: memref<1x128x4xf32, #tpu.memory_space<vmem>>, %arg10: memref<1x1x128x128xf32, #tpu.memory_space<vmem>>, %arg11: memref<128x128xf32, #tpu.memory_space<vmem>>, %arg12: memref<128x128xf32, #tpu.memory_space<vmem>>, %arg13: memref<128x128xf32, #tpu.memory_space<vmem>>, %arg14: memref<128x1xf32, #tpu.memory_space<vmem>>, %arg15: memref<128x1xf32, #tpu.memory_space<vmem>>) attributes {dimension_semantics = [#tpu.dimension_semantics<parallel>, #tpu.dimension_semantics<arbitrary>], iteration_bounds = array<i64: 2, 3>, scalar_prefetch = 0 : i64, scratch_operands = 5 : i64, tpu.core_type = #tpu.core_type<tc>, window_params = [{transform_indices = @transform_0, window_bounds = array<i64: 1>}, {transform_indices = @transform_1, window_bounds = array<i64: 1>}, {transform_indices = @transform_2, window_bounds = array<i64: 3>}, {transform_indices = @transform_3, window_bounds = array<i64: 3>}, {transform_indices = @transform_4, window_bounds = array<i64: 3>}, {pipeline_mode = #tpu.pipeline_mode<synchronous>, transform_indices = @transform_5, window_bounds = array<i64: 4, 4>}, {transform_indices = @transform_6, window_bounds = array<i64: 1, 128, 128>}, {transform_indices = @transform_7, window_bounds = array<i64: 1, 128, 4>}, {transform_indices = @transform_8, window_bounds = array<i64: 1, 1, 128, 128>}]} {
    %c0 = arith.constant 0 : index
    %0 = memref.load %arg2[%c0] : memref<1xf32, #tpu.memory_space<smem>>
    %c0_i32 = arith.constant 0 : i32
    %1 = arith.cmpi eq, %arg1, %c0_i32 : i32
    %2 = arith.extui %1 : i1 to i32
    %c0_i32_0 = arith.constant 0 : i32
    %3 = arith.cmpi ne, %2, %c0_i32_0 : i32
    scf.if %3 {
      %c0_35 = arith.constant 0 : index
      %c0_36 = arith.constant 0 : index
      %c0_37 = arith.constant 0 : index
      %66 = vector.load %arg8[%c0_35, %c0_36, %c0_37] : memref<1x128x128xf32, #tpu.memory_space<vmem>>, vector<1x128x128xf32>
      %67 = vector.shape_cast %66 : vector<1x128x128xf32> to vector<128x128xf32>
      %c0_38 = arith.constant 0 : index
      %c0_39 = arith.constant 0 : index
      %c0_40 = arith.constant 0 : index
      %68 = vector.load %arg9[%c0_38, %c0_39, %c0_40] : memref<1x128x4xf32, #tpu.memory_space<vmem>>, vector<1x128x4xf32>
      %69 = vector.shape_cast %68 : vector<1x128x4xf32> to vector<128x4xf32>
      %c0_41 = arith.constant 0 : index
      %c0_42 = arith.constant 0 : index
      %70 = vector.load %arg7[%c0_41, %c0_42] : memref<4x4xf32, #tpu.memory_space<vmem>>, vector<4x4xf32>
      %cst_43 = arith.constant dense<0.000000e+00> : vector<128x4xf32>
      %71 = tpu.matmul %69, %70, %cst_43 {dimension_numbers = #tpu.dot_dimension_numbers<[1], [1], [0], [0], [0, 0, 1, 0], [], []>} : vector<128x4xf32>, vector<4x4xf32>, vector<128x4xf32> -> vector<128x4xf32>
      %cst_44 = arith.constant dense<0.000000e+00> : vector<128x128xf32>
      %72 = tpu.matmul %71, %69, %cst_44 {dimension_numbers = #tpu.dot_dimension_numbers<[1], [1], [0], [0], [0, 0, 1, 0], [], []>} : vector<128x4xf32>, vector<128x4xf32>, vector<128x128xf32> -> vector<128x128xf32>
      %73 = tpu.iota {dimensions = array<i32: 0>} : vector<128x128xi32>
      %74 = tpu.iota {dimensions = array<i32: 1>} : vector<128x128xi32>
      %75 = arith.subi %73, %74 : vector<128x128xi32>
      %76 = math.absi %75 : vector<128x128xi32>
      %c3_i32 = arith.constant 3 : i32
      %77 = vector.broadcast %c3_i32 : i32 to vector<128x128xi32>
      %78 = arith.cmpi sle, %76, %77 : vector<128x128xi32>
      %cst_45 = arith.constant 0.000000e+00 : f32
      %79 = vector.broadcast %cst_45 : f32 to vector<128x128xf32>
      %80 = arith.select %78, %79, %72 : vector<128x128xi1>, vector<128x128xf32>
      %81 = vector.broadcast %0 : f32 to vector<128x128xf32>
      %82 = arith.subf %67, %81 : vector<128x128xf32>
      %cst_46 = arith.constant 2.000000e+00 : f32
      %83 = vector.broadcast %cst_46 : f32 to vector<128x128xf32>
      %84 = arith.mulf %83, %82 : vector<128x128xf32>
      %85 = arith.negf %84 : vector<128x128xf32>
      %86 = math.exp %85 : vector<128x128xf32>
      %cst_47 = arith.constant 1.000000e+00 : f32
      %87 = vector.broadcast %cst_47 : f32 to vector<128x128xf32>
      %88 = arith.addf %87, %86 : vector<128x128xf32>
      %89 = arith.divf %87, %88 : vector<128x128xf32>
      %90 = arith.mulf %89, %67 : vector<128x128xf32>
      %91 = arith.negf %90 : vector<128x128xf32>
      %92 = math.exp %91 : vector<128x128xf32>
      %cst_48 = arith.constant 1.000000e+00 : f32
      %93 = vector.broadcast %cst_48 : f32 to vector<128x128xf32>
      %94 = arith.addf %93, %92 : vector<128x128xf32>
      %95 = arith.divf %93, %94 : vector<128x128xf32>
      %96 = vector.broadcast %0 : f32 to vector<128x128xf32>
      %97 = arith.subf %90, %96 : vector<128x128xf32>
      %cst_49 = arith.constant 2.000000e+00 : f32
      %98 = vector.broadcast %cst_49 : f32 to vector<128x128xf32>
      %99 = arith.mulf %98, %97 : vector<128x128xf32>
      %100 = arith.negf %99 : vector<128x128xf32>
      %101 = math.exp %100 : vector<128x128xf32>
      %cst_50 = arith.constant 1.000000e+00 : f32
      %102 = vector.broadcast %cst_50 : f32 to vector<128x128xf32>
      %103 = arith.addf %102, %101 : vector<128x128xf32>
      %104 = arith.divf %102, %103 : vector<128x128xf32>
      %105 = arith.mulf %95, %104 : vector<128x128xf32>
      %106 = arith.mulf %105, %105 : vector<128x128xf32>
      %107 = tpu.transpose %106, [1, 0] : vector<128x128xf32> -> vector<128x128xf32>
      %108 = arith.addf %106, %107 : vector<128x128xf32>
      %cst_51 = arith.constant 5.000000e-01 : f32
      %109 = vector.broadcast %cst_51 : f32 to vector<128x128xf32>
      %110 = arith.mulf %109, %108 : vector<128x128xf32>
      %111 = arith.mulf %110, %80 : vector<128x128xf32>
      %cst_52 = arith.constant dense<0.000000e+00> : vector<128xf32>
      %112 = vector.multi_reduction <add>, %111, %cst_52 [1] : vector<128x128xf32> to vector<128xf32>
      %113 = vector.shape_cast %112 : vector<128xf32> to vector<128x1xf32>
      %cst_53 = arith.constant 1.000000e+00 : f32
      %114 = vector.broadcast %cst_53 : f32 to vector<128x1xf32>
      %115 = arith.subf %113, %114 : vector<128x1xf32>
      %c0_54 = arith.constant 0 : index
      %116 = memref.load %arg3[%c0_54] : memref<1xf32, #tpu.memory_space<smem>>
      %cst_55 = arith.constant 0.000000e+00 : f32
      %117 = vector.broadcast %cst_55 : f32 to vector<128x1xf32>
      %118 = arith.maximumf %115, %117 : vector<128x1xf32>
      %119 = vector.broadcast %116 : f32 to vector<128x1xf32>
      %120 = arith.mulf %119, %118 : vector<128x1xf32>
      %c0_56 = arith.constant 0 : index
      %c0_57 = arith.constant 0 : index
      %121 = vector.load %arg12[%c0_56, %c0_57] : memref<128x128xf32, #tpu.memory_space<vmem>>, vector<128x128xf32>
      tpu.vector_store %arg12[%c0_56, %c0_57], %80 {strides = array<i32>} : memref<128x128xf32, #tpu.memory_space<vmem>>, vector<128x128xf32>,
      %122 = tpu.transpose %90, [1, 0] : vector<128x128xf32> -> vector<128x128xf32>
      %123 = arith.addf %90, %122 : vector<128x128xf32>
      %cst_58 = arith.constant -5.000000e-01 : f32
      %124 = vector.broadcast %cst_58 : f32 to vector<128x128xf32>
      %125 = arith.mulf %124, %123 : vector<128x128xf32>
      %c0_59 = arith.constant 0 : index
      %c0_60 = arith.constant 0 : index
      %126 = vector.load %arg11[%c0_59, %c0_60] : memref<128x128xf32, #tpu.memory_space<vmem>>, vector<128x128xf32>
      tpu.vector_store %arg11[%c0_59, %c0_60], %125 {strides = array<i32>} : memref<128x128xf32, #tpu.memory_space<vmem>>, vector<128x128xf32>,
      %c0_61 = arith.constant 0 : index
      %c0_62 = arith.constant 0 : index
      %127 = vector.load %arg13[%c0_61, %c0_62] : memref<128x128xf32, #tpu.memory_space<vmem>>, vector<128x128xf32>
      tpu.vector_store %arg13[%c0_61, %c0_62], %105 {strides = array<i32>} : memref<128x128xf32, #tpu.memory_space<vmem>>, vector<128x128xf32>,
      %c0_63 = arith.constant 0 : index
      %c0_64 = arith.constant 0 : index
      %128 = vector.load %arg14[%c0_63, %c0_64] : memref<128x1xf32, #tpu.memory_space<vmem>>, vector<128x1xf32>
      tpu.vector_store %arg14[%c0_63, %c0_64], %115 {strides = array<i32>} : memref<128x1xf32, #tpu.memory_space<vmem>>, vector<128x1xf32>,
      %c0_65 = arith.constant 0 : index
      %c0_66 = arith.constant 0 : index
      %129 = vector.load %arg15[%c0_65, %c0_66] : memref<128x1xf32, #tpu.memory_space<vmem>>, vector<128x1xf32>
      tpu.vector_store %arg15[%c0_65, %c0_66], %120 {strides = array<i32>} : memref<128x1xf32, #tpu.memory_space<vmem>>, vector<128x1xf32>,
    } else {
    }
    %4 = arith.index_cast %arg1 : i32 to index
    %5 = memref.load %arg4[%4] : memref<3xf32, #tpu.memory_space<smem>>
    %6 = arith.index_cast %arg1 : i32 to index
    %7 = memref.load %arg5[%6] : memref<3xf32, #tpu.memory_space<smem>>
    %8 = arith.index_cast %arg1 : i32 to index
    %9 = memref.load %arg6[%8] : memref<3xf32, #tpu.memory_space<smem>>
    %c0_1 = arith.constant 0 : index
    %c0_2 = arith.constant 0 : index
    %10 = vector.load %arg15[%c0_1, %c0_2] : memref<128x1xf32, #tpu.memory_space<vmem>>, vector<128x1xf32>
    %c0_3 = arith.constant 0 : index
    %c0_4 = arith.constant 0 : index
    %11 = vector.load %arg14[%c0_3, %c0_4] : memref<128x1xf32, #tpu.memory_space<vmem>>, vector<128x1xf32>
    %cst = arith.constant 2.000000e+00 : f32
    %12 = vector.broadcast %cst : f32 to vector<128x1xf32>
    %13 = arith.mulf %12, %11 : vector<128x1xf32>
    %14 = arith.negf %13 : vector<128x1xf32>
    %15 = math.exp %14 : vector<128x1xf32>
    %cst_5 = arith.constant 1.000000e+00 : f32
    %16 = vector.broadcast %cst_5 : f32 to vector<128x1xf32>
    %17 = arith.addf %16, %15 : vector<128x1xf32>
    %18 = arith.divf %16, %17 : vector<128x1xf32>
    %19 = arith.mulf %10, %18 : vector<128x1xf32>
    %c0_6 = arith.constant 0 : index
    %c0_7 = arith.constant 0 : index
    %20 = vector.load %arg11[%c0_6, %c0_7] : memref<128x128xf32, #tpu.memory_space<vmem>>, vector<128x128xf32>
    %21 = vector.broadcast %19 : vector<128x1xf32> to vector<128x128xf32>
    %22 = arith.addf %20, %21 : vector<128x128xf32>
    %23 = tpu.transpose %19, [1, 0] : vector<128x1xf32> -> vector<1x128xf32>
    %24 = vector.broadcast %23 : vector<1x128xf32> to vector<128x128xf32>
    %25 = arith.addf %22, %24 : vector<128x128xf32>
    %c0_8 = arith.constant 0 : index
    %c0_9 = arith.constant 0 : index
    %26 = vector.load %arg13[%c0_8, %c0_9] : memref<128x128xf32, #tpu.memory_space<vmem>>, vector<128x128xf32>
    %c0_10 = arith.constant 0 : index
    %c0_11 = arith.constant 0 : index
    %27 = vector.load %arg12[%c0_10, %c0_11] : memref<128x128xf32, #tpu.memory_space<vmem>>, vector<128x128xf32>
    %28 = arith.mulf %26, %27 : vector<128x128xf32>
    %29 = arith.mulf %28, %25 : vector<128x128xf32>
    %c0_12 = arith.constant 0 : index
    %c0_13 = arith.constant 0 : index
    %30 = vector.load %arg13[%c0_12, %c0_13] : memref<128x128xf32, #tpu.memory_space<vmem>>, vector<128x128xf32>
    %31 = vector.broadcast %5 : f32 to vector<128x128xf32>
    %32 = arith.mulf %31, %29 : vector<128x128xf32>
    %33 = arith.subf %30, %32 : vector<128x128xf32>
    %34 = math.absf %33 : vector<128x128xf32>
    %35 = vector.broadcast %7 : f32 to vector<128x128xf32>
    %36 = arith.subf %34, %35 : vector<128x128xf32>
    %cst_14 = arith.constant 0.000000e+00 : f32
    %37 = vector.broadcast %cst_14 : f32 to vector<128x128xf32>
    %38 = arith.maximumf %36, %37 : vector<128x128xf32>
    %cst_15 = arith.constant -1.000000e+00 : f32
    %cst_16 = arith.constant 1.000000e+00 : f32
    %39 = vector.broadcast %cst_15 : f32 to vector<128x128xf32>
    %40 = arith.maximumf %39, %38 : vector<128x128xf32>
    %41 = vector.broadcast %cst_16 : f32 to vector<128x128xf32>
    %42 = arith.minimumf %41, %40 : vector<128x128xf32>
    %43 = arith.mulf %42, %42 : vector<128x128xf32>
    %44 = tpu.transpose %43, [1, 0] : vector<128x128xf32> -> vector<128x128xf32>
    %45 = arith.addf %43, %44 : vector<128x128xf32>
    %cst_17 = arith.constant 5.000000e-01 : f32
    %46 = vector.broadcast %cst_17 : f32 to vector<128x128xf32>
    %47 = arith.mulf %46, %45 : vector<128x128xf32>
    %c0_18 = arith.constant 0 : index
    %c0_19 = arith.constant 0 : index
    %48 = vector.load %arg12[%c0_18, %c0_19] : memref<128x128xf32, #tpu.memory_space<vmem>>, vector<128x128xf32>
    %49 = arith.mulf %47, %48 : vector<128x128xf32>
    %cst_20 = arith.constant dense<0.000000e+00> : vector<128xf32>
    %50 = vector.multi_reduction <add>, %49, %cst_20 [1] : vector<128x128xf32> to vector<128xf32>
    %51 = vector.shape_cast %50 : vector<128xf32> to vector<128x1xf32>
    %cst_21 = arith.constant 1.000000e+00 : f32
    %52 = vector.broadcast %cst_21 : f32 to vector<128x1xf32>
    %53 = arith.subf %51, %52 : vector<128x1xf32>
    %c0_22 = arith.constant 0 : index
    %c0_23 = arith.constant 0 : index
    %54 = vector.load %arg13[%c0_22, %c0_23] : memref<128x128xf32, #tpu.memory_space<vmem>>, vector<128x128xf32>
    tpu.vector_store %arg13[%c0_22, %c0_23], %42 {strides = array<i32>} : memref<128x128xf32, #tpu.memory_space<vmem>>, vector<128x128xf32>,
    %c0_24 = arith.constant 0 : index
    %c0_25 = arith.constant 0 : index
    %55 = vector.load %arg14[%c0_24, %c0_25] : memref<128x1xf32, #tpu.memory_space<vmem>>, vector<128x1xf32>
    tpu.vector_store %arg14[%c0_24, %c0_25], %53 {strides = array<i32>} : memref<128x1xf32, #tpu.memory_space<vmem>>, vector<128x1xf32>,
    %c0_26 = arith.constant 0 : index
    %c0_27 = arith.constant 0 : index
    %56 = vector.load %arg15[%c0_26, %c0_27] : memref<128x1xf32, #tpu.memory_space<vmem>>, vector<128x1xf32>
    %cst_28 = arith.constant 0.000000e+00 : f32
    %57 = vector.broadcast %cst_28 : f32 to vector<128x1xf32>
    %58 = arith.maximumf %53, %57 : vector<128x1xf32>
    %59 = vector.broadcast %9 : f32 to vector<128x1xf32>
    %60 = arith.mulf %59, %58 : vector<128x1xf32>
    %61 = arith.addf %56, %60 : vector<128x1xf32>
    %c0_29 = arith.constant 0 : index
    %c0_30 = arith.constant 0 : index
    %62 = vector.load %arg15[%c0_29, %c0_30] : memref<128x1xf32, #tpu.memory_space<vmem>>, vector<128x1xf32>
    tpu.vector_store %arg15[%c0_29, %c0_30], %61 {strides = array<i32>} : memref<128x1xf32, #tpu.memory_space<vmem>>, vector<128x1xf32>,
    %c0_31 = arith.constant 0 : index
    %c0_32 = arith.constant 0 : index
    %c0_33 = arith.constant 0 : index
    %c0_34 = arith.constant 0 : index
    %63 = vector.load %arg10[%c0_31, %c0_32, %c0_33, %c0_34] : memref<1x1x128x128xf32, #tpu.memory_space<vmem>>, vector<1x1x128x128xf32>
    %64 = vector.shape_cast %63 : vector<1x1x128x128xf32> to vector<128x128xf32>
    %65 = vector.shape_cast %49 : vector<128x128xf32> to vector<1x1x128x128xf32>
    tpu.vector_store %arg10[%c0_31, %c0_32, %c0_33, %c0_34], %65 {strides = array<i32>} : memref<1x1x128x128xf32, #tpu.memory_space<vmem>>, vector<1x1x128x128xf32>,
    return
  }
  func.func @transform_0(%arg0: i32, %arg1: i32) -> i32 {
    %c0_i32 = arith.constant 0 : i32
    %c0_i32_0 = arith.constant 0 : i32
    return %c0_i32 : i32
  }
  func.func @transform_1(%arg0: i32, %arg1: i32) -> i32 {
    %c0_i32 = arith.constant 0 : i32
    %c0_i32_0 = arith.constant 0 : i32
    return %c0_i32 : i32
  }
  func.func @transform_2(%arg0: i32, %arg1: i32) -> i32 {
    %c0_i32 = arith.constant 0 : i32
    %c0_i32_0 = arith.constant 0 : i32
    return %c0_i32 : i32
  }
  func.func @transform_3(%arg0: i32, %arg1: i32) -> i32 {
    %c0_i32 = arith.constant 0 : i32
    %c0_i32_0 = arith.constant 0 : i32
    return %c0_i32 : i32
  }
  func.func @transform_4(%arg0: i32, %arg1: i32) -> i32 {
    %c0_i32 = arith.constant 0 : i32
    %c0_i32_0 = arith.constant 0 : i32
    return %c0_i32 : i32
  }
  func.func @transform_5(%arg0: i32, %arg1: i32) -> (i32, i32) {
    %c0_i32 = arith.constant 0 : i32
    %c0_i32_0 = arith.constant 0 : i32
    %c0_i32_1 = arith.constant 0 : i32
    return %c0_i32, %c0_i32_0 : i32, i32
  }
  func.func @transform_6(%arg0: i32, %arg1: i32) -> (i32, i32, i32) {
    %c0_i32 = arith.constant 0 : i32
    %c0_i32_0 = arith.constant 0 : i32
    %c0_i32_1 = arith.constant 0 : i32
    return %arg0, %c0_i32, %c0_i32_0 : i32, i32, i32
  }
  func.func @transform_7(%arg0: i32, %arg1: i32) -> (i32, i32, i32) {
    %c0_i32 = arith.constant 0 : i32
    %c0_i32_0 = arith.constant 0 : i32
    %c0_i32_1 = arith.constant 0 : i32
    return %arg0, %c0_i32, %c0_i32_0 : i32, i32, i32
  }
  func.func @transform_8(%arg0: i32, %arg1: i32) -> (i32, i32, i32, i32) {
    %c0_i32 = arith.constant 0 : i32
    %c0_i32_0 = arith.constant 0 : i32
    %c0_i32_1 = arith.constant 0 : i32
    return %arg1, %arg0, %c0_i32, %c0_i32_0 : i32, i32, i32, i32
  }
}

</mosaic_0001>

<bundles_post_ra>
// kernel: tpu_custom_call.1
= control target key start
LH: loop header
LB: loop body
LE: loop exit
PB: predicated region body
PF: predicated region fallthrough
CT: control target
= control target key end

     0   :  { %s4711_s0 = inlined_call_operand.<no memory space> [shape: f32[1], index: 0, kind: input, shape index: {}]   ;;  %s4712_s1 = inlined_call_operand.<no memory space> [shape: f32[1], index: 1, kind: input, shape index: {}]   ;;  %s4713_s2 = inlined_call_operand.vmem [shape: f32[3], index: 2, kind: input, shape index: {}]   ;;  %s4714_s3 = inlined_call_operand.vmem [shape: f32[3], index: 3, kind: input, shape index: {}]   ;;  %s4715_s4 = inlined_call_operand.vmem [shape: f32[3], index: 4, kind: input, shape index: {}]   ;;  %s4716_s5 = inlined_call_operand.vmem [shape: f32[4,4], index: 5, kind: input, shape index: {}]   ;;  %s4717_s6 = inlined_call_operand.vmem [shape: f32[2,128,128], index: 6, kind: input, shape index: {}]   ;;  %s4718_s7 = inlined_call_operand.vmem [shape: f32[2,128,4], index: 7, kind: input, shape index: {}]   ;;  %s4719_s8 = inlined_call_operand.hbm [shape: f32[3,2,128,128], index: 8, kind: output, shape index: {}]  }
   0x1   :  { %4759 = sst [smem:[#allocation54_spill]] %s4714_s3 }
   0x2   :  { %13 = sst [smem:[#allocation7]] %s4711_s0 }
   0x3   :  { %14 = sst [smem:[#allocation8]] %s4712_s1 }
   0x4   :  { %15 = vsyncpa [#allocation11], 0 }
   0x5   :  { %16 = vsyncpa [#allocation13], 0 }
   0x6   :  { %17 = vsyncpa [#allocation10], 0 }
   0x7   :  { %19 = vsyncpa [#allocation10 + $0x1], 0  ;;  %s3512_s9 = smov 0   ;;  %s3514_s10 = smov 0  }
   0x8   :  { %s3516_s11 = smov 0   ;;  %s3518_s12 = smov 0  }
   0x9   :  { %s3520_s13 = smov 0   ;;  %s3522_s14 = smov 0  }
   0xa   :  { %s3524_s0 = smov 0   ;;  %s3526_s15 = smov 0  }
   0xb LB: > { %s2544_s1 = sadd.s32 4294967295, %s3452_s15   ;;  %s2545_s16 = sadd.s32 4294967294, %s3452_s15   ;;  %s3452_s15 = sphi %s3526_s15, %s25_s15   ;;  %s3448_s0 = sphi %s3524_s0, %s4849_s0   ;;  %s3444_s14 = sphi %s3522_s14, %s4848_s14   ;;  %s3440_s13 = sphi %s3520_s13, %s4847_s13   ;;  %s3436_s12 = sphi %s3518_s12, %s4846_s12   ;;  %s3432_s11 = sphi %s3516_s11, %s4845_s11   ;;  %s3428_s10 = sphi %s3514_s10, %s4844_s10   ;;  %s3424_s9 = sphi %s3512_s9, %s4843_s9  }
   0xc   : > { %s34_s17 = sadd.s32 1, %s3444_s14  ;;  %s37_s18 = sadd.s32 1, %s3448_s0 }
   0xd   : > { %p35_p0 = scmp.ge.s32.totalorder %s34_s17, 3  ;;  %s224_s19 = sadd.s32 1, %s3432_s11 }
   0xe   : > { %p234_p1 = scmp.ne.s32.totalorder %s3432_s11, %s3428_s10  ;;  %p235_p2 = scmp.eq.s32.totalorder %s2544_s1, 5 }
   0xf   : > { %s4851_s17 = smov (%p35_p0, %s34_s17), 0  ;;  %s4853_s18 = smov (!%p35_p0, %s37_s18), %s3448_s0 }
  0x10   : > { %s219_s20 = ssub.s32 %s3444_s14, %s4851_s17  ;;  %p3564_p3 = por %p235_p2, %p234_p1 }
  0x11   : > { %p39_p4 = scmp.ge.s32.totalorder %s4853_s18, 2  ;;  %p240_p5 = scmp.ne.s32.totalorder %s3428_s10, %s3424_s9 }
  0x12   : > { %s4760_s21 = scalar_select %p3564_p3, 1, 0 }
  0x13   : > { %p241_p6 = scmp.eq.s32.totalorder %s2545_s16, 5  ;;  %p2546_p7 = scmp.ge.s32.totalorder %s3452_s15, 1 }
  0x14   : > { %s4855_s18 = smov (%p39_p4, %s4853_s18), 0  ;;  %p248_p9 = scmp.lt.s32.totalorder %s3452_s15, 7 }
  0x15   : > { %4761 = sst [smem:[#allocation19_spill]] %s4855_s18  ;;  %p3573_p8 = por %p241_p6, %p240_p5 }
  0x16   : > { %s220_s23 = ssub.s32 %s3448_s0, %s4855_s18  ;;  %p3580_p10 = pnand %p2546_p7, %p248_p9 }
  0x17   : > { %s4762_s22 = scalar_select %p3573_p8, 1, 0 }
  0x18   : > { %s221_s24 = sor.u32 %s220_s23, %s219_s20  ;;  %p3584_p12 = scmp.eq.s32.totalorder %s2544_s1, 0 }
  0x19   : > { %s4763_s25 = scalar_select %p3580_p10, 1, 0 }
  0x1a   : > { %p222_p11 = scmp.eq.s32.totalorder %s221_s24, 0  ;;  %p2955_p13 = pneg %p3580_p10 }
  0x1b   : > { %s4764_s26 = scalar_select %p3584_p12, 1, 0 }
  0x1c   : > { %s4765_s3 = sld [smem:[#allocation54_spill]]  ;;  %p3598_p0 = pnand %p3584_p12, %p2955_p13 }
  0x1d   : > { %s3594_s30 = scalar_select %p222_p11, %s3432_s11, %s224_s19  }
  0x1e   : > { %p3307_p2 = pneg %p3598_p0 }
  0x22   : > { %s278_s29 = sshll.u32 %s4765_s3, 4  ;;  %s279_s29 = int_to_ptr.vmem [resolvable:$true] %s278_s29 }
  0x23   : > { %s3305_s1 = scalar_lea.vmem %s279_s29, 16  ;;  %p3313_p6 = scmp.lt.s32.totalorder %s279_s29, %s279_s29 }
  0x24   : > { %p3306_p1 = scmp.ne.s32.totalorder %s279_s29, %s3305_s1  ;;  %p3314_p7 = scmp.lt.s32.totalorder %s3305_s1, %s3305_s1 }
  0x26   : > { %p3308_p4 = pnand %p3307_p2, %p3306_p1  ;;  %p3315_p9 = por %p3314_p7, %p3313_p6 }
  0x28   : > { %p3309_p5 = pneg %p3308_p4 }
  0x2a   : > { %p3316_p11 = pnand %p3315_p9, %p3309_p5 }
  0x2c   : > { %3319 = shalt.err (!%p3316_p11)
}
  0x2d   : > { %s3454_s19 = smov [#allocation12]   ;;  %s267_s24 = sshll.u32 %s4713_s2, 4  ;;  %s268_s24 = int_to_ptr.vmem [resolvable:$true] %s267_s24 }
  0x2e   : > { %2961 = dma.vmem_to_smem (!%p3598_p0), %s279_s29, 16, %s3454_s19, [#allocation13]  }
  0x2f   : > { %s289_s3 = sshll.u32 %s4715_s4, 4  ;;  %s3320_s18 = scalar_lea.vmem %s268_s24, 16  ;;  %s290_s3 = int_to_ptr.vmem [resolvable:$true] %s289_s3 }
  0x30   : > { %p3321_p13 = scmp.ne.s32.totalorder %s268_s24, %s3320_s18  ;;  %p3328_p5 = scmp.lt.s32.totalorder %s268_s24, %s268_s24 }
  0x31   : > { %p3329_p6 = scmp.lt.s32.totalorder %s3320_s18, %s3320_s18 }
  0x32   : > { %p3323_p1 = pnand %p3321_p13, %p3307_p2 }
  0x33   : > { %p3330_p7 = por %p3329_p6, %p3328_p5 }
  0x34   : > { %p3324_p4 = pneg %p3323_p1 }
  0x36   : > { %p3331_p9 = pnand %p3330_p7, %p3324_p4 }
  0x38   : > { %3334 = shalt.err (!%p3331_p9)
}
  0x39   : > { %s3455_s29 = smov [#allocation9]   ;;  %s3335_s1 = scalar_lea.vmem %s290_s3, 16 }
  0x3a   : > { %2958 = dma.vmem_to_smem (!%p3598_p0), %s268_s24, 16, %s3455_s29, [#allocation11]  }
  0x3b   : > { %p3336_p11 = scmp.ne.s32.totalorder %s290_s3, %s3335_s1  ;;  %p3343_p12 = scmp.lt.s32.totalorder %s290_s3, %s290_s3 }
  0x3c   : > { %p3344_p13 = scmp.lt.s32.totalorder %s3335_s1, %s3335_s1 }
  0x3d   : > { %p3338_p8 = pnand %p3336_p11, %p3307_p2 }
  0x3e   : > { %p3345_p1 = por %p3344_p13, %p3343_p12 }
  0x3f   : > { %p3339_p3 = pneg %p3338_p8 }
  0x41   : > { %p3346_p10 = pnand %p3345_p1, %p3339_p3 }
  0x43   : > { %3349 = shalt.err (!%p3346_p10)
}
  0x44   : > { %s3456_s18 = smov [#allocation14]   ;;  %p4767_p4 = scmp.ne.s32.totalorder %s4763_s25, 0 }
  0x45   : > { %2964 = dma.vmem_to_smem (!%p3598_p0), %s290_s3, 16, %s3456_s18, [#allocation13]  }
  0x46   : > { %321 = sbr.rel (%p4767_p4) target bundleno = 1324 (0x52c), region = 52 }
  0x4d   : > { %p4768_p5 = scmp.ne.s32.totalorder %s4764_s26, 0 }
  0x4f   : > { %3411 = dma.done.wait (%p4768_p5), [#allocation11], 16  }
  0x50   : > { %3413 = vsyncadd (%p4768_p5), [#allocation11], 4294967280 }
  0x51   : > { %3415 = dma.done.wait (%p4768_p5), [#allocation13], 32  }
  0x52   : > { %3417 = vsyncadd (%p4768_p5), [#allocation13], 4294967264 }
  0x53   : > { %335 = sfence }
  0x54   : > { %s4725_s3 = sand.u32 1, %s3428_s10   ;;  %p369_p3 = scmp.lt.s32.totalorder %s3440_s13, 1 }
  0x55   : > { %s2555_s25 = sshll.u32 %s4725_s3, 7  ;;  %s3639_s16 = sld [smem:[#allocation7]] }
  0x56   : > { %s370_s19 = scalar_select %p369_p3, %s3440_s13, 1 }
  0x57   : > { %s3652_s1 = scalar_lea.vmem [#allocation15], %s2555_s25  ;;  %p2560_p8 = scmp.ne.s32.totalorder %s3436_s12, 0 }
  0x58   : > { %s2744_s20 = sshll.u32 %s370_s19, 7 }
  0x59   : > { %s3645_s27 = scalar_lea.vmem %s4717_s6, %s2744_s20  ;;  %s3650_s29 = scalar_lea.vmem %s4718_s7, %s2744_s20 }
  0x5a   : > { %383 = sbr.rel (%p2560_p8) target bundleno = 740 (0x2e4), region = 68 }
  0x61   : > { %v416_v0 = vld [vmem:[%s4716_s5] sm:$0xf]  ;;  %vm417_vm0 = vcmask 31744   ;;  %v401_v2 = vld [vmem:[%s3650_s29 + $0x8] sm:$0xff]  ;;  %v402_v4 = vld [vmem:[%s3650_s29 + $0x10] sm:$0xff]  ;;  %v3766_v27 = vstv %s3639_s16  ;;  %s1451_s3 = sld [smem:[#allocation8]] }
  0x62   : > { %v400_v1 = vld [vmem:[%s3650_s29] sm:$0xff]  ;;  %2795 = vmatprep.subr.msk.mxu0 %vm417_vm0, %v416_v0  ;;  %v403_v5 = vld [vmem:[%s3650_s29 + $0x18] sm:$0xff]  ;;  %vm3668_vm1 = vmpackc.low %vm417_vm0, %vm417_vm0 }
  0x63   : > { %2797 = vmatprep.mubr.msk.f32.mxu0 %vm417_vm0, %v400_v1  ;;  %2796 = vmatpush3.xpose.msk.msra.mxu0 %vm417_vm0, %v416_v0  ;;  %v2877_v3 = vpack.c.bf16 %v401_v2, %v400_v1  ;;  %v2883_v6 = vpack.c.bf16 %v403_v5, %v402_v4  ;;  %v404_v8 = vld [vmem:[%s3650_s29 + $0x20] sm:$0xff]  ;;  %v405_v9 = vld [vmem:[%s3650_s29 + $0x28] sm:$0xff]  ;;  %v406_v10 = vld [vmem:[%s3650_s29 + $0x30] sm:$0xff] }
  0x64   : > { %v2889_v11 = vpack.c.bf16 %v405_v9, %v404_v8  ;;  %v407_v12 = vld [vmem:[%s3650_s29 + $0x38] sm:$0xff]  ;;  %v408_v13 = vld [vmem:[%s3650_s29 + $0x40] sm:$0xff]  ;;  %v409_v14 = vld [vmem:[%s3650_s29 + $0x48] sm:$0xff] }
  0x65   : > { %2879 = vmatprep.subr.msk.bf16.mxu0 %vm3668_vm1, %v2877_v3  ;;  %2925 = vmatprep.subr.msk.bf16.mxu1 %vm3668_vm1, %v2877_v3  ;;  %v410_v15 = vld [vmem:[%s3650_s29 + $0x50] sm:$0xff]  ;;  %v2895_v16 = vpack.c.bf16 %v407_v12, %v406_v10  ;;  %v411_v17 = vld [vmem:[%s3650_s29 + $0x58] sm:$0xff]  ;;  %v412_v18 = vld [vmem:[%s3650_s29 + $0x60] sm:$0xff]  ;;  %v2901_v21 = vpack.c.bf16 %v409_v14, %v408_v13 }
  0x66   : > { %2798 = vmatmul.mubr.msk.f32.vlgmr.msra.gmra.mrb[0].mxu0 %vm417_vm0, %v401_v2  ;;  %2933 = vmatpush3.bf16.xpose.msk.msra.mxu1 %vm3668_vm1, %v2877_v3  ;;  %v413_v19 = vld [vmem:[%s3650_s29 + $0x68] sm:$0xff]  ;;  %v414_v20 = vld [vmem:[%s3650_s29 + $0x70] sm:$0xff]  ;;  %v415_v22 = vld [vmem:[%s3650_s29 + $0x78] sm:$0xff]  ;;  %v2907_v23 = vpack.c.bf16 %v411_v17, %v410_v15 }
  0x67   : > { %2800 = vmatprep.mubr.msk.f32.mxu0 %vm417_vm0, %v402_v4  ;;  %2882 = vmatpush3.bf16.xpose.msk.msra.mxu0 %vm3668_vm1, %v2877_v3  ;;  %v2913_v24 = vpack.c.bf16 %v413_v19, %v412_v18  ;;  %v2919_v25 = vpack.c.bf16 %v415_v22, %v414_v20  ;;  %v3763_v26 = vld [vmem:[%s3645_s27] sm:$0xff]  ;;  %v3771_v30 = vld [vmem:[%s3645_s27 + $0x8] sm:$0xff]  ;;  %v3776_v34 = vld [vmem:[%s3645_s27 + $0x10] sm:$0xff] }
  0x68   : > { %2885 = vmatprep.subr.msk.bf16.mxu0 %vm3668_vm1, %v2883_v6  ;;  %2926 = vmatprep.subr.msk.bf16.mxu1 %vm3668_vm1, %v2883_v6  ;;  %v923_v28 = vsub.f32 %v3763_v26, %v3766_v27  ;;  %v924_v32 = vsub.f32 %v3771_v30, %v3766_v27  ;;  %v925_v36 = vsub.f32 %v3776_v34, %v3766_v27  ;;  %v3781_v38 = vld [vmem:[%s3645_s27 + $0x18] sm:$0xff]  ;;  %v3786_v42 = vld [vmem:[%s3645_s27 + $0x20] sm:$0xff]  ;;  %v3791_v48 = vld [vmem:[%s3645_s27 + $0x28] sm:$0xff] }
  0x69   : > { %v926_v40 = vsub.f32 %v3781_v38, %v3766_v27  ;;  %v927_v45 = vsub.f32 %v3786_v42, %v3766_v27  ;;  %v928_v51 = vsub.f32 %v3791_v48, %v3766_v27  ;;  %v3796_v53 = vld [vmem:[%s3645_s27 + $0x30] sm:$0xff]  ;;  %v3799_v54 = vld [vmem:[%s3645_s27 + $0x38] sm:$0xff]  ;;  %v3802_v55 = vld [vmem:[%s3645_s27 + $0x40] sm:$0xff] }
  0x6a   : > { %2801 = vmatmul.mubr.msk.f32.gmra.mrb[2].mxu0 %vm417_vm0, %v403_v5  ;;  %v2626_v29 = vmul.f32 -2.0, %v923_v28  ;;  %v2627_v33 = vmul.f32 -2.0, %v924_v32  ;;  %v2628_v37 = vmul.f32 -2.0, %v925_v36  ;;  %v929_v57 = vsub.f32 %v3796_v53, %v3766_v27  ;;  %v3809_v59 = vld [vmem:[%s3645_s27 + $0x48] sm:$0xff]  ;;  %v3812_v60 = vld [vmem:[%s3645_s27 + $0x50] sm:$0xff]  ;;  %v3815_v61 = vld [vmem:[%s3645_s27 + $0x58] sm:$0xff] }
  0x6b   : > { %2803 = vmatprep.mubr.msk.f32.mxu0 %vm417_vm0, %v404_v8  ;;  %v2629_v41 = vmul.f32 -2.0, %v926_v40  ;;  %v2630_v47 = vmul.f32 -2.0, %v927_v45  ;;  %v2631_v56 = vmul.f32 -2.0, %v928_v51  ;;  %v930_v58 = vsub.f32 %v3799_v54, %v3766_v27 }
  0x6c   : > { %v971_v31 = vmul.f32 1.442695, %v2626_v29  ;;  %v973_v35 = vmul.f32 1.442695, %v2627_v33  ;;  %v975_v39 = vmul.f32 1.442695, %v2628_v37  ;;  %v931_v62 = vsub.f32 %v3802_v55, %v3766_v27 }
  0x6d   : > { %v977_v44 = vmul.f32 1.442695, %v2629_v41  ;;  %v979_v50 = vmul.f32 1.442695, %v2630_v47  ;;  %v932_v63 = vsub.f32 %v3809_v59, %v3766_v27  ;;  %v933_v0 = vsub.f32 %v3812_v60, %v3766_v27 }
  0x6e   : > { %2804 = vmatmul.mubr.msk.f32.gmra.mrb[4].mxu0 %vm417_vm0, %v405_v9  ;;  %2934 = vmatpush3.bf16.xpose.msk.msra.mxu1 %vm3668_vm1, %v2883_v6  ;;  %3046 = vpow2.f32 %v971_v31  ;;  %v981_v2 = vmul.f32 1.442695, %v2631_v56  ;;  %v2632_v3 = vmul.f32 -2.0, %v929_v57  ;;  %v2633_v4 = vmul.f32 -2.0, %v930_v58 }
  0x6f   : > { %2806 = vmatprep.mubr.msk.f32.mxu0 %vm417_vm0, %v406_v10  ;;  %2888 = vmatpush3.bf16.xpose.msk.msra.mxu0 %vm3668_vm1, %v2883_v6  ;;  %3048 = vpow2.f32 %v973_v35  ;;  %v934_v5 = vsub.f32 %v3815_v61, %v3766_v27  ;;  %v2634_v7 = vmul.f32 -2.0, %v931_v62  ;;  %v2635_v8 = vmul.f32 -2.0, %v932_v63  ;;  %v3826_v10 = vld [vmem:[%s3645_s27 + $0x60] sm:$0xff] }
  0x70   : > { %2891 = vmatprep.subr.msk.bf16.mxu0 %vm3668_vm1, %v2889_v11  ;;  %2927 = vmatprep.subr.msk.bf16.mxu1 %vm3668_vm1, %v2889_v11  ;;  %3050 = vpow2.f32 %v975_v39  ;;  %v2636_v9 = vmul.f32 -2.0, %v933_v0 }
  0x71   : > { %3052 = vpow2.f32 %v977_v44 }
  0x72   : > { %2807 = vmatmul.mubr.msk.f32.gmra.mrb[6].mxu0 %vm417_vm0, %v407_v12  ;;  %v985_v12 = vmul.f32 1.442695, %v2633_v4 }
  0x73   : > { %2809 = vmatprep.mubr.msk.f32.mxu0 %vm417_vm0, %v408_v13  ;;  %v987_v13 = vmul.f32 1.442695, %v2634_v7 }
  0x76   : > { %2810 = vmatmul.mubr.msk.f32.gmra.mrb[8].mxu0 %vm417_vm0, %v409_v14  ;;  %2935 = vmatpush3.bf16.xpose.msk.msra.mxu1 %vm3668_vm1, %v2889_v11 }
  0x77   : > { %2812 = vmatprep.mubr.msk.f32.mxu0 %vm417_vm0, %v410_v15  ;;  %2894 = vmatpush3.bf16.xpose.msk.msra.mxu0 %vm3668_vm1, %v2889_v11  ;;  %v983_v11 = vmul.f32 1.442695, %v2632_v3  ;;  %v989_v15 = vmul.f32 1.442695, %v2635_v8 }
  0x78   : > { %2897 = vmatprep.subr.msk.bf16.mxu0 %vm3668_vm1, %v2895_v16  ;;  %2928 = vmatprep.subr.msk.bf16.mxu1 %vm3668_vm1, %v2895_v16  ;;  %v3047_v43 = vpop.eup %3046 }
  0x79   : > { %v1003_v46 = vadd.f32 1.0, %v3047_v43  ;;  %v3049_v49 = vpop.eup %3048 }
  0x7a   : > { %2813 = vmatmul.mubr.msk.f32.gmra.mrb[10].mxu0 %vm417_vm0, %v411_v17  ;;  %v1004_v52 = vadd.f32 1.0, %v3049_v49  ;;  %v3051_v1 = vpop.eup %3050  ;;  %v935_v17 = vsub.f32 %v3826_v10, %v3766_v27 }
  0x7b   : > { %2815 = vmatprep.mubr.msk.f32.mxu0 %vm417_vm0, %v412_v18  ;;  %3054 = vrcp.f32 %v1003_v46  ;;  %v1005_v6 = vadd.f32 1.0, %v3051_v1  ;;  %v3053_v14 = vpop.eup %3052 }
  0x7c   : > { %3056 = vpow2.f32 %v979_v50 }
  0x7d   : > { %3058 = vrcp.f32 %v1004_v52 }
  0x7e   : > { %2816 = vmatmul.mubr.msk.f32.gmra.mrb[12].mxu0 %vm417_vm0, %v413_v19  ;;  %2936 = vmatpush3.bf16.xpose.msk.msra.mxu1 %vm3668_vm1, %v2895_v16  ;;  %3060 = vpow2.f32 %v981_v2  ;;  %v1006_v19 = vadd.f32 1.0, %v3053_v14 }
  0x7f   : > { %2818 = vmatprep.mubr.msk.f32.mxu0 %vm417_vm0, %v414_v20  ;;  %2900 = vmatpush3.bf16.xpose.msk.msra.mxu0 %vm3668_vm1, %v2895_v16  ;;  %3062 = vrcp.f32 %v1005_v6  ;;  %v2637_v16 = vmul.f32 -2.0, %v934_v5  ;;  %v991_v20 = vmul.f32 1.442695, %v2636_v9 }
  0x80   : > { %2903 = vmatprep.subr.msk.bf16.mxu0 %vm3668_vm1, %v2901_v21  ;;  %2929 = vmatprep.subr.msk.bf16.mxu1 %vm3668_vm1, %v2901_v21  ;;  %3064 = vpow2.f32 %v983_v11 }
  0x81   : > { %3066 = vpow2.f32 %v985_v12  ;;  %v993_v28 = vmul.f32 1.442695, %v2637_v16 }
  0x82   : > { %2819 = vmatmul.mubr.msk.f32.gmra.mrb[14].mxu0 %vm417_vm0, %v415_v22  ;;  %3068 = vpow2.f32 %v987_v13  ;;  %v2638_v22 = vmul.f32 -2.0, %v935_v17 }
  0x83   : > { %3070 = vrcp.f32 %v1006_v19 }
  0x84   : > { %3072 = vpow2.f32 %v989_v15  ;;  %v995_v32 = vmul.f32 1.442695, %v2638_v22 }
  0x85   : > { %v3055_v18 = vpop.eup %3054  ;;  %3074 = vpow2.f32 %v991_v20 }
  0x86   : > { %2937 = vmatpush3.bf16.xpose.msk.msra.mxu1 %vm3668_vm1, %v2901_v21 }
  0x87   : > { %2906 = vmatpush3.bf16.xpose.msk.msra.mxu0 %vm3668_vm1, %v2901_v21  ;;  %2930 = vmatprep.subr.msk.bf16.mxu1 %vm3668_vm1, %v2907_v23  ;;  %v3831_v21 = vmul.f32 %v3055_v18, %v3763_v26 }
  0x88   : > { %2909 = vmatprep.subr.msk.bf16.mxu0 %vm3668_vm1, %v2907_v23 }
  0x8e   : > { %2938 = vmatpush3.bf16.xpose.msk.msra.mxu1 %vm3668_vm1, %v2907_v23 }
  0x8f   : > { %2912 = vmatpush3.bf16.xpose.msk.msra.mxu0 %vm3668_vm1, %v2907_v23  ;;  %2931 = vmatprep.subr.msk.bf16.mxu1 %vm3668_vm1, %v2913_v24  ;;  %v3057_v23 = vpop.eup %3056 }
  0x90   : > { %2915 = vmatprep.subr.msk.bf16.mxu0 %vm3668_vm1, %v2913_v24  ;;  %v3059_v29 = vpop.eup %3058  ;;  %v1007_v31 = vadd.f32 1.0, %v3057_v23 }
  0x91   : > { %v3837_v26 = vmul.f32 %v3059_v29, %v3771_v30  ;;  %v3061_v35 = vpop.eup %3060 }
  0x92   : > { %v3063_v40 = vpop.eup %3062  ;;  %v1008_v41 = vadd.f32 1.0, %v3061_v35 }
  0x93   : > { %v2643_v37 = vmul.f32 -1.442695, %v3837_v26  ;;  %v1164_v39 = vsub.f32 %v3837_v26, %v3766_v27  ;;  %v3065_v43 = vpop.eup %3064  ;;  %v3843_v45 = vmul.f32 %v3063_v40, %v3776_v34 }
  0x94   : > { %v3067_v30 = vpop.eup %3066  ;;  %v1009_v46 = vadd.f32 1.0, %v3065_v43 }
  0x95   : > { %v2659_v44 = vmul.f32 -2.0, %v1164_v39  ;;  %v3069_v47 = vpop.eup %3068  ;;  %v2644_v50 = vmul.f32 -1.442695, %v3843_v45  ;;  %v1165_v51 = vsub.f32 %v3843_v45, %v3766_v27  ;;  %v1010_v56 = vadd.f32 1.0, %v3067_v30 }
  0x96   : > { %2939 = vmatpush3.bf16.xpose.msk.msra.mxu1 %vm3668_vm1, %v2913_v24  ;;  %v3071_v52 = vpop.eup %3070  ;;  %v1011_v57 = vadd.f32 1.0, %v3069_v47 }
  0x97   : > { %2918 = vmatpush3.bf16.xpose.msk.msra.mxu0 %vm3668_vm1, %v2913_v24  ;;  %2932 = vmatprep.subr.msk.bf16.mxu1 %vm3668_vm1, %v2919_v25  ;;  %v2642_v24 = vmul.f32 -1.442695, %v3831_v21  ;;  %v1213_v49 = vmul.f32 1.442695, %v2659_v44  ;;  %v3073_v58 = vpop.eup %3072  ;;  %v2660_v62 = vmul.f32 -2.0, %v1165_v51  ;;  %v3849_v34 = vmul.f32 %v3071_v52, %v3781_v38 }
  0x98   : > { %2921 = vmatprep.subr.msk.bf16.mxu0 %vm3668_vm1, %v2919_v25  ;;  %v3851_v63 = vpop.eup %3074  ;;  %v1012_v6 = vadd.f32 1.0, %v3073_v58 }
  0x99   : > { %3076 = vpow2.f32 %v2642_v24  ;;  %v1215_v1 = vmul.f32 1.442695, %v2660_v62  ;;  %v2645_v2 = vmul.f32 -1.442695, %v3849_v34  ;;  %v1166_v3 = vsub.f32 %v3849_v34, %v3766_v27 }
  0x9a   : > { %3078 = vrcp.f32 %v1007_v31 }
  0x9b   : > { %3080 = vpow2.f32 %v993_v28  ;;  %v2661_v38 = vmul.f32 -2.0, %v1166_v3 }
  0x9c   : > { %3082 = vpow2.f32 %v995_v32 }
  0x9d   : > { %v1217_v12 = vmul.f32 1.442695, %v2661_v38 }
  0x9e   : > { %2940 = vmatpush3.bf16.xpose.msk.msra.mxu1 %vm3668_vm1, %v2919_v25 }
  0x9f   : > { %2924 = vmatpush3.bf16.xpose.msk.msra.mxu0 %vm3668_vm1, %v2919_v25  ;;  %v1163_v25 = vsub.f32 %v3831_v21, %v3766_v27 }
  0xa1   : > { %v2658_v33 = vmul.f32 -2.0, %v1163_v25 }
  0xa3   : > { %v1211_v36 = vmul.f32 1.442695, %v2658_v33  ;;  %v3077_v0 = vpop.eup %3076 }
  0xa4   : > { %v3079_v4 = vpop.eup %3078  ;;  %v1115_v5 = vadd.f32 1.0, %v3077_v0 }
  0xa5   : > { %3084 = vpow2.f32 %v1211_v36  ;;  %v3856_v7 = vpop.eup %3080  ;;  %v3859_v8 = vmul.f32 %v3079_v4, %v3786_v42 }
  0xa6   : > { %3086 = vpow2.f32 %v2643_v37  ;;  %v3861_v9 = vpop.eup %3082 }
  0xa7   : > { %3088 = vrcp.f32 %v1008_v41  ;;  %v1167_v13 = vsub.f32 %v3859_v8, %v3766_v27  ;;  %v2646_v16 = vmul.f32 -1.442695, %v3859_v8 }
  0xa8   : > { %3090 = vrcp.f32 %v1009_v46 }
  0xa9   : > { %3092 = vpow2.f32 %v1213_v49  ;;  %v2662_v19 = vmul.f32 -2.0, %v1167_v13 }
  0xaa   : > { %3094 = vpow2.f32 %v2644_v50 }
  0xab   : > { %3096 = vrcp.f32 %v1010_v56  ;;  %v1219_v23 = vmul.f32 1.442695, %v2662_v19  ;;  %v3899_v19 = vld [vmem:[%s3645_s27 + $0x68] sm:$0xff] }
  0xac   : > { %3098 = vrcp.f32 %v1011_v57 }
  0xad   : > { %3100 = vpow2.f32 %v1215_v1 }
  0xae   : > { %3102 = vrcp.f32 %v1115_v5 }
  0xaf   : > { %v3085_v11 = vpop.eup %3084  ;;  %3104 = vpow2.f32 %v2645_v2 }
  0xb0   : > { %v3087_v14 = vpop.eup %3086  ;;  %v1243_v15 = vadd.f32 1.0, %v3085_v11  ;;  %3106 = vrcp.f32 %v1012_v6 }
  0xb1   : > { %v3089_v17 = vpop.eup %3088  ;;  %v1116_v18 = vadd.f32 1.0, %v3087_v14  ;;  %3108 = vpow2.f32 %v1217_v12 }
  0xb2   : > { %v3091_v42 = vpop.eup %3090  ;;  %3110 = vrcp.f32 %v1243_v15  ;;  %v3867_v20 = vmul.f32 %v3089_v17, %v3791_v48 }
  0xb3   : > { %v3093_v22 = vpop.eup %3092  ;;  %3112 = vrcp.f32 %v1116_v18  ;;  %v3870_v24 = vmul.f32 %v3091_v42, %v3796_v53 }
  0xb4   : > { %v3095_v25 = vpop.eup %3094  ;;  %v1244_v28 = vadd.f32 1.0, %v3093_v22  ;;  %3114 = vpow2.f32 %v2646_v16  ;;  %v2647_v29 = vmul.f32 -1.442695, %v3867_v20  ;;  %v1168_v31 = vsub.f32 %v3867_v20, %v3766_v27 }
  0xb5   : > { %v3097_v32 = vpop.eup %3096  ;;  %v1117_v33 = vadd.f32 1.0, %v3095_v25  ;;  %3116 = vpow2.f32 %v1219_v23  ;;  %v2648_v48 = vmul.f32 -1.442695, %v3870_v24  ;;  %v1169_v35 = vsub.f32 %v3870_v24, %v3766_v27 }
  0xb6   : > { %v3099_v36 = vpop.eup %3098  ;;  %3118 = vrcp.f32 %v1244_v28  ;;  %v2663_v53 = vmul.f32 -2.0, %v1168_v31  ;;  %v3879_v37 = vmul.f32 %v3097_v32, %v3799_v54  ;;  %v3905_v28 = vld [vmem:[%s3645_s27 + $0x70] sm:$0xff] }
  0xb7   : > { %v3101_v39 = vpop.eup %3100  ;;  %3120 = vrcp.f32 %v1117_v33  ;;  %v2664_v40 = vmul.f32 -2.0, %v1169_v35  ;;  %v3882_v41 = vmul.f32 %v3099_v36, %v3802_v55  ;;  %v936_v35 = vsub.f32 %v3899_v19, %v3766_v27 }
  0xb8   : > { %v3103_v43 = vpop.eup %3102  ;;  %v1245_v44 = vadd.f32 1.0, %v3101_v39  ;;  %3122 = vpow2.f32 %v2647_v29  ;;  %v1221_v30 = vmul.f32 1.442695, %v2663_v53  ;;  %v1170_v49 = vsub.f32 %v3879_v37, %v3766_v27 }
  0xb9   : > { %4771 = vst [vmem:[#allocation20_spill] sm:$0xff] %v3882_v41  ;;  %v3105_v46 = vpop.eup %3104  ;;  %3124 = vpow2.f32 %v2648_v48  ;;  %v1223_v47 = vmul.f32 1.442695, %v2664_v40  ;;  %v1171_v51 = vsub.f32 %v3882_v41, %v3766_v27  ;;  %v2649_v55 = vmul.f32 -1.442695, %v3879_v37  ;;  %v3913_v40 = vld [vmem:[%s3645_s27 + $0x78] sm:$0xff] }
  0xba   : > { %v3107_v50 = vpop.eup %3106  ;;  %3126 = vrcp.f32 %v1245_v44  ;;  %v1118_v54 = vadd.f32 1.0, %v3105_v46  ;;  %v2665_v56 = vmul.f32 -2.0, %v1170_v49  ;;  %v2650_v11 = vmul.f32 -1.442695, %v3882_v41 }
  0xbb   : > { %v3109_v52 = vpop.eup %3108  ;;  %3128 = vpow2.f32 %v1221_v30  ;;  %v3890_v57 = vmul.f32 %v3107_v50, %v3809_v59  ;;  %v2666_v0 = vmul.f32 -2.0, %v1171_v51  ;;  %v937_v39 = vsub.f32 %v3905_v28, %v3766_v27 }
  0xbc   : > { %v3111_v58 = vpop.eup %3110  ;;  %3130 = vrcp.f32 %v1118_v54  ;;  %v1246_v62 = vadd.f32 1.0, %v3109_v52  ;;  %v1225_v3 = vmul.f32 1.442695, %v2665_v56  ;;  %v1013_v30 = vadd.f32 1.0, %v3851_v63 }
  0xbd   : > { %4772 = vst [vmem:[#allocation21_spill] sm:$0xff] %v3890_v57  ;;  %v3113_v1 = vpop.eup %3112  ;;  %v1291_v2 = vmul.f32 %v3111_v58, %v3103_v43  ;;  %3132 = vpow2.f32 %v1223_v47  ;;  %v1172_v5 = vsub.f32 %v3890_v57, %v3766_v27  ;;  %v1227_v14 = vmul.f32 1.442695, %v2666_v0 }
  0xbe   : > { %v3115_v4 = vpop.eup %3114  ;;  %3134 = vrcp.f32 %v1246_v62  ;;  %v2651_v25 = vmul.f32 -1.442695, %v3890_v57  ;;  %v2639_v54 = vmul.f32 -2.0, %v936_v35  ;;  %v938_v51 = vsub.f32 %v3913_v40, %v3766_v27 }
  0xbf   : > { %v3117_v6 = vpop.eup %3116  ;;  %v3894_v38 = vmul.f32 %v1291_v2, %v1291_v2  ;;  %1581 = vst [vmem:[#allocation4] sm:$0xff] %v1291_v2  ;;  %v1119_v59 = vadd.f32 1.0, %v3115_v4  ;;  %3136 = vpow2.f32 %v2649_v55  ;;  %v2667_v17 = vmul.f32 -2.0, %v1172_v5 }
  0xc0   : > { %v3119_v12 = vpop.eup %3118  ;;  %v1247_v13 = vadd.f32 1.0, %v3117_v6  ;;  %3138 = vpow2.f32 %v1225_v3  ;;  %v1014_v56 = vadd.f32 1.0, %v3856_v7  ;;  %v2640_v58 = vmul.f32 -2.0, %v937_v39 }
  0xc1   : > { %v3121_v15 = vpop.eup %3120  ;;  %1323 = vxpose.xlu0.b32.start [1/16] %v3894_v38, 128  ;;  %v1292_v16 = vmul.f32 %v3119_v12, %v3113_v1  ;;  %3140 = vrcp.f32 %v1119_v59  ;;  %v1229_v48 = vmul.f32 1.442695, %v2667_v17  ;;  %v1015_v1 = vadd.f32 1.0, %v3861_v9 }
  0xc2   : > { %v3123_v18 = vpop.eup %3122  ;;  %3142 = vrcp.f32 %v1247_v13  ;;  %v2641_v5 = vmul.f32 -2.0, %v938_v51  ;;  %v997_v7 = vmul.f32 1.442695, %v2639_v54 }
  0xc3   : > { %v3125_v42 = vpop.eup %3124  ;;  %v3901_v22 = vmul.f32 %v1292_v16, %v1292_v16  ;;  %1582 = vst [vmem:[#allocation4 + $0x8] sm:$0xff] %v1292_v16  ;;  %v1120_v23 = vadd.f32 1.0, %v3123_v18  ;;  %3144 = vpow2.f32 %v2650_v11 }
  0xc4   : > { %v3127_v29 = vpop.eup %3126  ;;  %v1121_v31 = vadd.f32 1.0, %v3125_v42  ;;  %3146 = vpow2.f32 %v1227_v14  ;;  %v999_v14 = vmul.f32 1.442695, %v2640_v58  ;;  %v1001_v16 = vmul.f32 1.442695, %v2641_v5 }
  0xc5   : > { %v3129_v32 = vpop.eup %3128  ;;  %1324 = vxpose.xlu0.b32.cont [2/16] %v3901_v22, 128  ;;  %v1293_v33 = vmul.f32 %v3127_v29, %v3121_v15  ;;  %3148 = vrcp.f32 %v1120_v23 }
  0xc6   : > { %v3131_v36 = vpop.eup %3130  ;;  %v1248_v53 = vadd.f32 1.0, %v3129_v32  ;;  %3150 = vrcp.f32 %v1121_v31 }
  0xc7   : > { %v3133_v43 = vpop.eup %3132  ;;  %v3915_v44 = vmul.f32 %v1293_v33, %v1293_v33  ;;  %1583 = vst [vmem:[#allocation4 + $0x10] sm:$0xff] %v1293_v33  ;;  %3152 = vpow2.f32 %v2651_v25 }
  0xc8   : > { %v3135_v46 = vpop.eup %3134  ;;  %3154 = vrcp.f32 %v1248_v53  ;;  %v1249_v47 = vadd.f32 1.0, %v3133_v43 }
  0xc9   : > { %v3137_v49 = vpop.eup %3136  ;;  %1325 = vxpose.xlu0.b32.cont [3/16] %v3915_v44, 128  ;;  %v1294_v50 = vmul.f32 %v3135_v46, %v3131_v36  ;;  %3156 = vpow2.f32 %v1229_v48 }
  0xca   : > { %v3139_v52 = vpop.eup %3138  ;;  %3158 = vrcp.f32 %v1249_v47  ;;  %v1122_v55 = vadd.f32 1.0, %v3137_v49 }
  0xcb   : > { %v3141_v62 = vpop.eup %3140  ;;  %v3922_v63 = vmul.f32 %v1294_v50, %v1294_v50  ;;  %1584 = vst [vmem:[#allocation4 + $0x18] sm:$0xff] %v1294_v50  ;;  %v1250_v0 = vadd.f32 1.0, %v3139_v52  ;;  %3160 = vrcp.f32 %v1013_v30 }
  0xcc   : > { %v3143_v2 = vpop.eup %3142  ;;  %3162 = vrcp.f32 %v1122_v55 }
  0xcd   : > { %v3145_v3 = vpop.eup %3144  ;;  %1326 = vxpose.xlu0.b32.cont [4/16] %v3922_v63, 128  ;;  %v1295_v4 = vmul.f32 %v3143_v2, %v3141_v62  ;;  %3164 = vrcp.f32 %v1250_v0 }
  0xce   : > { %v3147_v6 = vpop.eup %3146  ;;  %v1123_v59 = vadd.f32 1.0, %v3145_v3  ;;  %3166 = vrcp.f32 %v1014_v56 }
  0xcf   : > { %v3149_v11 = vpop.eup %3148  ;;  %v3926_v12 = vmul.f32 %v1295_v4, %v1295_v4  ;;  %1585 = vst [vmem:[#allocation4 + $0x20] sm:$0xff] %v1295_v4  ;;  %v1251_v13 = vadd.f32 1.0, %v3147_v6  ;;  %3168 = vrcp.f32 %v1015_v1 }
  0xd0   : > { %v3151_v9 = vpop.eup %3150  ;;  %3170 = vrcp.f32 %v1123_v59 }
  0xd1   : > { %v3153_v15 = vpop.eup %3152  ;;  %1327 = vxpose.xlu0.b32.cont [5/16] %v3926_v12, 128  ;;  %3172 = vrcp.f32 %v1251_v13 }
  0xd2   : > { %v3155_v17 = vpop.eup %3154  ;;  %v1124_v18 = vadd.f32 1.0, %v3153_v15  ;;  %3174 = vpow2.f32 %v997_v7 }
  0xd3   : > { %v3157_v42 = vpop.eup %3156  ;;  %v1296_v23 = vmul.f32 %v3155_v17, %v3149_v11  ;;  %3176 = vpow2.f32 %v999_v14 }
  0xd4   : > { %v3159_v25 = vpop.eup %3158  ;;  %3178 = vrcp.f32 %v1124_v18  ;;  %v1252_v29 = vadd.f32 1.0, %v3157_v42 }
  0xd5   : > { %v3161_v31 = vpop.eup %3160  ;;  %v3929_v32 = vmul.f32 %v1296_v23, %v1296_v23  ;;  %1586 = vst [vmem:[#allocation4 + $0x28] sm:$0xff] %v1296_v23  ;;  %v1297_v33 = vmul.f32 %v3159_v25, %v3151_v9  ;;  %3180 = vpow2.f32 %v1001_v16 }
  0xd6   : > { %v3163_v48 = vpop.eup %3162  ;;  %3182 = vrcp.f32 %v1252_v29  ;;  %v3932_v35 = vmul.f32 %v3161_v31, %v3812_v60 }
  0xd7   : > { %v3165_v36 = vpop.eup %3164  ;;  %1328 = vxpose.xlu0.b32.cont [6/16] %v3929_v32, 128  ;;  %v3935_v53 = vmul.f32 %v1297_v33, %v1297_v33  ;;  %1587 = vst [vmem:[#allocation4 + $0x30] sm:$0xff] %v1297_v33 }
  0xd8   : > { %4773 = vst [vmem:[#allocation22_spill] sm:$0xff] %v3932_v35  ;;  %v3167_v39 = vpop.eup %3166  ;;  %v1298_v43 = vmul.f32 %v3165_v36, %v3163_v48  ;;  %v2652_v30 = vmul.f32 -1.442695, %v3932_v35  ;;  %v1173_v46 = vsub.f32 %v3932_v35, %v3766_v27 }
  0xd9   : > { %v3169_v47 = vpop.eup %3168  ;;  %v3941_v49 = vmul.f32 %v3167_v39, %v3815_v61 }
  0xda   : > { %v3171_v50 = vpop.eup %3170  ;;  %1588 = vst [vmem:[#allocation4 + $0x38] sm:$0xff] %v1298_v43  ;;  %3184 = vpow2.f32 %v2652_v30  ;;  %v2668_v60 = vmul.f32 -2.0, %v1173_v46  ;;  %v3944_v54 = vmul.f32 %v3169_v47, %v3826_v10  ;;  %v3947_v52 = vmul.f32 %v1298_v43, %v1298_v43 }
  0xdb   : > { %4774 = vst [vmem:[#allocation23_spill] sm:$0xff] %v3941_v49  ;;  %v3173_v51 = vpop.eup %3172  ;;  %1329 = vxpose.xlu0.b32.cont [7/16] %v3935_v53, 128  ;;  %v2653_v55 = vmul.f32 -1.442695, %v3941_v49  ;;  %v1174_v56 = vsub.f32 %v3941_v49, %v3766_v27 }
  0xdc   : > { %4775 = vst [vmem:[#allocation24_spill] sm:$0xff] %v3944_v54  ;;  %v3175_v58 = vpop.eup %3174  ;;  %v1299_v61 = vmul.f32 %v3173_v51, %v3171_v50  ;;  %v1231_v62 = vmul.f32 1.442695, %v2668_v60  ;;  %v2654_v0 = vmul.f32 -1.442695, %v3944_v54  ;;  %v1175_v1 = vsub.f32 %v3944_v54, %v3766_v27 }
  0xdd   : > { %v3177_v10 = vpop.eup %3176  ;;  %3186 = vpow2.f32 %v2653_v55  ;;  %v2669_v2 = vmul.f32 -2.0, %v1174_v56  ;;  %v1016_v3 = vadd.f32 1.0, %v3175_v58 }
  0xde   : > { %v3179_v4 = vpop.eup %3178  ;;  %1589 = vst [vmem:[#allocation4 + $0x40] sm:$0xff] %v1299_v61  ;;  %3188 = vpow2.f32 %v1231_v62  ;;  %v2670_v5 = vmul.f32 -2.0, %v1175_v1  ;;  %v3956_v59 = vmul.f32 %v1299_v61, %v1299_v61  ;;  %v1017_v11 = vadd.f32 1.0, %v3177_v10 }
  0xdf   : > { %v3181_v6 = vpop.eup %3180  ;;  %1330 = vxpose.xlu0.b32.cont [8/16] %v3947_v52, 128  ;;  %v1233_v7 = vmul.f32 1.442695, %v2669_v2  ;;  %3190 = vpow2.f32 %v2654_v0 }
  0xe0   : > { %v3183_v13 = vpop.eup %3182  ;;  %v1235_v14 = vmul.f32 1.442695, %v2670_v5  ;;  %3192 = vrcp.f32 %v1016_v3  ;;  %v1018_v9 = vadd.f32 1.0, %v3181_v6 }
  0xe1   : > { %v1300_v15 = vmul.f32 %v3183_v13, %v3179_v4  ;;  %3194 = vpow2.f32 %v1233_v7 }
  0xe2   : > { %3196 = vpow2.f32 %v1235_v14 }
  0xe3   : > { %1331 = vxpose.xlu0.b32.cont [9/16] %v3956_v59, 128  ;;  %v3959_v16 = vmul.f32 %v1300_v15, %v1300_v15  ;;  %1590 = vst [vmem:[#allocation4 + $0x48] sm:$0xff] %v1300_v15  ;;  %3198 = vrcp.f32 %v1017_v11 }
  0xe4   : > { %v3185_v17 = vpop.eup %3184  ;;  %3200 = vrcp.f32 %v1018_v9 }
  0xe5   : > { %v1125_v18 = vadd.f32 1.0, %v3185_v17 }
  0xe7   : > { %v3187_v42 = vpop.eup %3186  ;;  %1332 = vxpose.xlu0.b32.cont [10/16] %v3959_v16, 128  ;;  %3202 = vrcp.f32 %v1125_v18 }
  0xe8   : > { %v3189_v23 = vpop.eup %3188  ;;  %v1126_v25 = vadd.f32 1.0, %v3187_v42 }
  0xe9   : > { %v3191_v29 = vpop.eup %3190  ;;  %v1253_v31 = vadd.f32 1.0, %v3189_v23 }
  0xea   : > { %v3193_v33 = vpop.eup %3192  ;;  %v1127_v48 = vadd.f32 1.0, %v3191_v29 }
  0xeb   : > { %v3195_v36 = vpop.eup %3194  ;;  %3204 = vrcp.f32 %v1253_v31  ;;  %v3963_v39 = vmul.f32 %v3193_v33, %v3899_v19 }
  0xec   : > { %v3197_v43 = vpop.eup %3196  ;;  %3206 = vrcp.f32 %v1126_v25  ;;  %v1254_v30 = vadd.f32 1.0, %v3195_v36 }
  0xed   : > { %4776 = vst [vmem:[#allocation25_spill] sm:$0xff] %v3963_v39  ;;  %v3199_v46 = vpop.eup %3198  ;;  %3208 = vrcp.f32 %v1127_v48  ;;  %v1255_v47 = vadd.f32 1.0, %v3197_v43  ;;  %v2655_v50 = vmul.f32 -1.442695, %v3963_v39  ;;  %v1176_v60 = vsub.f32 %v3963_v39, %v3766_v27 }
  0xee   : > { %v3201_v51 = vpop.eup %3200  ;;  %3210 = vrcp.f32 %v1254_v30  ;;  %v3969_v55 = vmul.f32 %v3199_v46, %v3905_v28 }
  0xef   : > { %3212 = vrcp.f32 %v1255_v47  ;;  %v2671_v56 = vmul.f32 -2.0, %v1176_v60  ;;  %v3972_v19 = vmul.f32 %v3201_v51, %v3913_v40 }
  0xf0   : > { %4777 = vst [vmem:[#allocation26_spill] sm:$0xff] %v3969_v55  ;;  %3214 = vpow2.f32 %v2655_v50  ;;  %v2656_v58 = vmul.f32 -1.442695, %v3969_v55  ;;  %v1177_v61 = vsub.f32 %v3969_v55, %v3766_v27 }
  0xf1   : > { %4778 = vst [vmem:[#allocation27_spill] sm:$0xff] %v3972_v19  ;;  %v1237_v62 = vmul.f32 1.442695, %v2671_v56  ;;  %v2657_v0 = vmul.f32 -1.442695, %v3972_v19  ;;  %v1178_v1 = vsub.f32 %v3972_v19, %v3766_v27  ;;  %v3203_v10 = vpop.eup %3202 }
  0xf2   : > { %3216 = vpow2.f32 %v2656_v58  ;;  %v2672_v28 = vmul.f32 -2.0, %v1177_v61 }
  0xf3   : > { %3218 = vpow2.f32 %v1237_v62  ;;  %v2673_v2 = vmul.f32 -2.0, %v1178_v1 }
  0xf4   : > { %v1239_v3 = vmul.f32 1.442695, %v2672_v28  ;;  %3220 = vpow2.f32 %v2657_v0 }
  0xf5   : > { %v3205_v40 = vpop.eup %3204  ;;  %v1241_v5 = vmul.f32 1.442695, %v2673_v2 }
  0xf6   : > { %v3207_v6 = vpop.eup %3206  ;;  %v1301_v11 = vmul.f32 %v3205_v40, %v3203_v10  ;;  %3222 = vpow2.f32 %v1239_v3 }
  0xf7   : > { %v3209_v13 = vpop.eup %3208  ;;  %3224 = vpow2.f32 %v1241_v5 }
  0xf8   : > { %v3211_v14 = vpop.eup %3210  ;;  %v3982_v27 = vmul.f32 %v1301_v11, %v1301_v11  ;;  %1591 = vst [vmem:[#allocation4 + $0x50] sm:$0xff] %v1301_v11 }
  0xf9   : > { %v3213_v9 = vpop.eup %3212  ;;  %v1302_v17 = vmul.f32 %v3211_v14, %v3207_v6 }
  0xfa   : > { %v3215_v18 = vpop.eup %3214  ;;  %1333 = vxpose.xlu0.b32.cont [11/16] %v3982_v27, 128  ;;  %v1303_v23 = vmul.f32 %v3213_v9, %v3209_v13 }
  0xfb   : > { %v3986_v25 = vmul.f32 %v1302_v17, %v1302_v17  ;;  %1592 = vst [vmem:[#allocation4 + $0x58] sm:$0xff] %v1302_v17  ;;  %v1128_v29 = vadd.f32 1.0, %v3215_v18 }
  0xfc   : > { %v3217_v31 = vpop.eup %3216  ;;  %1593 = vst [vmem:[#allocation4 + $0x60] sm:$0xff] %v1303_v23  ;;  %v3990_v46 = vmul.f32 %v1303_v23, %v1303_v23 }
  0xfd   : > { %v3219_v33 = vpop.eup %3218  ;;  %v1129_v36 = vadd.f32 1.0, %v3217_v31  ;;  %3226 = vrcp.f32 %v1128_v29 }
  0xfe   : > { %v3221_v43 = vpop.eup %3220  ;;  %1334 = vxpose.xlu0.b32.cont [12/16] %v3986_v25, 128  ;;  %v1256_v47 = vadd.f32 1.0, %v3219_v33 }
  0xff   : > { %v1130_v50 = vadd.f32 1.0, %v3221_v43 }
 0x100   : > { %v3223_v60 = vpop.eup %3222  ;;  %3228 = vrcp.f32 %v1256_v47 }
 0x101   : > { %v3225_v51 = vpop.eup %3224  ;;  %3230 = vrcp.f32 %v1129_v36  ;;  %v1257_v58 = vadd.f32 1.0, %v3223_v60  ;;  %v807_v60 = vlaneseq }
 0x102   : > { %1335 = vxpose.xlu0.b32.cont [13/16] %v3990_v46, 128  ;;  %3232 = vrcp.f32 %v1130_v50  ;;  %v1258_v62 = vadd.f32 1.0, %v3225_v51 }
 0x103   : > { %3234 = vrcp.f32 %v1257_v58  ;;  %v4042_v51 = vshrl.u32 %v807_v60, 7 }
 0x104   : > { %3236 = vrcp.f32 %v1258_v62 }
 0x105   : > { %v809_v58 = vadd.s32 8, %v4042_v51  ;;  %v811_v62 = vadd.s32 24, %v4042_v51 }
 0x107   : > { %v3227_v28 = vpop.eup %3226 }
 0x10a   : > { %v3229_v2 = vpop.eup %3228 }
 0x10b   : > { %v3231_v40 = vpop.eup %3230 }
 0x10c   : > { %v3233_v5 = vpop.eup %3232 }
 0x10d   : > { %v3235_v6 = vpop.eup %3234 }
 0x10e   : > { %v3237_v13 = vpop.eup %3236  ;;  %v1305_v9 = vmul.f32 %v3235_v6, %v3231_v40  ;;  %v813_v40 = vadd.s32 40, %v4042_v51  ;;  %v812_v6 = vadd.s32 32, %v4042_v51 }
 0x110   : > { %v4006_v17 = vmul.f32 %v1305_v9, %v1305_v9  ;;  %1595 = vst [vmem:[#allocation4 + $0x70] sm:$0xff] %v1305_v9 }
 0x139   : > { %v2799_v4 = vpop.f32.mrb[0].mxu0 }
 0x13a   : > { %v535_v7 = vpop.f32.mrb[1].mxu0 }
 0x13b   : > { %2853 = vmatprep.mubr.msk.f32.mxu0 %vm417_vm0, %v535_v7 }
 0x13c   : > { %2854 = vmatmul.mubr.msk.f32.vlgmr.msra.gmra.mrb[16].mxu0 %vm417_vm0, %v2799_v4  ;;  %v1304_v4 = vmul.f32 %v3229_v2, %v3227_v28 }
 0x13d   : > { %v2802_v15 = vpop.f32.mrb[2].mxu0 }
 0x13e   : > { %v545_v42 = vpop.f32.mrb[3].mxu0  ;;  %v4001_v11 = vmul.f32 %v1304_v4, %v1304_v4  ;;  %1594 = vst [vmem:[#allocation4 + $0x68] sm:$0xff] %v1304_v4 }
 0x13f   : > { %2856 = vmatprep.mubr.msk.f32.mxu0 %vm417_vm0, %v545_v42 }
 0x140   : > { %2857 = vmatmul.mubr.msk.f32.gmra.mrb[18].mxu0 %vm417_vm0, %v2802_v15  ;;  %1336 = vxpose.xlu0.b32.cont [14/16] %v4001_v11, 128  ;;  %v1306_v15 = vmul.f32 %v3237_v13, %v3233_v5  ;;  %v815_v13 = vadd.s32 56, %v4042_v51 }
 0x141   : > { %v2805_v48 = vpop.f32.mrb[4].mxu0 }
 0x142   : > { %v555_v30 = vpop.f32.mrb[5].mxu0  ;;  %1596 = vst [vmem:[#allocation4 + $0x78] sm:$0xff] %v1306_v15  ;;  %v4010_v23 = vmul.f32 %v1306_v15, %v1306_v15 }
 0x143   : > { %2859 = vmatprep.mubr.msk.f32.mxu0 %vm417_vm0, %v555_v30 }
 0x144   : > { %2860 = vmatmul.mubr.msk.f32.gmra.mrb[20].mxu0 %vm417_vm0, %v2805_v48  ;;  %1337 = vxpose.xlu0.b32.cont [15/16] %v4006_v17, 128  ;;  %4779 = vst [vmem:[#allocation28_spill] sm:$0xff] %v4010_v23 }
 0x145   : > { %v2808_v56 = vpop.f32.mrb[6].mxu0 }
 0x146   : > { %v565_v61 = vpop.f32.mrb[7].mxu0 }
 0x147   : > { %2862 = vmatprep.mubr.msk.f32.mxu1 %vm417_vm0, %v565_v61  ;;  %v4047_v61 = vand.u32 127, %v807_v60 }
 0x148   : > { %2863 = vmatmul.mubr.msk.f32.vlgmr.msra.gmra.mrb[0].mxu1 %vm417_vm0, %v2808_v56  ;;  %1338 = vxpose.xlu0.b32.end [16/16] %v4010_v23, 128 }
 0x149   : > { %v2811_v0 = vpop.f32.mrb[8].mxu0  ;;  %v826_v28 = vsub.s32 %v4042_v51, %v4047_v61  ;;  %v829_v2 = vsub.s32 %v811_v62, %v4047_v61  ;;  %v830_v62 = vsub.s32 %v812_v6, %v4047_v61 }
 0x14a   : > { %v575_v1 = vpop.f32.mrb[9].mxu0 }
 0x14b   : > { %2865 = vmatprep.mubr.msk.f32.mxu1 %vm417_vm0, %v575_v1  ;;  %v827_v1 = vsub.s32 %v809_v58, %v4047_v61  ;;  %v843_v4 = vsub.s32 0, %v826_v28  ;;  %v852_v9 = vsub.s32 0, %v829_v2 }
 0x14c   : > { %2866 = vmatmul.mubr.msk.f32.gmra.mrb[2].mxu1 %vm417_vm0, %v2811_v0  ;;  %1501 = vxpose.xlu0.b32.start [1/16] %v3831_v21, 128 }
 0x14d   : > { %v2814_v10 = vpop.f32.mrb[10].mxu0  ;;  %v2610_v60 = vmin.u32 %v843_v4, %v826_v28 }
 0x14e   : > { %v585_v3 = vpop.f32.mrb[11].mxu0 }
 0x14f   : > { %2868 = vmatprep.mubr.msk.f32.mxu1 %vm417_vm0, %v585_v3  ;;  %v846_v3 = vsub.s32 0, %v827_v1  ;;  %vm890_vm3 = vcmp.le.s32.totalorder %v2610_v60, 3 }
 0x150   : > { %2869 = vmatmul.mubr.msk.f32.gmra.mrb[4].mxu1 %vm417_vm0, %v2814_v10  ;;  %1502 = vxpose.xlu0.b32.cont [2/16] %v3837_v26, 128  ;;  %v810_v10 = vadd.s32 16, %v4042_v51 }
 0x151   : > { %v2817_v7 = vpop.f32.mrb[12].mxu0 }
 0x152   : > { %v595_v14 = vpop.f32.mrb[13].mxu0  ;;  %v828_v5 = vsub.s32 %v810_v10, %v4047_v61  ;;  %v833_v10 = vsub.s32 %v815_v13, %v4047_v61 }
 0x153   : > { %2871 = vmatprep.mubr.msk.f32.mxu1 %vm417_vm0, %v595_v14  ;;  %v814_v14 = vadd.s32 48, %v4042_v51 }
 0x154   : > { %2872 = vmatmul.mubr.msk.f32.gmra.mrb[6].mxu1 %vm417_vm0, %v2817_v7  ;;  %1503 = vxpose.xlu0.b32.cont [3/16] %v3843_v45, 128  ;;  %v849_v58 = vsub.s32 0, %v828_v5 }
 0x155   : > { %v2820_v18 = vpop.f32.mrb[14].mxu0 }
 0x156   : > { %v605_v42 = vpop.f32.mrb[15].mxu0 }
 0x157   : > { %2874 = vmatprep.mubr.msk.f32.mxu1 %vm417_vm0, %v605_v42  ;;  %v831_v42 = vsub.s32 %v813_v40, %v4047_v61  ;;  %v864_v40 = vsub.s32 0, %v833_v10 }
 0x158   : > { %2875 = vmatmul.mubr.msk.f32.gmra.mrb[8].mxu1 %vm417_vm0, %v2820_v18  ;;  %1504 = vxpose.xlu0.b32.cont [4/16] %v3849_v34, 128  ;;  %v2611_v18 = vmin.u32 %v846_v3, %v827_v1  ;;  %v816_v1 = vadd.s32 64, %v4042_v51 }
 0x15a   : > { %vm891_vm2 = vcmp.le.s32.totalorder %v2611_v18, 3 }
 0x15c   : > { %1505 = vxpose.xlu0.b32.cont [5/16] %v3859_v8, 128 }
 0x160   : > { %1506 = vxpose.xlu0.b32.cont [6/16] %v3867_v20, 128 }
 0x164   : > { %1507 = vxpose.xlu0.b32.cont [7/16] %v3870_v24, 128 }
 0x168   : > { %1508 = vxpose.xlu0.b32.cont [8/16] %v3879_v37, 128 }
 0x16c   : > { %1509 = vxpose.xlu0.b32.cont [9/16] %v3882_v41, 128 }
 0x170   : > { %1510 = vxpose.xlu0.b32.cont [10/16] %v3890_v57, 128  ;;  %v2617_v57 = vmin.u32 %v864_v40, %v833_v10 }
 0x172   : > { %vm897_vm8 = vcmp.le.s32.totalorder %v2617_v57, 3 }
 0x174   : > { %1511 = vxpose.xlu0.b32.cont [11/16] %v3932_v35, 128  ;;  %v858_v35 = vsub.s32 0, %v831_v42 }
 0x176   : > { %v2615_v18 = vmin.u32 %v858_v35, %v831_v42  ;;  %v821_v42 = vadd.s32 104, %v4042_v51 }
 0x178   : > { %1512 = vxpose.xlu0.b32.cont [12/16] %v3941_v49, 128  ;;  %vm895_vm6 = vcmp.le.s32.totalorder %v2615_v18, 3 }
 0x17c   : > { %1513 = vxpose.xlu0.b32.cont [13/16] %v3944_v54, 128 }
 0x180   : > { %1514 = vxpose.xlu0.b32.cont [14/16] %v3963_v39, 128  ;;  %v2613_v39 = vmin.u32 %v852_v9, %v829_v2  ;;  %v819_v2 = vadd.s32 88, %v4042_v51 }
 0x182   : > { %vm893_vm4 = vcmp.le.s32.totalorder %v2613_v39, 3 }
 0x184   : > { %1515 = vxpose.xlu0.b32.cont [15/16] %v3969_v55, 128  ;;  %v817_v55 = vadd.s32 72, %v4042_v51 }
 0x186   : > { %v835_v6 = vsub.s32 %v817_v55, %v4047_v61 }
 0x188   : > { %1516 = vxpose.xlu0.b32.end [16/16] %v3972_v19, 128  ;;  %v832_v19 = vsub.s32 %v814_v14, %v4047_v61  ;;  %v870_v41 = vsub.s32 0, %v835_v6 }
 0x18a   : > { %v861_v4 = vsub.s32 0, %v832_v19 }
 0x18c   : > { %v1339_v29 = vpop.trf.xlu0  ;;  %v2616_v23 = vmin.u32 %v861_v4, %v832_v19 }
 0x18d   : > { %v1355_v28 = vadd.f32 %v1339_v29, %v3894_v38  ;;  %v834_v38 = vsub.s32 %v816_v1, %v4047_v61  ;;  %v818_v29 = vadd.s32 80, %v4042_v51 }
 0x18e   : > { %vm896_vm9 = vcmp.le.s32.totalorder %v2616_v23, 3 }
 0x18f   : > { %v1371_v55 = vmul.f32 0.5, %v1355_v28  ;;  %v867_v19 = vsub.s32 0, %v834_v38  ;;  %v836_v10 = vsub.s32 %v818_v29, %v4047_v61  ;;  %v822_v29 = vadd.s32 112, %v4042_v51 }
 0x190   : > { %v1340_v31 = vpop.trf.xlu0 }
 0x191   : > { %v1356_v15 = vadd.f32 %v1340_v31, %v3901_v22  ;;  %v2612_v22 = vmin.u32 %v849_v58, %v828_v5  ;;  %v855_v31 = vsub.s32 0, %v830_v62  ;;  %v2618_v18 = vmin.u32 %v867_v19, %v834_v38 }
 0x192   : > { %v840_v57 = vsub.s32 %v822_v29, %v4047_v61 }
 0x193   : > { %v1372_v49 = vmul.f32 0.5, %v1356_v15  ;;  %vm892_vm5 = vcmp.le.s32.totalorder %v2612_v22, 3  ;;  %v2614_v60 = vmin.u32 %v855_v31, %v830_v62  ;;  %v839_v22 = vsub.s32 %v821_v42, %v4047_v61 }
 0x194   : > { %v4030_v33 = vpop.trf.xlu0  ;;  %vm898_vm11 = vcmp.le.s32.totalorder %v2618_v18, 3 }
 0x195   : > { %vm894_vm7 = vcmp.le.s32.totalorder %v2614_v60, 3 }
 0x198   : > { %v1342_v48 = vpop.trf.xlu0 }
 0x199   : > { %v1358_v15 = vadd.f32 %v1342_v48, %v3922_v63  ;;  %v1357_v63 = vadd.f32 %v4030_v33, %v3915_v44  ;;  %v837_v48 = vsub.s32 %v819_v2, %v4047_v61  ;;  %v820_v44 = vadd.s32 96, %v4042_v51 }
 0x19a   : > { %v2619_v33 = vmin.u32 %v870_v41, %v835_v6  ;;  %v873_v41 = vsub.s32 0, %v836_v10 }
 0x19b   : > { %v1374_v62 = vmul.f32 0.5, %v1358_v15  ;;  %v1373_v28 = vmul.f32 0.5, %v1357_v63  ;;  %v838_v6 = vsub.s32 %v820_v44, %v4047_v61  ;;  %v882_v63 = vsub.s32 0, %v839_v22 }
 0x19c   : > { %v4032_v36 = vpop.trf.xlu0  ;;  %vm899_vm10 = vcmp.le.s32.totalorder %v2619_v33, 3 }
 0x19d   : > { %v2623_v19 = vmin.u32 %v882_v63, %v839_v22 }
 0x19f   : > { %vm903_vm14 = vcmp.le.s32.totalorder %v2623_v19, 3 }
 0x1a0   : > { %v4034_v43 = vpop.trf.xlu0 }
 0x1a1   : > { %v1360_v2 = vadd.f32 %v4034_v43, %v3929_v32 }
 0x1a4   : > { %v4036_v30 = vpop.trf.xlu0 }
 0x1a5   : > { %v1361_v33 = vadd.f32 %v4036_v30, %v3935_v53 }
 0x1a7   : > { %v1377_v30 = vmul.f32 0.5, %v1361_v33 }
 0x1a8   : > { %v4038_v47 = vpop.trf.xlu0 }
 0x1ac   : > { %v4040_v50 = vpop.trf.xlu0 }
 0x1b0   : > { %v4044_v56 = vpop.trf.xlu0 }
 0x1b4   : > { %v4050_v0 = vpop.trf.xlu0 }
 0x1b8   : > { %v4060_v7 = vpop.trf.xlu0 }
 0x1bc   : > { %v4070_v54 = vpop.trf.xlu0 }
 0x1c0   : > { %v4079_v58 = vpop.trf.xlu0 }
 0x20f   : > { %v2855_v3 = vpop.f32.mrb[16].mxu0 }
 0x210   : > { %v907_v13 = vsel %vm891_vm2, 0.0, %v2855_v3  ;;  %v728_v14 = vpop.f32.mrb[17].mxu0  ;;  %vm1597_vm2 = vcmask 7168  }
 0x211   : > { %1486 = vst [vmem:[#allocation3 + $0x8] sm:$0xff] %v907_v13  ;;  %v906_v9 = vsel %vm890_vm3, 0.0, %v728_v14  ;;  %v1388_v5 = vmul.f32 %v1372_v49, %v907_v13  ;;  %v876_v13 = vsub.s32 0, %v837_v48  ;;  %v4090_v14 = vpop.trf.xlu0 }
 0x212   : > { %1485 = vst [vmem:[#allocation3] sm:$0xff] %v906_v9  ;;  %v1387_v1 = vmul.f32 %v1371_v55, %v906_v9 }
 0x213   : > { %v2858_v3 = vpop.f32.mrb[18].mxu0  ;;  %1405 = vadd.xlane.f32.xlu1 %v1388_v5  ;;  %v823_v5 = vadd.s32 120, %v4042_v51  ;;  %v2621_v60 = vmin.u32 %v876_v13, %v837_v48  ;;  %v2620_v51 = vmin.u32 %v873_v41, %v836_v10  ;;  %v1362_v48 = vadd.f32 %v4038_v47, %v3947_v52 }
 0x214   : > { %v909_v35 = vsel %vm893_vm4, 0.0, %v2858_v3  ;;  %v738_v49 = vpop.f32.mrb[19].mxu0  ;;  %v1359_v3 = vadd.f32 %v4032_v36, %v3926_v12 }
 0x215   : > { %1488 = vst [vmem:[#allocation3 + $0x18] sm:$0xff] %v909_v35  ;;  %v908_v31 = vsel %vm892_vm5, 0.0, %v738_v49  ;;  %v1390_v15 = vmul.f32 %v1374_v62, %v909_v35  ;;  %v1376_v35 = vmul.f32 0.5, %v1360_v2  ;;  %v841_v42 = vsub.s32 %v823_v5, %v4047_v61 }
 0x216   : > { %1487 = vst [vmem:[#allocation3 + $0x10] sm:$0xff] %v908_v31  ;;  %v1389_v49 = vmul.f32 %v1373_v28, %v908_v31  ;;  %v879_v62 = vsub.s32 0, %v838_v6  ;;  %v1375_v36 = vmul.f32 0.5, %v1359_v3  ;;  %vm901_vm12 = vcmp.le.s32.totalorder %v2621_v60, 3 }
 0x217   : > { %1403 = vadd.xlane.f32.xlu1 %v1387_v1  ;;  %v2861_v39 = vpop.f32.mrb[20].mxu0  ;;  %v4106_v1 = vpop.trf.xlu0  ;;  %vm900_vm13 = vcmp.le.s32.totalorder %v2620_v51, 3  ;;  %v885_v28 = vsub.s32 0, %v840_v57 }
 0x218   : > { %v911_v40 = vsel %vm895_vm6, 0.0, %v2861_v39  ;;  %v748_v4 = vpop.f32.mrb[21].mxu0  ;;  %v888_v39 = vsub.s32 0, %v841_v42  ;;  %v2622_v61 = vmin.u32 %v879_v62, %v838_v6 }
 0x219   : > { %1490 = vst [vmem:[#allocation3 + $0x28] sm:$0xff] %v911_v40  ;;  %v910_v9 = vsel %vm894_vm7, 0.0, %v748_v4  ;;  %v1392_v44 = vmul.f32 %v1376_v35, %v911_v40  ;;  %v1378_v40 = vmul.f32 0.5, %v1362_v48  ;;  %v2624_v41 = vmin.u32 %v885_v28, %v840_v57 }
 0x21a   : > { %1489 = vst [vmem:[#allocation3 + $0x20] sm:$0xff] %v910_v9  ;;  %v1391_v2 = vmul.f32 %v1375_v36, %v910_v9  ;;  %v2625_v5 = vmin.u32 %v888_v39, %v841_v42  ;;  %vm902_vm15 = vcmp.le.s32.totalorder %v2622_v61, 3  ;;  %v1364_v9 = vadd.f32 %v4044_v56, %v3959_v16 }
 0x21b   : > { %1409 = vadd.xlane.f32.xlu1 %v1390_v15  ;;  %v2864_v55 = vpop.f32.mrb[0].mxu1  ;;  %v1517_v4 = vpop.trf.xlu0  ;;  %vm904_vm1 = vcmp.le.s32.totalorder %v2624_v41, 3  ;;  %v1363_v16 = vadd.f32 %v4040_v50, %v3956_v59  ;;  %v1366_v59 = vadd.f32 %v4060_v7, %v3986_v25 }
 0x21c   : > { %v913_v32 = vsel %vm897_vm8, 0.0, %v2864_v55  ;;  %v758_v43 = vpop.f32.mrb[1].mxu1  ;;  %v1533_v47 = vadd.f32 %v1517_v4, %v3831_v21  ;;  %vm905_vm0 = vcmp.le.s32.totalorder %v2625_v5, 3 }
 0x21d   : > { %1492 = vst [vmem:[#allocation3 + $0x38] sm:$0xff] %v913_v32  ;;  %v4102_v38 = vsel %vm896_vm9, 0.0, %v758_v43  ;;  %v1394_v3 = vmul.f32 %v1378_v40, %v913_v32  ;;  %v1382_v19 = vmul.f32 0.5, %v1366_v59 }
 0x21e   : > { %1491 = vst [vmem:[#allocation3 + $0x30] sm:$0xff] %v4102_v38  ;;  %v1549_v18 = vmul.f32 -0.5, %v1533_v47  ;;  %v1393_v42 = vmul.f32 %v1377_v30, %v4102_v38  ;;  %v1369_v47 = vadd.f32 %v4090_v14, %v4006_v17 }
 0x21f   : > { %1407 = vadd.xlane.f32.xlu1 %v1389_v49  ;;  %v2867_v12 = vpop.f32.mrb[2].mxu1  ;;  %v1518_v21 = vpop.trf.xlu0  ;;  %v1380_v49 = vmul.f32 0.5, %v1364_v9 }
 0x220   : > { %v4112_v23 = vsel %vm899_vm10, 0.0, %v2867_v12  ;;  %v768_v31 = vpop.f32.mrb[3].mxu1  ;;  %1565 = vst [vmem:[#allocation2] sm:$0xff] %v1549_v18  ;;  %v1534_v53 = vadd.f32 %v1518_v21, %v3837_v26 }
 0x221   : > { %1494 = vst [vmem:[#allocation3 + $0x48] sm:$0xff] %v4112_v23  ;;  %v4115_v10 = vsel %vm898_vm11, 0.0, %v768_v31  ;;  %v1396_v50 = vmul.f32 %v1380_v49, %v4112_v23  ;;  %v1365_v31 = vadd.f32 %v4050_v0, %v3982_v27  ;;  %v1368_v23 = vadd.f32 %v4079_v58, %v4001_v11 }
 0x222   : > { %1493 = vst [vmem:[#allocation3 + $0x40] sm:$0xff] %v4115_v10  ;;  %v1550_v60 = vmul.f32 -0.5, %v1534_v53  ;;  %v1367_v0 = vadd.f32 %v4070_v54, %v3990_v46  ;;  %v1385_v46 = vmul.f32 0.5, %v1369_v47  ;;  %v4783_v53 = vld [vmem:[#allocation22_spill] sm:$0xff] }
 0x223   : > { %1413 = vadd.xlane.f32.xlu1 %v1392_v44  ;;  %v2870_v52 = vpop.f32.mrb[4].mxu1  ;;  %v1519_v63 = vpop.trf.xlu0  ;;  %v1381_v7 = vmul.f32 0.5, %v1365_v31 }
 0x224   : > { %v4121_v13 = vsel %vm901_vm12, 0.0, %v2870_v52  ;;  %v778_v22 = vpop.f32.mrb[5].mxu1  ;;  %1566 = vst [vmem:[#allocation2 + $0x8] sm:$0xff] %v1550_v60  ;;  %v1535_v26 = vadd.f32 %v1519_v63, %v3843_v45  ;;  %v1379_v45 = vmul.f32 0.5, %v1363_v16  ;;  %v1383_v58 = vmul.f32 0.5, %v1367_v0  ;;  %v4785_v63 = vld [vmem:[#allocation24_spill] sm:$0xff] }
 0x225   : > { %1496 = vst [vmem:[#allocation3 + $0x58] sm:$0xff] %v4121_v13  ;;  %v4124_v15 = vsel %vm900_vm13, 0.0, %v778_v22  ;;  %v1398_v61 = vmul.f32 %v1382_v19, %v4121_v13  ;;  %v4781_v22 = vld [vmem:[#allocation28_spill] sm:$0xff] }
 0x226   : > { %1495 = vst [vmem:[#allocation3 + $0x50] sm:$0xff] %v4124_v15  ;;  %v1551_v62 = vmul.f32 -0.5, %v1535_v26  ;;  %v1395_v44 = vmul.f32 %v1379_v45, %v4115_v10  ;;  %v1384_v10 = vmul.f32 0.5, %v1368_v23  ;;  %v1397_v4 = vmul.f32 %v1381_v7, %v4124_v15  ;;  %v4788_v45 = vld [vmem:[#allocation27_spill] sm:$0xff] }
 0x227   : > { %1411 = vadd.xlane.f32.xlu1 %v1391_v2  ;;  %v2873_v6 = vpop.f32.mrb[6].mxu1  ;;  %v1520_v57 = vpop.trf.xlu0  ;;  %v1370_v2 = vadd.f32 %v4106_v1, %v4781_v22 }
 0x228   : > { %v919_v29 = vsel %vm903_vm14, 0.0, %v2873_v6  ;;  %v788_v55 = vpop.f32.mrb[7].mxu1  ;;  %1567 = vst [vmem:[#allocation2 + $0x10] sm:$0xff] %v1551_v62  ;;  %v1536_v12 = vadd.f32 %v1520_v57, %v3849_v34 }
 0x229   : > { %1498 = vst [vmem:[#allocation3 + $0x68] sm:$0xff] %v919_v29  ;;  %v4131_v43 = vsel %vm902_vm15, 0.0, %v788_v55  ;;  %v1400_v33 = vmul.f32 %v1384_v10, %v919_v29  ;;  %v1386_v17 = vmul.f32 0.5, %v1370_v2  ;;  %v4784_v55 = vld [vmem:[#allocation23_spill] sm:$0xff] }
 0x22a   : > { %1497 = vst [vmem:[#allocation3 + $0x60] sm:$0xff] %v4131_v43  ;;  %v1552_v36 = vmul.f32 -0.5, %v1536_v12  ;;  %v1399_v15 = vmul.f32 %v1383_v58, %v4131_v43 }
 0x22b   : > { %1417 = vadd.xlane.f32.xlu1 %v1394_v3  ;;  %v2876_v35 = vpop.f32.mrb[8].mxu1  ;;  %v1521_v48 = vpop.trf.xlu0 }
 0x22c   : > { %v4137_v56 = vsel %vm905_vm0, 0.0, %v2876_v35  ;;  %v798_v32 = vpop.f32.mrb[9].mxu1  ;;  %1568 = vst [vmem:[#allocation2 + $0x18] sm:$0xff] %v1552_v36  ;;  %v1537_v38 = vadd.f32 %v1521_v48, %v3859_v8 }
 0x22d   : > { %1500 = vst [vmem:[#allocation3 + $0x78] sm:$0xff] %v4137_v56  ;;  %v920_v51 = vsel %vm904_vm1, 0.0, %v798_v32  ;;  %v1402_v9 = vmul.f32 %v1386_v17, %v4137_v56  ;;  %v4786_v32 = vld [vmem:[#allocation25_spill] sm:$0xff]  ;;  %v4787_v56 = vld [vmem:[#allocation26_spill] sm:$0xff] }
 0x22e   : > { %1499 = vst [vmem:[#allocation3 + $0x70] sm:$0xff] %v920_v51  ;;  %v1553_v39 = vmul.f32 -0.5, %v1537_v38  ;;  %v1401_v14 = vmul.f32 %v1385_v46, %v920_v51  ;;  %v4172_v38 = vstv %s1451_s3 }
 0x22f   : > { %1415 = vadd.xlane.f32.xlu1 %v1393_v42  ;;  %v1522_v34 = vpop.trf.xlu0 }
 0x230   : > { %1569 = vst [vmem:[#allocation2 + $0x20] sm:$0xff] %v1553_v39  ;;  %v1538_v25 = vadd.f32 %v1522_v34, %v3867_v20 }
 0x232   : > { %v1554_v28 = vmul.f32 -0.5, %v1538_v25 }
 0x233   : > { %1421 = vadd.xlane.f32.xlu1 %v1396_v50  ;;  %v1523_v8 = vpop.trf.xlu0 }
 0x234   : > { %1570 = vst [vmem:[#allocation2 + $0x28] sm:$0xff] %v1554_v28  ;;  %v1539_v27 = vadd.f32 %v1523_v8, %v3870_v24  ;;  %v4780_v24 = vld [vmem:[#allocation20_spill] sm:$0xff] }
 0x236   : > { %v1555_v52 = vmul.f32 -0.5, %v1539_v27 }
 0x237   : > { %1419 = vadd.xlane.f32.xlu1 %v1395_v44  ;;  %v1524_v20 = vpop.trf.xlu0 }
 0x238   : > { %1571 = vst [vmem:[#allocation2 + $0x30] sm:$0xff] %v1555_v52  ;;  %v1540_v11 = vadd.f32 %v1524_v20, %v3879_v37  ;;  %v4782_v37 = vld [vmem:[#allocation21_spill] sm:$0xff] }
 0x23a   : > { %v1556_v40 = vmul.f32 -0.5, %v1540_v11 }
 0x23b   : > { %1425 = vadd.xlane.f32.xlu1 %v1398_v61  ;;  %v1525_v13 = vpop.trf.xlu0 }
 0x23c   : > { %1572 = vst [vmem:[#allocation2 + $0x38] sm:$0xff] %v1556_v40  ;;  %v1541_v54 = vadd.f32 %v1525_v13, %v4780_v24 }
 0x23e   : > { %v1557_v5 = vmul.f32 -0.5, %v1541_v54 }
 0x23f   : > { %1423 = vadd.xlane.f32.xlu1 %v1397_v4  ;;  %v1526_v18 = vpop.trf.xlu0 }
 0x240   : > { %1573 = vst [vmem:[#allocation2 + $0x40] sm:$0xff] %v1557_v5  ;;  %v1542_v41 = vadd.f32 %v1526_v18, %v4782_v37 }
 0x242   : > { %v1558_v21 = vmul.f32 -0.5, %v1542_v41 }
 0x243   : > { %1429 = vadd.xlane.f32.xlu1 %v1400_v33  ;;  %v1527_v6 = vpop.trf.xlu0 }
 0x244   : > { %1574 = vst [vmem:[#allocation2 + $0x48] sm:$0xff] %v1558_v21  ;;  %v1543_v30 = vadd.f32 %v1527_v6, %v4783_v53 }
 0x246   : > { %v1559_v29 = vmul.f32 -0.5, %v1543_v30 }
 0x247   : > { %1427 = vadd.xlane.f32.xlu1 %v1399_v15  ;;  %v1528_v1 = vpop.trf.xlu0 }
 0x248   : > { %1575 = vst [vmem:[#allocation2 + $0x50] sm:$0xff] %v1559_v29  ;;  %v1544_v3 = vadd.f32 %v1528_v1, %v4784_v55 }
 0x24a   : > { %v1560_v43 = vmul.f32 -0.5, %v1544_v3 }
 0x24b   : > { %1431 = vadd.xlane.f32.xlu1 %v1401_v14  ;;  %v1529_v60 = vpop.trf.xlu0 }
 0x24c   : > { %1576 = vst [vmem:[#allocation2 + $0x58] sm:$0xff] %v1560_v43  ;;  %v1545_v35 = vadd.f32 %v1529_v60, %v4785_v63 }
 0x24e   : > { %v1561_v26 = vmul.f32 -0.5, %v1545_v35 }
 0x24f   : > { %1433 = vadd.xlane.f32.xlu1 %v1402_v9  ;;  %v1530_v16 = vpop.trf.xlu0 }
 0x250   : > { %1577 = vst [vmem:[#allocation2 + $0x60] sm:$0xff] %v1561_v26  ;;  %v1546_v49 = vadd.f32 %v1530_v16, %v4786_v32 }
 0x252   : > { %v1562_v42 = vmul.f32 -0.5, %v1546_v49 }
 0x253   : > { %v1531_v51 = vpop.trf.xlu0 }
 0x254   : > { %1578 = vst [vmem:[#allocation2 + $0x68] sm:$0xff] %v1562_v42  ;;  %v1547_v62 = vadd.f32 %v1531_v51, %v4787_v56 }
 0x256   : > { %v1563_v57 = vmul.f32 -0.5, %v1547_v62 }
 0x257   : > { %v1532_v12 = vpop.trf.xlu0 }
 0x258   : > { %1579 = vst [vmem:[#allocation2 + $0x70] sm:$0xff] %v1563_v57  ;;  %v1548_v59 = vadd.f32 %v1532_v12, %v4788_v45 }
 0x25a   : > { %v1564_v50 = vmul.f32 -0.5, %v1548_v59 }
 0x25c   : > { %1580 = vst [vmem:[#allocation2 + $0x78] sm:$0xff] %v1564_v50 }
 0x2a0   : > { %v1406_v36 = vpop.xlane.xlu1 %1405 }
 0x2a1   : > { %v2675_v48 = vadd.f32 -1.0, %v1406_v36 }
 0x2a3   : > { %v1453_v31 = vmax.f32 %v2675_v48, 0.0  ;;  %1599 = vst.msk [vmem:[#allocation5 + $0x8] sm:$0xff] %vm1597_vm2, %v2675_v48 }
 0x2a4   : > { %v1404_v19 = vpop.xlane.xlu1 %1403 }
 0x2a5   : > { %v1470_v44 = vmul.f32 %v4172_v38, %v1453_v31  ;;  %v2674_v39 = vadd.f32 -1.0, %v1404_v19 }
 0x2a7   : > { %1615 = vst.msk [vmem:[#allocation6 + $0x8] sm:$0xff] %vm1597_vm2, %v1470_v44  ;;  %v1452_v34 = vmax.f32 %v2674_v39, 0.0  ;;  %1598 = vst.msk [vmem:[#allocation5] sm:$0xff] %vm1597_vm2, %v2674_v39 }
 0x2a8   : > { %v1410_v25 = vpop.xlane.xlu1 %1409 }
 0x2a9   : > { %v1469_v7 = vmul.f32 %v4172_v38, %v1452_v34  ;;  %v2677_v23 = vadd.f32 -1.0, %v1410_v25 }
 0x2ab   : > { %1614 = vst.msk [vmem:[#allocation6] sm:$0xff] %vm1597_vm2, %v1469_v7  ;;  %v1455_v61 = vmax.f32 %v2677_v23, 0.0  ;;  %1601 = vst.msk [vmem:[#allocation5 + $0x18] sm:$0xff] %vm1597_vm2, %v2677_v23 }
 0x2ac   : > { %v1408_v28 = vpop.xlane.xlu1 %1407 }
 0x2ad   : > { %v1472_v8 = vmul.f32 %v4172_v38, %v1455_v61  ;;  %v2676_v27 = vadd.f32 -1.0, %v1408_v28 }
 0x2af   : > { %1617 = vst.msk [vmem:[#allocation6 + $0x18] sm:$0xff] %vm1597_vm2, %v1472_v8  ;;  %v1454_v0 = vmax.f32 %v2676_v27, 0.0  ;;  %1600 = vst.msk [vmem:[#allocation5 + $0x10] sm:$0xff] %vm1597_vm2, %v2676_v27 }
 0x2b0   : > { %v1414_v10 = vpop.xlane.xlu1 %1413 }
 0x2b1   : > { %v1471_v4 = vmul.f32 %v4172_v38, %v1454_v0  ;;  %v2679_v52 = vadd.f32 -1.0, %v1414_v10 }
 0x2b3   : > { %1616 = vst.msk [vmem:[#allocation6 + $0x10] sm:$0xff] %vm1597_vm2, %v1471_v4  ;;  %v1457_v20 = vmax.f32 %v2679_v52, 0.0  ;;  %1603 = vst.msk [vmem:[#allocation5 + $0x28] sm:$0xff] %vm1597_vm2, %v2679_v52 }
 0x2b4   : > { %v1412_v11 = vpop.xlane.xlu1 %1411 }
 0x2b5   : > { %v1474_v58 = vmul.f32 %v4172_v38, %v1457_v20  ;;  %v2678_v47 = vadd.f32 -1.0, %v1412_v11 }
 0x2b7   : > { %1619 = vst.msk [vmem:[#allocation6 + $0x28] sm:$0xff] %vm1597_vm2, %v1474_v58  ;;  %v1456_v33 = vmax.f32 %v2678_v47, 0.0  ;;  %1602 = vst.msk [vmem:[#allocation5 + $0x20] sm:$0xff] %vm1597_vm2, %v2678_v47 }
 0x2b8   : > { %v1418_v40 = vpop.xlane.xlu1 %1417 }
 0x2b9   : > { %v1473_v13 = vmul.f32 %v4172_v38, %v1456_v33  ;;  %v2681_v24 = vadd.f32 -1.0, %v1418_v40 }
 0x2bb   : > { %1618 = vst.msk [vmem:[#allocation6 + $0x20] sm:$0xff] %vm1597_vm2, %v1473_v13  ;;  %v1459_v54 = vmax.f32 %v2681_v24, 0.0  ;;  %1605 = vst.msk [vmem:[#allocation5 + $0x38] sm:$0xff] %vm1597_vm2, %v2681_v24 }
 0x2bc   : > { %v1416_v46 = vpop.xlane.xlu1 %1415 }
 0x2bd   : > { %v1476_v22 = vmul.f32 %v4172_v38, %v1459_v54  ;;  %v2680_v2 = vadd.f32 -1.0, %v1416_v46 }
 0x2bf   : > { %1621 = vst.msk [vmem:[#allocation6 + $0x38] sm:$0xff] %vm1597_vm2, %v1476_v22  ;;  %v1458_v15 = vmax.f32 %v2680_v2, 0.0  ;;  %1604 = vst.msk [vmem:[#allocation5 + $0x30] sm:$0xff] %vm1597_vm2, %v2680_v2 }
 0x2c0   : > { %v1422_v5 = vpop.xlane.xlu1 %1421 }
 0x2c1   : > { %v1475_v18 = vmul.f32 %v4172_v38, %v1458_v15  ;;  %v2683_v37 = vadd.f32 -1.0, %v1422_v5 }
 0x2c3   : > { %1620 = vst.msk [vmem:[#allocation6 + $0x30] sm:$0xff] %vm1597_vm2, %v1475_v18  ;;  %v1461_v41 = vmax.f32 %v2683_v37, 0.0  ;;  %1607 = vst.msk [vmem:[#allocation5 + $0x48] sm:$0xff] %vm1597_vm2, %v2683_v37 }
 0x2c4   : > { %v1420_v17 = vpop.xlane.xlu1 %1419 }
 0x2c5   : > { %v1478_v14 = vmul.f32 %v4172_v38, %v1461_v41  ;;  %v2682_v21 = vadd.f32 -1.0, %v1420_v17 }
 0x2c7   : > { %1623 = vst.msk [vmem:[#allocation6 + $0x48] sm:$0xff] %vm1597_vm2, %v1478_v14  ;;  %v1460_v6 = vmax.f32 %v2682_v21, 0.0  ;;  %1606 = vst.msk [vmem:[#allocation5 + $0x40] sm:$0xff] %vm1597_vm2, %v2682_v21 }
 0x2c8   : > { %v1426_v53 = vpop.xlane.xlu1 %1425 }
 0x2c9   : > { %v1477_v30 = vmul.f32 %v4172_v38, %v1460_v6  ;;  %v2685_v9 = vadd.f32 -1.0, %v1426_v53 }
 0x2cb   : > { %1622 = vst.msk [vmem:[#allocation6 + $0x40] sm:$0xff] %vm1597_vm2, %v1477_v30  ;;  %v1463_v29 = vmax.f32 %v2685_v9, 0.0  ;;  %1609 = vst.msk [vmem:[#allocation5 + $0x58] sm:$0xff] %vm1597_vm2, %v2685_v9 }
 0x2cc   : > { %v1424_v1 = vpop.xlane.xlu1 %1423 }
 0x2cd   : > { %v1480_v55 = vmul.f32 %v4172_v38, %v1463_v29  ;;  %v2684_v3 = vadd.f32 -1.0, %v1424_v1 }
 0x2cf   : > { %1625 = vst.msk [vmem:[#allocation6 + $0x58] sm:$0xff] %vm1597_vm2, %v1480_v55  ;;  %v1462_v43 = vmax.f32 %v2684_v3, 0.0  ;;  %1608 = vst.msk [vmem:[#allocation5 + $0x50] sm:$0xff] %vm1597_vm2, %v2684_v3 }
 0x2d0   : > { %v1430_v60 = vpop.xlane.xlu1 %1429 }
 0x2d1   : > { %v1479_v63 = vmul.f32 %v4172_v38, %v1462_v43  ;;  %v2687_v35 = vadd.f32 -1.0, %v1430_v60 }
 0x2d3   : > { %1624 = vst.msk [vmem:[#allocation6 + $0x50] sm:$0xff] %vm1597_vm2, %v1479_v63  ;;  %v1465_v26 = vmax.f32 %v2687_v35, 0.0  ;;  %1611 = vst.msk [vmem:[#allocation5 + $0x68] sm:$0xff] %vm1597_vm2, %v2687_v35 }
 0x2d4   : > { %v1428_v16 = vpop.xlane.xlu1 %1427 }
 0x2d5   : > { %v1482_v32 = vmul.f32 %v4172_v38, %v1465_v26  ;;  %v2686_v49 = vadd.f32 -1.0, %v1428_v16 }
 0x2d7   : > { %1627 = vst.msk [vmem:[#allocation6 + $0x68] sm:$0xff] %vm1597_vm2, %v1482_v32  ;;  %v1464_v42 = vmax.f32 %v2686_v49, 0.0  ;;  %1610 = vst.msk [vmem:[#allocation5 + $0x60] sm:$0xff] %vm1597_vm2, %v2686_v49 }
 0x2d8   : > { %v1432_v51 = vpop.xlane.xlu1 %1431 }
 0x2d9   : > { %v1481_v56 = vmul.f32 %v4172_v38, %v1464_v42  ;;  %v2688_v62 = vadd.f32 -1.0, %v1432_v51 }
 0x2db   : > { %1626 = vst.msk [vmem:[#allocation6 + $0x60] sm:$0xff] %vm1597_vm2, %v1481_v56  ;;  %v1466_v57 = vmax.f32 %v2688_v62, 0.0  ;;  %1612 = vst.msk [vmem:[#allocation5 + $0x70] sm:$0xff] %vm1597_vm2, %v2688_v62 }
 0x2dc   : > { %v1434_v12 = vpop.xlane.xlu1 %1433 }
 0x2dd   : > { %v1483_v45 = vmul.f32 %v4172_v38, %v1466_v57  ;;  %v2689_v59 = vadd.f32 -1.0, %v1434_v12 }
 0x2df   : > { %1628 = vst.msk [vmem:[#allocation6 + $0x70] sm:$0xff] %vm1597_vm2, %v1483_v45  ;;  %v1467_v50 = vmax.f32 %v2689_v59, 0.0  ;;  %1613 = vst.msk [vmem:[#allocation5 + $0x78] sm:$0xff] %vm1597_vm2, %v2689_v59 }
 0x2e1   : > { %v1484_v36 = vmul.f32 %v4172_v38, %v1467_v50 }
 0x2e3   : > { %1629 = vst.msk [vmem:[#allocation6 + $0x78] sm:$0xff] %vm1597_vm2, %v1484_v36 }
 0x2e4 PF: > { %v1649_v48 = vld [vmem:[#allocation5] sm:$0xff]  ;;  %v3457_v31 = vmov 0   ;;  %v1650_v44 = vld [vmem:[#allocation5 + $0x8] sm:$0xff]  ;;  %v1655_v7 = vld [vmem:[#allocation5 + $0x30] sm:$0xff]  ;;  %s4270_s25 = sld [smem:[#allocation9 + %s3436_s12]]  ;;  %s2739_s19 = sshll.u32 %s3440_s13, 4 }
 0x2e5   : > { %3238 = vset.pattern.permute.xlu0 %v3457_v31  ;;  %v2690_v19 = vmul.f32 -2.0, %v1649_v48  ;;  %v1653_v39 = vld [vmem:[#allocation5 + $0x20] sm:$0xff]  ;;  %3239 = vset.pattern.permute.xlu1 %v3457_v31  ;;  %v2691_v34 = vmul.f32 -2.0, %v1650_v44  ;;  %v2696_v61 = vmul.f32 -2.0, %v1655_v7  ;;  %v1659_v8 = vld [vmem:[#allocation5 + $0x50] sm:$0xff]  ;;  %v1652_v47 = vld [vmem:[#allocation5 + $0x18] sm:$0xff] }
 0x2e6   : > { %v2694_v25 = vmul.f32 -2.0, %v1653_v39  ;;  %v1657_v28 = vld [vmem:[#allocation5 + $0x40] sm:$0xff]  ;;  %v2700_v10 = vmul.f32 -2.0, %v1659_v8  ;;  %v1651_v20 = vld [vmem:[#allocation5 + $0x10] sm:$0xff]  ;;  %v1654_v33 = vld [vmem:[#allocation5 + $0x28] sm:$0xff]  ;;  %v2693_v13 = vmul.f32 -2.0, %v1652_v47 }
 0x2e7   : > { %v1697_v23 = vmul.f32 1.442695, %v2690_v19  ;;  %v1699_v27 = vmul.f32 1.442695, %v2691_v34  ;;  %v2698_v38 = vmul.f32 -2.0, %v1657_v28  ;;  %v2692_v58 = vmul.f32 -2.0, %v1651_v20 }
 0x2e8   : > { %v1705_v0 = vmul.f32 1.442695, %v2694_v25  ;;  %v1709_v4 = vmul.f32 1.442695, %v2696_v61  ;;  %v1717_v11 = vmul.f32 1.442695, %v2700_v10 }
 0x2e9   : > { %3240 = vpow2.f32 %v1697_v23  ;;  %v1713_v52 = vmul.f32 1.442695, %v2698_v38  ;;  %v1661_v40 = vld [vmem:[#allocation5 + $0x60] sm:$0xff]  ;;  %v2695_v24 = vmul.f32 -2.0, %v1654_v33  ;;  %v1656_v54 = vld [vmem:[#allocation5 + $0x38] sm:$0xff]  ;;  %v1658_v2 = vld [vmem:[#allocation5 + $0x48] sm:$0xff] }
 0x2ea   : > { %3242 = vpow2.f32 %v1699_v27  ;;  %v1701_v46 = vmul.f32 1.442695, %v2692_v58  ;;  %v2697_v22 = vmul.f32 -2.0, %v1656_v54  ;;  %v1703_v15 = vmul.f32 1.442695, %v2693_v13  ;;  %v1663_v37 = vld [vmem:[#allocation5 + $0x70] sm:$0xff] }
 0x2eb   : > { %3244 = vpow2.f32 %v1705_v0  ;;  %v1707_v5 = vmul.f32 1.442695, %v2695_v24  ;;  %v2702_v18 = vmul.f32 -2.0, %v1661_v40  ;;  %v2699_v17 = vmul.f32 -2.0, %v1658_v2  ;;  %v1660_v60 = vld [vmem:[#allocation5 + $0x58] sm:$0xff]  ;;  %v1662_v26 = vld [vmem:[#allocation5 + $0x68] sm:$0xff] }
 0x2ec   : > { %3246 = vpow2.f32 %v1709_v4  ;;  %v1711_v41 = vmul.f32 1.442695, %v2697_v22  ;;  %v2704_v30 = vmul.f32 -2.0, %v1663_v37  ;;  %v1664_v32 = vld [vmem:[#allocation5 + $0x78] sm:$0xff]  ;;  %v2701_v42 = vmul.f32 -2.0, %v1660_v60  ;;  %v1633_v36 = vld [vmem:[#allocation6] sm:$0xff] }
 0x2ed   : > { %3248 = vpow2.f32 %v1713_v52  ;;  %v1721_v53 = vmul.f32 1.442695, %v2702_v18  ;;  %v1715_v1 = vmul.f32 1.442695, %v2699_v17  ;;  %v2703_v57 = vmul.f32 -2.0, %v1662_v26  ;;  %v1634_v39 = vld [vmem:[#allocation6 + $0x8] sm:$0xff] }
 0x2ee   : > { %3250 = vpow2.f32 %v1717_v11  ;;  %v1725_v43 = vmul.f32 1.442695, %v2704_v30  ;;  %v2705_v50 = vmul.f32 -2.0, %v1664_v32  ;;  %v1719_v19 = vmul.f32 1.442695, %v2701_v42  ;;  %v1637_v38 = vld [vmem:[#allocation6 + $0x20] sm:$0xff] }
 0x2ef   : > { %3252 = vpow2.f32 %v1701_v46  ;;  %v1723_v34 = vmul.f32 1.442695, %v2703_v57  ;;  %v4227_v52 = vld [vmem:[#allocation6 + $0x10] sm:$0xff]  ;;  %v4232_v40 = vld [vmem:[#allocation6 + $0x18] sm:$0xff]  ;;  %v1641_v18 = vld [vmem:[#allocation6 + $0x40] sm:$0xff]  ;;  %s4275_s16 = sld [smem:[#allocation12 + %s3436_s12]] }
 0x2f0   : > { %3254 = vpow2.f32 %v1703_v15  ;;  %v1727_v23 = vmul.f32 1.442695, %v2705_v50  ;;  %4789 = vst [vmem:[#allocation29_spill] sm:$0xff] %v4227_v52  ;;  %v1639_v33 = vld [vmem:[#allocation6 + $0x30] sm:$0xff]  ;;  %4790 = vst [vmem:[#allocation30_spill] sm:$0xff] %v4232_v40  ;;  %v4237_v37 = vld [vmem:[#allocation6 + $0x28] sm:$0xff] }
 0x2f1   : > { %3256 = vpow2.f32 %v1707_v5  ;;  %4791 = vst [vmem:[#allocation31_spill] sm:$0xff] %v4237_v37  ;;  %v4243_v26 = vld [vmem:[#allocation6 + $0x48] sm:$0xff]  ;;  %v1647_v42 = vld [vmem:[#allocation6 + $0x70] sm:$0xff]  ;;  %s2740_s20 = sshll.u32 %s3436_s12, 5  ;;  %s2425_s23 = sshll.u32 %s3652_s1, 4  ;;  %s4594_s23 = int_to_ptr.vmem [resolvable:$true] %s2425_s23 }
 0x2f2   : > { %3258 = vpow2.f32 %v1711_v41  ;;  %4793 = vst [vmem:[#allocation33_spill] sm:$0xff] %v4243_v26  ;;  %s2422_s24 = sadd.s32 %s2740_s20, %s2739_s19  ;;  %s4834_s18 = sand.u32 1, %s3428_s10  }
 0x2f3   : > { %v3241_v14 = vpop.eup %3240  ;;  %s2741_s27 = sshll.u32 %s2422_s24, 7  ;;  %s4603_s3 = scalar_lea.sflag [#allocation10], %s4834_s18 }
 0x2f4   : > { %v3243_v21 = vpop.eup %3242  ;;  %v1729_v6 = vadd.f32 1.0, %v3241_v14  ;;  %s4599_s29 = scalar_lea.hbm %s4719_s8, %s2741_s27  ;;  %p4835_p12 = scmp.ne.s32.totalorder %s4760_s21, 0 }
 0x2f5   : > { %v3245_v9 = vpop.eup %3244  ;;  %v1730_v29 = vadd.f32 1.0, %v3243_v21  ;;  %s3458_s13 = smov [#allocation15]  }
 0x2f6   : > { %v3247_v55 = vpop.eup %3246  ;;  %3260 = vrcp.f32 %v1729_v6  ;;  %v1733_v3 = vadd.f32 1.0, %v3245_v9 }
 0x2f7   : > { %3262 = vrcp.f32 %v1730_v29  ;;  %v3249_v63 = vpop.eup %3248  ;;  %v1735_v35 = vadd.f32 1.0, %v3247_v55  ;;  %v1643_v29 = vld [vmem:[#allocation6 + $0x50] sm:$0xff] }
 0x2f8   : > { %3264 = vpow2.f32 %v1721_v53  ;;  %v3251_v16 = vpop.eup %3250  ;;  %v1737_v56 = vadd.f32 1.0, %v3249_v63 }
 0x2f9   : > { %3266 = vpow2.f32 %v1715_v1  ;;  %v3253_v49 = vpop.eup %3252  ;;  %v1739_v45 = vadd.f32 1.0, %v3251_v16  ;;  %v4240_v1 = vld [vmem:[#allocation6 + $0x38] sm:$0xff] }
 0x2fa   : > { %3268 = vrcp.f32 %v1733_v3  ;;  %v3255_v51 = vpop.eup %3254  ;;  %v1731_v62 = vadd.f32 1.0, %v3253_v49  ;;  %4792 = vst [vmem:[#allocation32_spill] sm:$0xff] %v4240_v1 }
 0x2fb   : > { %3270 = vpow2.f32 %v1725_v43  ;;  %v3257_v12 = vpop.eup %3256  ;;  %v1732_v59 = vadd.f32 1.0, %v3255_v51  ;;  %v1644_v51 = vld [vmem:[#allocation6 + $0x58] sm:$0xff] }
 0x2fc   : > { %3272 = vrcp.f32 %v1735_v35  ;;  %v1734_v48 = vadd.f32 1.0, %v3257_v12  ;;  %v3259_v31 = vpop.eup %3258  ;;  %v1645_v35 = vld [vmem:[#allocation6 + $0x60] sm:$0xff] }
 0x2fd   : > { %3274 = vrcp.f32 %v1731_v62  ;;  %v1736_v28 = vadd.f32 1.0, %v3259_v31 }
 0x2fe   : > { %3276 = vrcp.f32 %v1732_v59 }
 0x2ff   : > { %3278 = vrcp.f32 %v1737_v56 }
 0x300   : > { %v3261_v44 = vpop.eup %3260  ;;  %3280 = vrcp.f32 %v1739_v45  ;;  %v1646_v45 = vld [vmem:[#allocation6 + $0x68] sm:$0xff] }
 0x301   : > { %v3263_v25 = vpop.eup %3262  ;;  %v4222_v7 = vmul.f32 %v3261_v44, %v1633_v36  ;;  %3282 = vrcp.f32 %v1734_v48  ;;  %v1648_v36 = vld [vmem:[#allocation6 + $0x78] sm:$0xff] }
 0x302   : > { %v3265_v61 = vpop.eup %3264  ;;  %v4225_v27 = vmul.f32 %v3263_v25, %v1634_v39  ;;  %3284 = vpow2.f32 %v1719_v19 }
 0x303   : > { %v3267_v8 = vpop.eup %3266  ;;  %1811 = vperm.xlu0 %3238, %v4222_v7   ;;  %3286 = vpow2.f32 %v1723_v34  ;;  %v1741_v10 = vadd.f32 1.0, %v3265_v61 }
 0x304   : > { %v3269_v0 = vpop.eup %3268  ;;  %3288 = vpow2.f32 %v1727_v23  ;;  %v1738_v20 = vadd.f32 1.0, %v3267_v8  ;;  %v1937_v8 = vlaneseq }
 0x305   : > { %v3271_v4 = vpop.eup %3270  ;;  %3290 = vrcp.f32 %v1736_v28  ;;  %v4230_v58 = vmul.f32 %v3269_v0, %v1637_v38  ;;  %v4279_v38 = vld [vmem:[#allocation4] sm:$0xff] }
 0x306   : > { %v3273_v11 = vpop.eup %3272  ;;  %3292 = vrcp.f32 %v1741_v10  ;;  %v1743_v46 = vadd.f32 1.0, %v3271_v4  ;;  %v4281_v10 = vld [vmem:[#allocation3] sm:$0xff]  ;;  %v4283_v4 = vld [vmem:[#allocation4 + $0x8] sm:$0xff] }
 0x307   : > { %1816 = vperm.xlu0 %3238, %v4225_v27   ;;  %v3275_v47 = vpop.eup %3274  ;;  %3294 = vrcp.f32 %v1738_v20  ;;  %v1783_v2 = vmul.f32 %v3273_v11, %v1639_v33  ;;  %4794 = vst [vmem:[#allocation34_spill] sm:$0xff] %v4281_v10  ;;  %v4285_v20 = vld [vmem:[#allocation3 + $0x8] sm:$0xff]  ;;  %v4287_v11 = vld [vmem:[#allocation4 + $0x10] sm:$0xff]  ;;  %v4293_v33 = vld [vmem:[#allocation4 + $0x18] sm:$0xff] }
 0x308   : > { %v3277_v13 = vpop.eup %3276  ;;  %v1779_v24 = vmul.f32 %v3275_v47, %v4227_v52  ;;  %3296 = vrcp.f32 %v1743_v46  ;;  %4795 = vst [vmem:[#allocation35_spill] sm:$0xff] %v4285_v20  ;;  %v4291_v47 = vshrl.u32 %v1937_v8, 7  ;;  %v4301_v46 = vld [vmem:[#allocation4 + $0x28] sm:$0xff]  ;;  %v1800_v8 = vld [vmem:[#allocation2 + $0x38] sm:$0xff] }
 0x309   : > { %v3279_v54 = vpop.eup %3278  ;;  %v1780_v15 = vmul.f32 %v3277_v13, %v4232_v40  ;;  %v4295_v13 = vld [vmem:[#allocation3 + $0x18] sm:$0xff] }
 0x30a   : > { %v3281_v22 = vpop.eup %3280  ;;  %1821 = vperm.xlu1 %3239, %v1779_v24   ;;  %v1785_v6 = vmul.f32 %v3279_v54, %v1641_v18  ;;  %4797 = vst [vmem:[#allocation37_spill] sm:$0xff] %v4295_v13  ;;  %v4299_v54 = vld [vmem:[#allocation3 + $0x20] sm:$0xff]  ;;  %v4311_v18 = vld [vmem:[#allocation3 + $0x38] sm:$0xff] }
 0x30b   : > { %1831 = vperm.xlu0 %3238, %v4230_v58   ;;  %v3283_v5 = vpop.eup %3282  ;;  %v1787_v43 = vmul.f32 %v3281_v22, %v1643_v29  ;;  %4798 = vst [vmem:[#allocation38_spill] sm:$0xff] %v4299_v54  ;;  %v4303_v22 = vld [vmem:[#allocation3 + $0x28] sm:$0xff]  ;;  %4801 = vst [vmem:[#allocation41_spill] sm:$0xff] %v4311_v18  ;;  %v4325_v29 = vld [vmem:[#allocation4 + $0x58] sm:$0xff] }
 0x30c   : > { %v3285_v41 = vpop.eup %3284  ;;  %v1782_v53 = vmul.f32 %v3283_v5, %v4237_v37  ;;  %4799 = vst [vmem:[#allocation39_spill] sm:$0xff] %v4303_v22  ;;  %v4309_v5 = vld [vmem:[#allocation4 + $0x38] sm:$0xff] }
 0x30d   : > { %v3287_v17 = vpop.eup %3286  ;;  %v1740_v14 = vadd.f32 1.0, %v3285_v41  ;;  %v4313_v41 = vld [vmem:[#allocation4 + $0x40] sm:$0xff]  ;;  %v4370_v40 = vld [vmem:[#allocation4 + $0x78] sm:$0xff] }
 0x30e   : > { %v3289_v21 = vpop.eup %3288  ;;  %1826 = vperm.xlu1 %3239, %v1780_v15   ;;  %v1742_v30 = vadd.f32 1.0, %v3287_v17  ;;  %4802 = vst [vmem:[#allocation42_spill] sm:$0xff] %v4313_v41  ;;  %v4315_v17 = vld [vmem:[#allocation3 + $0x40] sm:$0xff]  ;;  %v4372_v52 = vld [vmem:[#allocation3 + $0x78] sm:$0xff] }
 0x30f   : > { %1841 = vperm.xlu0 %3238, %v1783_v2   ;;  %v3291_v9 = vpop.eup %3290  ;;  %3298 = vrcp.f32 %v1740_v14  ;;  %v1744_v55 = vadd.f32 1.0, %v3289_v21  ;;  %4803 = vst [vmem:[#allocation43_spill] sm:$0xff] %v4315_v17  ;;  %v4317_v14 = vld [vmem:[#allocation4 + $0x48] sm:$0xff]  ;;  %v4368_v37 = vmul.f32 %v4315_v17, %v4313_v41 }
 0x310   : > { %3300 = vrcp.f32 %v1742_v30  ;;  %v3293_v3 = vpop.eup %3292  ;;  %v1784_v60 = vmul.f32 %v3291_v9, %v4240_v1  ;;  %4804 = vst [vmem:[#allocation44_spill] sm:$0xff] %v4317_v14  ;;  %v4319_v21 = vld [vmem:[#allocation3 + $0x48] sm:$0xff]  ;;  %v1796_v30 = vld [vmem:[#allocation2 + $0x18] sm:$0xff]  ;;  %v4323_v9 = vld [vmem:[#allocation3 + $0x50] sm:$0xff]  ;;  %v1996_v1 = vmul.f32 %v4311_v18, %v4309_v5 }
 0x311   : > { %v3295_v63 = vpop.eup %3294  ;;  %3302 = vrcp.f32 %v1744_v55  ;;  %v1789_v16 = vmul.f32 %v3293_v3, %v1645_v35  ;;  %4805 = vst [vmem:[#allocation45_spill] sm:$0xff] %v4319_v21  ;;  %4806 = vst [vmem:[#allocation46_spill] sm:$0xff] %v4323_v9  ;;  %v4327_v55 = vld [vmem:[#allocation3 + $0x58] sm:$0xff]  ;;  %v1793_v3 = vld [vmem:[#allocation2] sm:$0xff]  ;;  %v1989_v35 = vmul.f32 %v4281_v10, %v4279_v38 }
 0x312   : > { %1836 = vperm.xlu1 %3239, %v1782_v53   ;;  %v1786_v32 = vmul.f32 %v3295_v63, %v4243_v26  ;;  %v3297_v49 = vpop.eup %3296  ;;  %4807 = vst [vmem:[#allocation47_spill] sm:$0xff] %v4327_v55  ;;  %v1939_v63 = vsub.s32 0, %v4291_v47  ;;  %v4360_v47 = vstv %s4275_s16  ;;  %4813 = vst [vmem:[#allocation53_spill] sm:$0xff] %v4368_v37  ;;  %v4384_v18 = vmul.f32 %v4327_v55, %v4325_v29  ;;  %v1802_v41 = vld [vmem:[#allocation2 + $0x48] sm:$0xff]  ;;  %v1804_v37 = vld [vmem:[#allocation2 + $0x58] sm:$0xff] }
 0x313   : > { %1851 = vperm.xlu0 %3238, %v1785_v6   ;;  %v1791_v62 = vmul.f32 %v3297_v49, %v1647_v42  ;;  %v4336_v49 = vld [vmem:[#allocation4 + $0x60] sm:$0xff] }
 0x314   : > { %4808 = vst [vmem:[#allocation48_spill] sm:$0xff] %v4336_v49  ;;  %v4338_v42 = vld [vmem:[#allocation3 + $0x60] sm:$0xff] }
 0x315   : > { %4809 = vst [vmem:[#allocation49_spill] sm:$0xff] %v4338_v42  ;;  %v4388_v17 = vmul.f32 %v4338_v42, %v4336_v49 }
 0x316   : > { %1846 = vperm.xlu1 %3239, %v1784_v60  }
 0x317   : > { %1861 = vperm.xlu0 %3238, %v1787_v43  }
 0x319   : > { %v3299_v56 = vpop.eup %3298 }
 0x31a   : > { %1856 = vperm.xlu1 %3239, %v1786_v32   ;;  %v1788_v57 = vmul.f32 %v3299_v56, %v1644_v51  ;;  %v3301_v12 = vpop.eup %3300  ;;  %v4340_v51 = vld [vmem:[#allocation4 + $0x68] sm:$0xff] }
 0x31b   : > { %1871 = vperm.xlu0 %3238, %v1789_v16   ;;  %v1790_v59 = vmul.f32 %v3301_v12, %v1646_v45  ;;  %v3303_v50 = vpop.eup %3302  ;;  %4810 = vst [vmem:[#allocation50_spill] sm:$0xff] %v4340_v51  ;;  %v1794_v56 = vld [vmem:[#allocation2 + $0x8] sm:$0xff]  ;;  %v1992_v12 = vmul.f32 %v4295_v13, %v4293_v33  ;;  %v1801_v13 = vld [vmem:[#allocation2 + $0x40] sm:$0xff] }
 0x31c   : > { %v1792_v48 = vmul.f32 %v3303_v50, %v1648_v36  ;;  %v4353_v50 = vld [vmem:[#allocation3 + $0x68] sm:$0xff]  ;;  %v4355_v36 = vld [vmem:[#allocation4 + $0x70] sm:$0xff] }
 0x31d   : > { %4811 = vst [vmem:[#allocation51_spill] sm:$0xff] %v4353_v50 }
 0x31e   : > { %1866 = vperm.xlu1 %3239, %v1788_v57  }
 0x31f   : > { %1881 = vperm.xlu0 %3238, %v1791_v62  }
 0x322   : > { %1876 = vperm.xlu1 %3239, %v1790_v59  }
 0x326   : > { %1886 = vperm.xlu1 %3239, %v1792_v48  }
 0x33d   : > { %1905 = vxpose.xlu0.b32.start [1/16] (narrow) %v4222_v7, 8 }
 0x341   : > { %1906 = vxpose.xlu0.b32.cont [2/16] (narrow) %v4225_v27, 8 }
 0x345   : > { %1907 = vxpose.xlu0.b32.cont [3/16] (narrow) %v1779_v24, 8  ;;  %v4297_v24 = vld [vmem:[#allocation4 + $0x20] sm:$0xff] }
 0x346   : > { %v1993_v45 = vmul.f32 %v4299_v54, %v4297_v24  ;;  %v1799_v54 = vld [vmem:[#allocation2 + $0x30] sm:$0xff] }
 0x349   : > { %1908 = vxpose.xlu0.b32.cont [4/16] (narrow) %v1780_v15, 8  ;;  %v4307_v15 = vld [vmem:[#allocation3 + $0x30] sm:$0xff] }
 0x34a   : > { %4800 = vst [vmem:[#allocation40_spill] sm:$0xff] %v4307_v15 }
 0x34d   : > { %1909 = vxpose.xlu0.b32.cont [5/16] (narrow) %v4230_v58, 8  ;;  %v4289_v58 = vld [vmem:[#allocation3 + $0x10] sm:$0xff] }
 0x34e   : > { %4796 = vst [vmem:[#allocation36_spill] sm:$0xff] %v4289_v58 }
 0x351   : > { %1910 = vxpose.xlu0.b32.cont [6/16] (narrow) %v1782_v53, 8  ;;  %v1795_v53 = vld [vmem:[#allocation2 + $0x10] sm:$0xff] }
 0x355   : > { %1911 = vxpose.xlu0.b32.cont [7/16] (narrow) %v1783_v2, 8  ;;  %v4305_v2 = vld [vmem:[#allocation4 + $0x30] sm:$0xff] }
 0x356   : > { %v1995_v26 = vmul.f32 %v4307_v15, %v4305_v2 }
 0x359   : > { %1912 = vxpose.xlu0.b32.cont [8/16] (narrow) %v1784_v60, 8 }
 0x35d   : > { %1913 = vxpose.xlu0.b32.cont [9/16] (narrow) %v1785_v6, 8  ;;  %v4321_v6 = vld [vmem:[#allocation4 + $0x50] sm:$0xff] }
 0x35e   : > { %v4380_v15 = vmul.f32 %v4323_v9, %v4321_v6 }
 0x361   : > { %1914 = vxpose.xlu0.b32.cont [10/16] (narrow) %v1786_v32, 8  ;;  %v1991_v32 = vmul.f32 %v4289_v58, %v4287_v11  ;;  %v4376_v58 = vmul.f32 %v4319_v21, %v4317_v14  ;;  %v1806_v21 = vld [vmem:[#allocation2 + $0x68] sm:$0xff]  ;;  %v4394_v14 = vmul.f32 %v4353_v50, %v4340_v51 }
 0x365   : > { %1915 = vxpose.xlu0.b32.cont [11/16] (narrow) %v1787_v43, 8  ;;  %v1798_v43 = vld [vmem:[#allocation2 + $0x28] sm:$0xff] }
 0x369   : > { %1916 = vxpose.xlu0.b32.cont [12/16] (narrow) %v1788_v57, 8  ;;  %v4345_v57 = vstv %s4270_s25  ;;  %s3350_s25 = scalar_lea.vmem %s4594_s23, 2048 }
 0x36a   : > { %p3351_p10 = scmp.ne.s32.totalorder %s4594_s23, %s3350_s25 }
 0x36c   : > { %p3352_p0 = pnand %p3351_p10, %p4835_p12 }
 0x36d   : > { %1917 = vxpose.xlu0.b32.cont [13/16] (narrow) %v1789_v16, 8  ;;  %v1990_v16 = vmul.f32 %v4285_v20, %v4283_v4 }
 0x36e   : > { %p3353_p2 = pneg %p3352_p0 }
 0x371   : > { %1918 = vxpose.xlu0.b32.cont [14/16] (narrow) %v1790_v59, 8  ;;  %v1994_v59 = vmul.f32 %v4303_v22, %v4301_v46  ;;  %v1797_v22 = vld [vmem:[#allocation2 + $0x20] sm:$0xff] }
 0x375   : > { %1919 = vxpose.xlu0.b32.cont [15/16] (narrow) %v1791_v62, 8 }
 0x379   : > { %1920 = vxpose.xlu0.b32.end [16/16] (narrow) %v1792_v48, 8  ;;  %v4357_v48 = vld [vmem:[#allocation3 + $0x70] sm:$0xff] }
 0x37a   : > { %4812 = vst [vmem:[#allocation52_spill] sm:$0xff] %v4357_v48  ;;  %v4398_v9 = vmul.f32 %v4357_v48, %v4355_v36 }
 0x382   : > { %v4249_v31 = vpop.permute.xlu0 %1811 }
 0x383   : > { %v1889_v55 = vadd.f32 %v4249_v31, %v1793_v3 }
 0x386   : > { %v4251_v19 = vpop.permute.xlu0 %1816 }
 0x389   : > { %v4253_v44 = vpop.permute.xlu1 %1821 }
 0x38a   : > { %v4255_v39 = vpop.permute.xlu0 %1831  ;;  %v1891_v20 = vadd.f32 %v4253_v44, %v1795_v53  ;;  %v1890_v53 = vadd.f32 %v4251_v19, %v1794_v56 }
 0x38d   : > { %v4257_v34 = vpop.permute.xlu1 %1826 }
 0x38e   : > { %v4259_v25 = vpop.permute.xlu0 %1841  ;;  %v1892_v10 = vadd.f32 %v4257_v34, %v1796_v30  ;;  %v4405_v34 = vmul.f32 %v4372_v52, %v4370_v40  ;;  %v1893_v30 = vadd.f32 %v4255_v39, %v1797_v22 }
 0x38f   : > { %v1895_v50 = vadd.f32 %v4259_v25, %v1799_v54 }
 0x391   : > { %v4261_v7 = vpop.permute.xlu1 %1836 }
 0x392   : > { %v4263_v23 = vpop.permute.xlu0 %1851  ;;  %v1894_v42 = vadd.f32 %v4261_v7, %v1798_v43 }
 0x393   : > { %v1897_v31 = vadd.f32 %v4263_v23, %v1801_v13 }
 0x395   : > { %v4265_v61 = vpop.permute.xlu1 %1846 }
 0x396   : > { %v4267_v28 = vpop.permute.xlu0 %1861  ;;  %v1896_v49 = vadd.f32 %v4265_v61, %v1800_v8 }
 0x399   : > { %v4272_v27 = vpop.permute.xlu1 %1856 }
 0x39a   : > { %v4277_v0 = vpop.permute.xlu0 %1871  ;;  %v1898_v7 = vadd.f32 %v4272_v27, %v1802_v41 }
 0x39d   : > { %v1867_v60 = vpop.permute.xlu1 %1866 }
 0x39e   : > { %v4342_v62 = vpop.permute.xlu0 %1881  ;;  %v4414_v3 = vadd.f32 %v1867_v60, %v1804_v37 }
 0x3a1   : > { %v1877_v51 = vpop.permute.xlu1 %1876 }
 0x3a2   : > { %v4416_v61 = vadd.f32 %v1877_v51, %v1806_v21 }
 0x3bd   : > { %v1921_v44 = vpop.trf.xlu0 }
 0x3be   : > { %v4410_v48 = vrot.slane %v1921_v44, %v1939_v63 }
 0x3c0   : > { %v1941_v43 = vadd.f32 %v4410_v48, %v1889_v55  ;;  %v1942_v8 = vadd.f32 %v4410_v48, %v1890_v53  ;;  %v1943_v19 = vadd.f32 %v4410_v48, %v1891_v20  ;;  %v1944_v39 = vadd.f32 %v4410_v48, %v1892_v10 }
 0x3c1   : > { %v1945_v25 = vadd.f32 %v4410_v48, %v1893_v30  ;;  %v1946_v54 = vadd.f32 %v4410_v48, %v1894_v42  ;;  %v1947_v23 = vadd.f32 %v4410_v48, %v1895_v50  ;;  %v1948_v27 = vadd.f32 %v4410_v48, %v1896_v49 }
 0x3c2   : > { %v2005_v37 = vmul.f32 %v1989_v35, %v1941_v43  ;;  %v2006_v13 = vmul.f32 %v1990_v16, %v1942_v8  ;;  %v2007_v22 = vmul.f32 %v1991_v32, %v1943_v19  ;;  %v2008_v41 = vmul.f32 %v1992_v12, %v1944_v39 }
 0x3c3   : > { %v2009_v21 = vmul.f32 %v1993_v45, %v1945_v25  ;;  %v2010_v55 = vmul.f32 %v1994_v59, %v1946_v54  ;;  %v2011_v60 = vmul.f32 %v1995_v26, %v1947_v23  ;;  %v2012_v63 = vmul.f32 %v1996_v1, %v1948_v27 }
 0x3c4   : > { %v2022_v20 = vmul.f32 %v4345_v57, %v2005_v37  ;;  %v2023_v10 = vmul.f32 %v4345_v57, %v2006_v13  ;;  %v2024_v51 = vmul.f32 %v4345_v57, %v2007_v22  ;;  %v2025_v42 = vmul.f32 %v4345_v57, %v2008_v41  ;;  %v1805_v13 = vld [vmem:[#allocation2 + $0x60] sm:$0xff] }
 0x3c5   : > { %v2026_v56 = vmul.f32 %v4345_v57, %v2009_v21  ;;  %v2027_v49 = vmul.f32 %v4345_v57, %v2010_v55  ;;  %v2028_v35 = vmul.f32 %v4345_v57, %v2011_v60  ;;  %v2029_v16 = vmul.f32 %v4345_v57, %v2012_v63  ;;  %v1807_v60 = vld [vmem:[#allocation2 + $0x70] sm:$0xff]  ;;  %v1808_v63 = vld [vmem:[#allocation2 + $0x78] sm:$0xff] }
 0x3c6   : > { %v2038_v32 = vsub.f32 %v4279_v38, %v2022_v20  ;;  %v2039_v1 = vsub.f32 %v4283_v4, %v2023_v10  ;;  %v2040_v26 = vsub.f32 %v4287_v11, %v2024_v51  ;;  %v2041_v12 = vsub.f32 %v4293_v33, %v2025_v42  ;;  %v1887_v20 = vpop.permute.xlu1 %1886 }
 0x3c7   : > { %v2042_v45 = vsub.f32 %v4297_v24, %v2026_v56  ;;  %v2043_v59 = vsub.f32 %v4301_v46, %v2027_v49  ;;  %v2044_v50 = vsub.f32 %v4305_v2, %v2028_v35  ;;  %v2045_v44 = vsub.f32 %v4309_v5, %v2029_v16 }
 0x3c8   : > { %v2054_v53 = vand.u32 2147483647, %v2038_v32  ;;  %v2055_v30 = vand.u32 2147483647, %v2039_v1  ;;  %v2056_v43 = vand.u32 2147483647, %v2040_v26  ;;  %v1949_v8 = vadd.f32 %v4410_v48, %v1897_v31 }
 0x3c9   : > { %v2057_v38 = vand.u32 2147483647, %v2041_v12  ;;  %v2058_v19 = vand.u32 2147483647, %v2042_v45  ;;  %v2059_v4 = vand.u32 2147483647, %v2043_v59  ;;  %v1950_v11 = vadd.f32 %v4410_v48, %v1898_v7 }
 0x3ca   : > { %v2071_v33 = vsub.f32 %v2054_v53, %v4360_v47  ;;  %v2072_v24 = vsub.f32 %v2055_v30, %v4360_v47  ;;  %v2073_v46 = vsub.f32 %v2056_v43, %v4360_v47  ;;  %v2060_v39 = vand.u32 2147483647, %v2044_v50  ;;  %v1803_v7 = vld [vmem:[#allocation2 + $0x50] sm:$0xff]  ;;  %v4814_v53 = vld [vmem:[#allocation53_spill] sm:$0xff] }
 0x3cb   : > { %v2074_v2 = vsub.f32 %v2057_v38, %v4360_v47  ;;  %v2075_v5 = vsub.f32 %v2058_v19, %v4360_v47  ;;  %v2076_v25 = vsub.f32 %v2059_v4, %v4360_v47  ;;  %v2061_v54 = vand.u32 2147483647, %v2045_v44 }
 0x3cc   : > { %v2087_v31 = vmax.f32 %v2071_v33, 0.0  ;;  %v2088_v23 = vmax.f32 %v2072_v24, 0.0  ;;  %v2089_v27 = vmax.f32 %v2073_v46, 0.0  ;;  %v2077_v37 = vsub.f32 %v2060_v39, %v4360_v47 }
 0x3cd   : > { %v2090_v22 = vmax.f32 %v2074_v2, 0.0  ;;  %v2091_v41 = vmax.f32 %v2075_v5, 0.0  ;;  %v2092_v21 = vmax.f32 %v2076_v25, 0.0  ;;  %v2078_v55 = vsub.f32 %v2061_v54, %v4360_v47  ;;  %v4815_v5 = vld [vmem:[#allocation42_spill] sm:$0xff]  ;;  %v4816_v25 = vld [vmem:[#allocation44_spill] sm:$0xff] }
 0x3ce   : > { %v2706_v10 = vclamps-f32 %v2087_v31, 1.0  ;;  %v2707_v51 = vclamps-f32 %v2088_v23, 1.0  ;;  %v2708_v42 = vclamps-f32 %v2089_v27, 1.0  ;;  %v2093_v56 = vmax.f32 %v2077_v37, 0.0 }
 0x3cf   : > { %v2709_v49 = vclamps-f32 %v2090_v22, 1.0  ;;  %v4452_v35 = vclamps-f32 %v2091_v41, 1.0  ;;  %v4454_v16 = vclamps-f32 %v2092_v21, 1.0  ;;  %v2094_v32 = vmax.f32 %v2078_v55, 0.0  ;;  %v4817_v22 = vld [vmem:[#allocation48_spill] sm:$0xff]  ;;  %v4818_v21 = vld [vmem:[#allocation50_spill] sm:$0xff] }
 0x3d0   : > { %v1899_v1 = vadd.f32 %v4267_v28, %v1803_v7  ;;  %v1901_v26 = vadd.f32 %v4277_v0, %v1805_v13  ;;  %v4458_v12 = vmul.f32 %v2706_v10, %v2706_v10  ;;  %2279 = vst [vmem:[#allocation4] sm:$0xff] %v2706_v10  ;;  %2280 = vst [vmem:[#allocation4 + $0x8] sm:$0xff] %v2707_v51  ;;  %v4460_v45 = vclamps-f32 %v2093_v56, 1.0 }
 0x3d1   : > { %2281 = vst [vmem:[#allocation4 + $0x10] sm:$0xff] %v2708_v42  ;;  %v1903_v59 = vadd.f32 %v4342_v62, %v1807_v60  ;;  %v1904_v50 = vadd.f32 %v1887_v20, %v1808_v63  ;;  %v4463_v44 = vmul.f32 %v2707_v51, %v2707_v51  ;;  %2282 = vst [vmem:[#allocation4 + $0x18] sm:$0xff] %v2709_v49  ;;  %v4467_v28 = vclamps-f32 %v2094_v32, 1.0 }
 0x3d2   : > { %2283 = vst [vmem:[#allocation4 + $0x20] sm:$0xff] %v4452_v35  ;;  %2284 = vst [vmem:[#allocation4 + $0x28] sm:$0xff] %v4454_v16  ;;  %2151 = vxpose.xlu1.b32.start [1/16] %v4458_v12, 128  ;;  %v4470_v0 = vmul.f32 %v2708_v42, %v2708_v42  ;;  %v2013_v30 = vmul.f32 %v4814_v53, %v1949_v8  ;;  %v2014_v62 = vmul.f32 %v4376_v58, %v1950_v11 }
 0x3d3   : > { %2285 = vst [vmem:[#allocation4 + $0x30] sm:$0xff] %v4460_v45  ;;  %v1951_v43 = vadd.f32 %v4410_v48, %v1899_v1  ;;  %v4476_v38 = vmul.f32 %v2709_v49, %v2709_v49  ;;  %2286 = vst [vmem:[#allocation4 + $0x38] sm:$0xff] %v4467_v28  ;;  %v1952_v19 = vadd.f32 %v4410_v48, %v4414_v3 }
 0x3d4   : > { %v1953_v4 = vadd.f32 %v4410_v48, %v1901_v26  ;;  %v1954_v33 = vadd.f32 %v4410_v48, %v4416_v61  ;;  %v2030_v24 = vmul.f32 %v4345_v57, %v2013_v30  ;;  %v2031_v8 = vmul.f32 %v4345_v57, %v2014_v62 }
 0x3d5   : > { %v2015_v58 = vmul.f32 %v4380_v15, %v1951_v43  ;;  %v1955_v11 = vadd.f32 %v4410_v48, %v1903_v59  ;;  %v2016_v46 = vmul.f32 %v4384_v18, %v1952_v19  ;;  %v1956_v3 = vadd.f32 %v4410_v48, %v1904_v50 }
 0x3d6   : > { %v2017_v39 = vmul.f32 %v4388_v17, %v1953_v4  ;;  %v2018_v2 = vmul.f32 %v4394_v14, %v1954_v33  ;;  %2152 = vxpose.xlu1.b32.cont [2/16] %v4463_v44, 128  ;;  %v2046_v61 = vsub.f32 %v4815_v5, %v2030_v24  ;;  %v2047_v54 = vsub.f32 %v4816_v25, %v2031_v8 }
 0x3d7   : > { %v2032_v31 = vmul.f32 %v4345_v57, %v2015_v58  ;;  %v2019_v15 = vmul.f32 %v4398_v9, %v1955_v11  ;;  %v2033_v23 = vmul.f32 %v4345_v57, %v2016_v46  ;;  %v2020_v14 = vmul.f32 %v4405_v34, %v1956_v3 }
 0x3d8   : > { %v2034_v18 = vmul.f32 %v4345_v57, %v2017_v39  ;;  %v2035_v17 = vmul.f32 %v4345_v57, %v2018_v2  ;;  %v2062_v27 = vand.u32 2147483647, %v2046_v61  ;;  %v2063_v48 = vand.u32 2147483647, %v2047_v54 }
 0x3d9   : > { %v2048_v37 = vsub.f32 %v4321_v6, %v2032_v31  ;;  %v2036_v7 = vmul.f32 %v4345_v57, %v2019_v15  ;;  %v2049_v13 = vsub.f32 %v4325_v29, %v2033_v23  ;;  %v2037_v55 = vmul.f32 %v4345_v57, %v2020_v14 }
 0x3da   : > { %v2050_v41 = vsub.f32 %v4817_v22, %v2034_v18  ;;  %v2051_v9 = vsub.f32 %v4818_v21, %v2035_v17  ;;  %2153 = vxpose.xlu1.b32.cont [3/16] %v4470_v0, 128  ;;  %v2079_v60 = vsub.f32 %v2062_v27, %v4360_v47  ;;  %v2080_v34 = vsub.f32 %v2063_v48, %v4360_v47  ;;  %v4819_v27 = vld [vmem:[#allocation34_spill] sm:$0xff]  ;;  %v4820_v22 = vld [vmem:[#allocation35_spill] sm:$0xff] }
 0x3db   : > { %v2064_v63 = vand.u32 2147483647, %v2048_v37  ;;  %v2052_v20 = vsub.f32 %v4355_v36, %v2036_v7  ;;  %v2065_v6 = vand.u32 2147483647, %v2049_v13  ;;  %v2053_v29 = vsub.f32 %v4370_v40, %v2037_v55  ;;  %v4821_v55 = vld [vmem:[#allocation36_spill] sm:$0xff] }
 0x3dc   : > { %v2066_v10 = vand.u32 2147483647, %v2050_v41  ;;  %v2067_v51 = vand.u32 2147483647, %v2051_v9  ;;  %v2095_v42 = vmax.f32 %v2079_v60, 0.0  ;;  %v2096_v56 = vmax.f32 %v2080_v34, 0.0 }
 0x3dd   : > { %v2081_v49 = vsub.f32 %v2064_v63, %v4360_v47  ;;  %v2068_v32 = vand.u32 2147483647, %v2052_v20  ;;  %v2082_v57 = vsub.f32 %v2065_v6, %v4360_v47  ;;  %v2069_v59 = vand.u32 2147483647, %v2053_v29  ;;  %v4822_v20 = vld [vmem:[#allocation37_spill] sm:$0xff]  ;;  %v4823_v29 = vld [vmem:[#allocation38_spill] sm:$0xff] }
 0x3de   : > { %v2083_v1 = vsub.f32 %v2066_v10, %v4360_v47  ;;  %v2084_v26 = vsub.f32 %v2067_v51, %v4360_v47  ;;  %2154 = vxpose.xlu1.b32.cont [4/16] %v4476_v38, 128  ;;  %v2714_v36 = vclamps-f32 %v2095_v42, 1.0  ;;  %v2715_v50 = vclamps-f32 %v2096_v56, 1.0 }
 0x3df   : > { %v2097_v53 = vmax.f32 %v2081_v49, 0.0  ;;  %v2085_v30 = vsub.f32 %v2068_v32, %v4360_v47  ;;  %v2098_v40 = vmax.f32 %v2082_v57, 0.0  ;;  %v2086_v19 = vsub.f32 %v2069_v59, %v4360_v47  ;;  %v4824_v32 = vld [vmem:[#allocation39_spill] sm:$0xff] }
 0x3e0   : > { %v2099_v62 = vmax.f32 %v2083_v1, 0.0  ;;  %v2100_v43 = vmax.f32 %v2084_v26, 0.0  ;;  %v2139_v4 = vmul.f32 %v4452_v35, %v4452_v35  ;;  %2287 = vst [vmem:[#allocation4 + $0x40] sm:$0xff] %v2714_v36  ;;  %2288 = vst [vmem:[#allocation4 + $0x48] sm:$0xff] %v2715_v50  ;;  %v2140_v47 = vmul.f32 %v4454_v16, %v4454_v16 }
 0x3e1   : > { %v2716_v33 = vclamps-f32 %v2097_v53, 1.0  ;;  %v2101_v24 = vmax.f32 %v2085_v30, 0.0  ;;  %v2717_v8 = vclamps-f32 %v2098_v40, 1.0  ;;  %v2102_v46 = vmax.f32 %v2086_v19, 0.0 }
 0x3e2   : > { %v2718_v58 = vclamps-f32 %v2099_v62, 1.0  ;;  %v2719_v11 = vclamps-f32 %v2100_v43, 1.0  ;;  %2155 = vxpose.xlu1.b32.cont [5/16] %v2139_v4, 128  ;;  %v2141_v35 = vmul.f32 %v4460_v45, %v4460_v45  ;;  %v2142_v3 = vmul.f32 %v4467_v28, %v4467_v28  ;;  %v4826_v62 = vld [vmem:[#allocation41_spill] sm:$0xff] }
 0x3e3   : > { %2289 = vst [vmem:[#allocation4 + $0x50] sm:$0xff] %v2716_v33  ;;  %v2720_v39 = vclamps-f32 %v2101_v24, 1.0  ;;  %2290 = vst [vmem:[#allocation4 + $0x58] sm:$0xff] %v2717_v8  ;;  %v2721_v2 = vclamps-f32 %v2102_v46, 1.0  ;;  %v2143_v5 = vmul.f32 %v2714_v36, %v2714_v36  ;;  %v4527_v61 = vmul.f32 %v2715_v50, %v2715_v50  ;;  %v4825_v36 = vld [vmem:[#allocation40_spill] sm:$0xff]  ;;  %v4827_v24 = vld [vmem:[#allocation43_spill] sm:$0xff] }
 0x3e4   : > { %2291 = vst [vmem:[#allocation4 + $0x60] sm:$0xff] %v2718_v58  ;;  %2292 = vst [vmem:[#allocation4 + $0x68] sm:$0xff] %v2719_v11  ;;  %v4530_v25 = vmul.f32 %v2716_v33, %v2716_v33  ;;  %v4533_v16 = vmul.f32 %v2717_v8, %v2717_v8  ;;  %v4536_v45 = vmul.f32 %v2718_v58, %v2718_v58 }
 0x3e5   : > { %2293 = vst [vmem:[#allocation4 + $0x70] sm:$0xff] %v2720_v39  ;;  %2294 = vst [vmem:[#allocation4 + $0x78] sm:$0xff] %v2721_v2  ;;  %v4539_v28 = vmul.f32 %v2719_v11, %v2719_v11  ;;  %v4542_v54 = vmul.f32 %v2720_v39, %v2720_v39  ;;  %v4545_v31 = vmul.f32 %v2721_v2, %v2721_v2  ;;  %v4828_v39 = vld [vmem:[#allocation45_spill] sm:$0xff] }
 0x3e6   : > { %2156 = vxpose.xlu1.b32.cont [6/16] %v2140_v47, 128 }
 0x3ea   : > { %2157 = vxpose.xlu1.b32.cont [7/16] %v2141_v35, 128 }
 0x3ee   : > { %2158 = vxpose.xlu1.b32.cont [8/16] %v2142_v3, 128 }
 0x3f2   : > { %2159 = vxpose.xlu1.b32.cont [9/16] %v2143_v5, 128 }
 0x3f6   : > { %2160 = vxpose.xlu1.b32.cont [10/16] %v4527_v61, 128 }
 0x3fa   : > { %2161 = vxpose.xlu1.b32.cont [11/16] %v4530_v25, 128 }
 0x3fe   : > { %2162 = vxpose.xlu1.b32.cont [12/16] %v4533_v16, 128 }
 0x402   : > { %2163 = vxpose.xlu1.b32.cont [13/16] %v4536_v45, 128 }
 0x406   : > { %2164 = vxpose.xlu1.b32.cont [14/16] %v4539_v28, 128 }
 0x40a   : > { %2165 = vxpose.xlu1.b32.cont [15/16] %v4542_v54, 128 }
 0x40e   : > { %2166 = vxpose.xlu1.b32.end [16/16] %v4545_v31, 128 }
 0x452   : > { %v2167_v15 = vpop.trf.xlu1 }
 0x453   : > { %v2183_v23 = vadd.f32 %v2167_v15, %v4458_v12 }
 0x455   : > { %v2199_v18 = vmul.f32 0.5, %v2183_v23 }
 0x456   : > { %v2168_v17 = vpop.trf.xlu1 }
 0x457   : > { %v2184_v14 = vadd.f32 %v2168_v17, %v4463_v44  ;;  %v2215_v48 = vmul.f32 %v2199_v18, %v4819_v27  ;;  %v4830_v17 = vld [vmem:[#allocation47_spill] sm:$0xff] }
 0x459   : > { %v2200_v37 = vmul.f32 0.5, %v2184_v14  ;;  %2231 = vadd.xlane.f32.xlu0 %v2215_v48  ;;  %2393 = vst [vmem:[%s3652_s1] sm:$0xff] %v2215_v48 }
 0x45a   : > { %v2169_v7 = vpop.trf.xlu1 }
 0x45b   : > { %v2185_v13 = vadd.f32 %v2169_v7, %v4470_v0  ;;  %v2216_v41 = vmul.f32 %v2200_v37, %v4820_v22  ;;  %v4831_v37 = vld [vmem:[#allocation49_spill] sm:$0xff]  ;;  %v4832_v22 = vld [vmem:[#allocation51_spill] sm:$0xff] }
 0x45d   : > { %v2201_v21 = vmul.f32 0.5, %v2185_v13  ;;  %2233 = vadd.xlane.f32.xlu1 %v2216_v41  ;;  %2394 = vst [vmem:[%s3652_s1 + $0x8] sm:$0xff] %v2216_v41 }
 0x45e   : > { %v2170_v12 = vpop.trf.xlu1 }
 0x45f   : > { %v2186_v9 = vadd.f32 %v2170_v12, %v4476_v38  ;;  %v2217_v44 = vmul.f32 %v2201_v21, %v4821_v55 }
 0x461   : > { %v2202_v60 = vmul.f32 0.5, %v2186_v9  ;;  %2235 = vadd.xlane.f32.xlu0 %v2217_v44  ;;  %2395 = vst [vmem:[%s3652_s1 + $0x10] sm:$0xff] %v2217_v44  ;;  %v4833_v9 = vld [vmem:[#allocation52_spill] sm:$0xff] }
 0x462   : > { %v2171_v34 = vpop.trf.xlu1 }
 0x463   : > { %v2187_v63 = vadd.f32 %v2171_v34, %v2139_v4  ;;  %v2218_v0 = vmul.f32 %v2202_v60, %v4822_v20 }
 0x465   : > { %v2203_v6 = vmul.f32 0.5, %v2187_v63  ;;  %2237 = vadd.xlane.f32.xlu0 %v2218_v0  ;;  %2396 = vst [vmem:[%s3652_s1 + $0x18] sm:$0xff] %v2218_v0 }
 0x466   : > { %v2172_v10 = vpop.trf.xlu1 }
 0x467   : > { %v2188_v51 = vadd.f32 %v2172_v10, %v2140_v47  ;;  %v2219_v42 = vmul.f32 %v2203_v6, %v4823_v29 }
 0x469   : > { %v2204_v38 = vmul.f32 0.5, %v2188_v51  ;;  %2239 = vadd.xlane.f32.xlu1 %v2219_v42  ;;  %2397 = vst [vmem:[%s3652_s1 + $0x20] sm:$0xff] %v2219_v42 }
 0x46a   : > { %v2173_v56 = vpop.trf.xlu1 }
 0x46b   : > { %v2189_v49 = vadd.f32 %v2173_v56, %v2141_v35  ;;  %v2220_v57 = vmul.f32 %v2204_v38, %v4824_v32 }
 0x46d   : > { %v2205_v1 = vmul.f32 0.5, %v2189_v49  ;;  %2241 = vadd.xlane.f32.xlu0 %v2220_v57  ;;  %2398 = vst [vmem:[%s3652_s1 + $0x28] sm:$0xff] %v2220_v57 }
 0x46e   : > { %v2174_v26 = vpop.trf.xlu1 }
 0x46f   : > { %v2190_v59 = vadd.f32 %v2174_v26, %v2142_v3  ;;  %v2221_v50 = vmul.f32 %v2205_v1, %v4825_v36 }
 0x471   : > { %v2206_v53 = vmul.f32 0.5, %v2190_v59  ;;  %2243 = vadd.xlane.f32.xlu1 %v2221_v50  ;;  %2399 = vst [vmem:[%s3652_s1 + $0x30] sm:$0xff] %v2221_v50 }
 0x472   : > { %v2175_v30 = vpop.trf.xlu1 }
 0x473   : > { %v2191_v40 = vadd.f32 %v2175_v30, %v2143_v5  ;;  %v2222_v43 = vmul.f32 %v2206_v53, %v4826_v62  ;;  %v4829_v5 = vld [vmem:[#allocation46_spill] sm:$0xff] }
 0x475   : > { %v2207_v19 = vmul.f32 0.5, %v2191_v40  ;;  %2245 = vadd.xlane.f32.xlu0 %v2222_v43  ;;  %2400 = vst [vmem:[%s3652_s1 + $0x38] sm:$0xff] %v2222_v43 }
 0x476   : > { %v2176_v4 = vpop.trf.xlu1 }
 0x477   : > { %v2192_v33 = vadd.f32 %v2176_v4, %v4527_v61  ;;  %v2223_v8 = vmul.f32 %v2207_v19, %v4827_v24 }
 0x479   : > { %v2208_v58 = vmul.f32 0.5, %v2192_v33  ;;  %2247 = vadd.xlane.f32.xlu1 %v2223_v8  ;;  %2401 = vst [vmem:[%s3652_s1 + $0x40] sm:$0xff] %v2223_v8 }
 0x47a   : > { %v2177_v11 = vpop.trf.xlu1 }
 0x47b   : > { %v2193_v46 = vadd.f32 %v2177_v11, %v4530_v25  ;;  %v2224_v2 = vmul.f32 %v2208_v58, %v4828_v39 }
 0x47d   : > { %v2209_v47 = vmul.f32 0.5, %v2193_v46  ;;  %2249 = vadd.xlane.f32.xlu0 %v2224_v2  ;;  %2402 = vst [vmem:[%s3652_s1 + $0x48] sm:$0xff] %v2224_v2 }
 0x47e   : > { %v2178_v35 = vpop.trf.xlu1 }
 0x47f   : > { %v2194_v3 = vadd.f32 %v2178_v35, %v4533_v16  ;;  %v2225_v61 = vmul.f32 %v2209_v47, %v4829_v5 }
 0x481   : > { %v2210_v15 = vmul.f32 0.5, %v2194_v3  ;;  %2251 = vadd.xlane.f32.xlu1 %v2225_v61  ;;  %2403 = vst [vmem:[%s3652_s1 + $0x50] sm:$0xff] %v2225_v61 }
 0x482   : > { %v2179_v23 = vpop.trf.xlu1 }
 0x483   : > { %v2195_v18 = vadd.f32 %v2179_v23, %v4536_v45  ;;  %v2226_v25 = vmul.f32 %v2210_v15, %v4830_v17 }
 0x485   : > { %v2211_v14 = vmul.f32 0.5, %v2195_v18  ;;  %2253 = vadd.xlane.f32.xlu0 %v2226_v25  ;;  %2404 = vst [vmem:[%s3652_s1 + $0x58] sm:$0xff] %v2226_v25 }
 0x486   : > { %v2180_v27 = vpop.trf.xlu1 }
 0x487   : > { %v2196_v48 = vadd.f32 %v2180_v27, %v4539_v28  ;;  %v2227_v16 = vmul.f32 %v2211_v14, %v4831_v37 }
 0x489   : > { %v2212_v7 = vmul.f32 0.5, %v2196_v48  ;;  %2255 = vadd.xlane.f32.xlu1 %v2227_v16  ;;  %2405 = vst [vmem:[%s3652_s1 + $0x60] sm:$0xff] %v2227_v16 }
 0x48a   : > { %v2181_v13 = vpop.trf.xlu1 }
 0x48b   : > { %v2197_v45 = vadd.f32 %v2181_v13, %v4542_v54  ;;  %v2228_v41 = vmul.f32 %v2212_v7, %v4832_v22 }
 0x48d   : > { %v2213_v21 = vmul.f32 0.5, %v2197_v45  ;;  %2257 = vadd.xlane.f32.xlu0 %v2228_v41  ;;  %2406 = vst [vmem:[%s3652_s1 + $0x68] sm:$0xff] %v2228_v41 }
 0x48e   : > { %v2182_v12 = vpop.trf.xlu1 }
 0x48f   : > { %v2198_v28 = vadd.f32 %v2182_v12, %v4545_v31  ;;  %v2229_v55 = vmul.f32 %v2213_v21, %v4833_v9 }
 0x491   : > { %v2214_v44 = vmul.f32 0.5, %v2198_v28  ;;  %2259 = vadd.xlane.f32.xlu1 %v2229_v55  ;;  %2407 = vst [vmem:[%s3652_s1 + $0x70] sm:$0xff] %v2229_v55 }
 0x493   : > { %v2230_v60 = vmul.f32 %v2214_v44, %v4372_v52 }
 0x495   : > { %2261 = vadd.xlane.f32.xlu0 %v2230_v60  ;;  %2408 = vst [vmem:[%s3652_s1 + $0x78] sm:$0xff] %v2230_v60  ;;  %s3354_s1 = sshll.u32 %s3458_s13, 4  ;;  %s3355_s1 = int_to_ptr.vmem [resolvable:$false] %s3354_s1 }
 0x496   : > { %s3356_s16 = scalar_lea.vmem %s3355_s1, 4096  ;;  %p3357_p6 = scmp.lt.s32.totalorder %s4594_s23, %s3355_s1 }
 0x497   : > { %p3358_p7 = scmp.lt.s32.totalorder %s3356_s16, %s3350_s25 }
 0x499   : > { %p3359_p9 = por %p3358_p7, %p3357_p6 }
 0x49b   : > { %p3360_p11 = pnand %p3359_p9, %p3353_p2 }
 0x49d   : > { %3363 = shalt.err (!%p3360_p11)
}
 0x49e   : > { %s3364_s19 = scalar_lea.hbm %s4599_s29, 2048  ;;  %s3368_s27 = scalar_lea.hbm %s4719_s8, 12288 }
 0x49f   : > { %p3365_p13 = scmp.ne.s32.totalorder %s4599_s29, %s3364_s19  ;;  %p3369_p5 = scmp.lt.u32.totalorder %s4599_s29, %s4719_s8 }
 0x4a0   : > { %p3370_p3 = scmp.lt.u32.totalorder %s3368_s27, %s3364_s19  ;;  %p3372_p10 = scmp.lt.u32.totalorder %s3364_s19, %s4599_s29 }
 0x4a1   : > { %p3366_p1 = pnand %p3365_p13, %p4835_p12 }
 0x4a2   : > { %p3371_p8 = por %p3370_p3, %p3369_p5 }
 0x4a3   : > { %p3367_p4 = pneg %p3366_p1 }
 0x4a4   : > { %p3373_p0 = por %p3372_p10, %p3371_p8 }
 0x4a6   : > { %p3374_p2 = pnand %p3373_p0, %p3367_p4 }
 0x4a8   : > { %3377 = shalt.err (!%p3374_p2)
}
 0x4a9   : > { %s3459_s18 = smov 128   ;;  %s3460_s25 = smov 8   ;;  %vm2295_vm3 = vcmask 7168   ;;  %v2312_v63 = vld [vmem:[#allocation6] sm:$0xff]  ;;  %v2313_v29 = vld [vmem:[#allocation6 + $0x8] sm:$0xff]  ;;  %v4838_v47 = vld [vmem:[#allocation31_spill] sm:$0xff] }
 0x4aa   : > { %2953 = dma.vmem_to_hbm [thread:$0]  (%p4835_p12), %s4594_s23, 2048, %s4599_s29, %s4603_s3, %s3459_s18, %s3459_s18, %s3460_s25   ;;  %v4836_v59 = vld [vmem:[#allocation29_spill] sm:$0xff]  ;;  %v4837_v62 = vld [vmem:[#allocation30_spill] sm:$0xff]  ;;  %v2318_v5 = vld [vmem:[#allocation6 + $0x30] sm:$0xff] }
 0x4ab   : > { %s1632_s13 = sld [smem:[#allocation14 + %s3436_s12]]  ;;  %v2316_v4 = vld [vmem:[#allocation6 + $0x20] sm:$0xff]  ;;  %v4839_v48 = vld [vmem:[#allocation32_spill] sm:$0xff] }
 0x4ac   : > { %v2320_v7 = vld [vmem:[#allocation6 + $0x40] sm:$0xff] }
 0x4ad   : > { %v4840_v55 = vld [vmem:[#allocation33_spill] sm:$0xff] }
 0x4b1   : > { %v4628_v31 = vstv %s1632_s13 }
 0x4e6   : > { %v2232_v52 = vpop.xlane.xlu0 %2231 }
 0x4e7   : > { %v2722_v54 = vadd.f32 -1.0, %v2232_v52  ;;  %v2322_v52 = vld [vmem:[#allocation6 + $0x50] sm:$0xff] }
 0x4e9   : > { %2296 = vst.msk [vmem:[#allocation5] sm:$0xff] %vm2295_vm3, %v2722_v54  ;;  %v2328_v34 = vmax.f32 %v2722_v54, 0.0 }
 0x4ea   : > { %v2234_v20 = vpop.xlane.xlu1 %2233 }
 0x4eb   : > { %v2345_v0 = vmul.f32 %v4628_v31, %v2328_v34  ;;  %v2723_v6 = vadd.f32 -1.0, %v2234_v20 }
 0x4ed   : > { %v2361_v10 = vadd.f32 %v2345_v0, %v2312_v63  ;;  %2297 = vst.msk [vmem:[#allocation5 + $0x8] sm:$0xff] %vm2295_vm3, %v2723_v6  ;;  %v2329_v51 = vmax.f32 %v2723_v6, 0.0 }
 0x4ee   : > { %v2236_v42 = vpop.xlane.xlu0 %2235 }
 0x4ef   : > { %2377 = vst.msk [vmem:[#allocation6] sm:$0xff] %vm2295_vm3, %v2361_v10  ;;  %v2346_v38 = vmul.f32 %v4628_v31, %v2329_v51  ;;  %v2724_v56 = vadd.f32 -1.0, %v2236_v42 }
 0x4f1   : > { %v2362_v49 = vadd.f32 %v2346_v38, %v2313_v29  ;;  %2298 = vst.msk [vmem:[#allocation5 + $0x10] sm:$0xff] %vm2295_vm3, %v2724_v56  ;;  %v2330_v32 = vmax.f32 %v2724_v56, 0.0  ;;  %v3304_v29 = vld [vmem:[#allocation6 + $0x58] sm:$0xff]  ;;  %v2324_v56 = vld [vmem:[#allocation6 + $0x60] sm:$0xff] }
 0x4f2   : > { %v2238_v57 = vpop.xlane.xlu0 %2237 }
 0x4f3   : > { %2378 = vst.msk [vmem:[#allocation6 + $0x8] sm:$0xff] %vm2295_vm3, %v2362_v49  ;;  %v2347_v1 = vmul.f32 %v4628_v31, %v2330_v32  ;;  %v2725_v26 = vadd.f32 -1.0, %v2238_v57 }
 0x4f5   : > { %v2363_v36 = vadd.f32 %v2347_v1, %v4836_v59  ;;  %2299 = vst.msk [vmem:[#allocation5 + $0x18] sm:$0xff] %vm2295_vm3, %v2725_v26  ;;  %v2331_v50 = vmax.f32 %v2725_v26, 0.0  ;;  %v2325_v59 = vld [vmem:[#allocation6 + $0x68] sm:$0xff] }
 0x4f6   : > { %v2240_v53 = vpop.xlane.xlu1 %2239 }
 0x4f7   : > { %2379 = vst.msk [vmem:[#allocation6 + $0x10] sm:$0xff] %vm2295_vm3, %v2363_v36  ;;  %v2348_v30 = vmul.f32 %v4628_v31, %v2331_v50  ;;  %v2726_v40 = vadd.f32 -1.0, %v2240_v53 }
 0x4f9   : > { %v2364_v43 = vadd.f32 %v2348_v30, %v4837_v62  ;;  %2300 = vst.msk [vmem:[#allocation5 + $0x20] sm:$0xff] %vm2295_vm3, %v2726_v40  ;;  %v2332_v19 = vmax.f32 %v2726_v40, 0.0  ;;  %v2326_v62 = vld [vmem:[#allocation6 + $0x70] sm:$0xff] }
 0x4fa   : > { %v2242_v33 = vpop.xlane.xlu0 %2241 }
 0x4fb   : > { %2380 = vst.msk [vmem:[#allocation6 + $0x18] sm:$0xff] %vm2295_vm3, %v2364_v43  ;;  %v2349_v24 = vmul.f32 %v4628_v31, %v2332_v19  ;;  %v2727_v8 = vadd.f32 -1.0, %v2242_v33 }
 0x4fd   : > { %v2365_v58 = vadd.f32 %v2349_v24, %v2316_v4  ;;  %2301 = vst.msk [vmem:[#allocation5 + $0x28] sm:$0xff] %vm2295_vm3, %v2727_v8  ;;  %v2333_v11 = vmax.f32 %v2727_v8, 0.0  ;;  %v2327_v8 = vld [vmem:[#allocation6 + $0x78] sm:$0xff] }
 0x4fe   : > { %v2244_v46 = vpop.xlane.xlu1 %2243 }
 0x4ff   : > { %2381 = vst.msk [vmem:[#allocation6 + $0x20] sm:$0xff] %vm2295_vm3, %v2365_v58  ;;  %v2350_v39 = vmul.f32 %v4628_v31, %v2333_v11  ;;  %v2728_v2 = vadd.f32 -1.0, %v2244_v46 }
 0x501   : > { %v2366_v35 = vadd.f32 %v2350_v39, %v4838_v47  ;;  %2302 = vst.msk [vmem:[#allocation5 + $0x30] sm:$0xff] %vm2295_vm3, %v2728_v2  ;;  %v2334_v3 = vmax.f32 %v2728_v2, 0.0 }
 0x502   : > { %v2246_v61 = vpop.xlane.xlu0 %2245 }
 0x503   : > { %2382 = vst.msk [vmem:[#allocation6 + $0x28] sm:$0xff] %vm2295_vm3, %v2366_v35  ;;  %v2351_v15 = vmul.f32 %v4628_v31, %v2334_v3  ;;  %v2729_v23 = vadd.f32 -1.0, %v2246_v61 }
 0x505   : > { %v2367_v18 = vadd.f32 %v2351_v15, %v2318_v5  ;;  %2303 = vst.msk [vmem:[#allocation5 + $0x38] sm:$0xff] %vm2295_vm3, %v2729_v23  ;;  %v2335_v17 = vmax.f32 %v2729_v23, 0.0 }
 0x506   : > { %v2248_v25 = vpop.xlane.xlu1 %2247 }
 0x507   : > { %2383 = vst.msk [vmem:[#allocation6 + $0x30] sm:$0xff] %vm2295_vm3, %v2367_v18  ;;  %v2352_v14 = vmul.f32 %v4628_v31, %v2335_v17  ;;  %v2730_v27 = vadd.f32 -1.0, %v2248_v25 }
 0x509   : > { %v2368_v37 = vadd.f32 %v2352_v14, %v4839_v48  ;;  %2304 = vst.msk [vmem:[#allocation5 + $0x40] sm:$0xff] %vm2295_vm3, %v2730_v27  ;;  %v2336_v16 = vmax.f32 %v2730_v27, 0.0 }
 0x50a   : > { %v2250_v13 = vpop.xlane.xlu0 %2249 }
 0x50b   : > { %2384 = vst.msk [vmem:[#allocation6 + $0x38] sm:$0xff] %vm2295_vm3, %v2368_v37  ;;  %v2353_v45 = vmul.f32 %v4628_v31, %v2336_v16  ;;  %v2731_v22 = vadd.f32 -1.0, %v2250_v13 }
 0x50d   : > { %v2369_v41 = vadd.f32 %v2353_v45, %v2320_v7  ;;  %2305 = vst.msk [vmem:[#allocation5 + $0x48] sm:$0xff] %vm2295_vm3, %v2731_v22  ;;  %v2337_v21 = vmax.f32 %v2731_v22, 0.0 }
 0x50e   : > { %v2252_v12 = vpop.xlane.xlu1 %2251 }
 0x50f   : > { %2385 = vst.msk [vmem:[#allocation6 + $0x40] sm:$0xff] %vm2295_vm3, %v2369_v41  ;;  %v2354_v28 = vmul.f32 %v4628_v31, %v2337_v21  ;;  %v2732_v9 = vadd.f32 -1.0, %v2252_v12 }
 0x511   : > { %v2370_v44 = vadd.f32 %v2354_v28, %v4840_v55  ;;  %2306 = vst.msk [vmem:[#allocation5 + $0x50] sm:$0xff] %vm2295_vm3, %v2732_v9  ;;  %v2338_v60 = vmax.f32 %v2732_v9, 0.0 }
 0x512   : > { %v2254_v54 = vpop.xlane.xlu0 %2253 }
 0x513   : > { %2386 = vst.msk [vmem:[#allocation6 + $0x48] sm:$0xff] %vm2295_vm3, %v2370_v44  ;;  %v2355_v34 = vmul.f32 %v4628_v31, %v2338_v60  ;;  %v2733_v63 = vadd.f32 -1.0, %v2254_v54 }
 0x515   : > { %v2371_v20 = vadd.f32 %v2355_v34, %v2322_v52  ;;  %2307 = vst.msk [vmem:[#allocation5 + $0x58] sm:$0xff] %vm2295_vm3, %v2733_v63  ;;  %v2339_v0 = vmax.f32 %v2733_v63, 0.0 }
 0x516   : > { %v2256_v6 = vpop.xlane.xlu1 %2255 }
 0x517   : > { %2387 = vst.msk [vmem:[#allocation6 + $0x50] sm:$0xff] %vm2295_vm3, %v2371_v20  ;;  %v2356_v10 = vmul.f32 %v4628_v31, %v2339_v0  ;;  %v2734_v51 = vadd.f32 -1.0, %v2256_v6 }
 0x519   : > { %v2372_v42 = vadd.f32 %v3304_v29, %v2356_v10  ;;  %2308 = vst.msk [vmem:[#allocation5 + $0x60] sm:$0xff] %vm2295_vm3, %v2734_v51  ;;  %v2340_v38 = vmax.f32 %v2734_v51, 0.0 }
 0x51a   : > { %v2258_v49 = vpop.xlane.xlu0 %2257 }
 0x51b   : > { %2388 = vst.msk [vmem:[#allocation6 + $0x58] sm:$0xff] %vm2295_vm3, %v2372_v42  ;;  %v2357_v32 = vmul.f32 %v4628_v31, %v2340_v38  ;;  %v2735_v57 = vadd.f32 -1.0, %v2258_v49 }
 0x51d   : > { %v2373_v1 = vadd.f32 %v2357_v32, %v2324_v56  ;;  %2309 = vst.msk [vmem:[#allocation5 + $0x68] sm:$0xff] %vm2295_vm3, %v2735_v57  ;;  %v2341_v26 = vmax.f32 %v2735_v57, 0.0 }
 0x51e   : > { %v2260_v36 = vpop.xlane.xlu1 %2259 }
 0x51f   : > { %2389 = vst.msk [vmem:[#allocation6 + $0x60] sm:$0xff] %vm2295_vm3, %v2373_v1  ;;  %v2358_v50 = vmul.f32 %v4628_v31, %v2341_v26  ;;  %v2736_v53 = vadd.f32 -1.0, %v2260_v36 }
 0x521   : > { %v2374_v30 = vadd.f32 %v2358_v50, %v2325_v59  ;;  %2310 = vst.msk [vmem:[#allocation5 + $0x70] sm:$0xff] %vm2295_vm3, %v2736_v53  ;;  %v2342_v40 = vmax.f32 %v2736_v53, 0.0 }
 0x522   : > { %v2262_v43 = vpop.xlane.xlu0 %2261 }
 0x523   : > { %2390 = vst.msk [vmem:[#allocation6 + $0x68] sm:$0xff] %vm2295_vm3, %v2374_v30  ;;  %v2359_v19 = vmul.f32 %v4628_v31, %v2342_v40  ;;  %v2737_v4 = vadd.f32 -1.0, %v2262_v43 }
 0x525   : > { %v2375_v33 = vadd.f32 %v2359_v19, %v2326_v62  ;;  %2311 = vst.msk [vmem:[#allocation5 + $0x78] sm:$0xff] %vm2295_vm3, %v2737_v4  ;;  %v2343_v24 = vmax.f32 %v2737_v4, 0.0 }
 0x527   : > { %2391 = vst.msk [vmem:[#allocation6 + $0x70] sm:$0xff] %vm2295_vm3, %v2375_v33  ;;  %v2360_v58 = vmul.f32 %v4628_v31, %v2343_v24 }
 0x529   : > { %v2376_v11 = vadd.f32 %v2360_v58, %v2327_v8 }
 0x52b   : > { %2392 = vst.msk [vmem:[#allocation6 + $0x78] sm:$0xff] %vm2295_vm3, %v2376_v11 }
 0x52c PF: > { %p2975_p12 = scmp.ge.s32.totalorder %s3452_s15, 2  ;;  %s2440_s12 = sand.u32 1, %s3424_s9  }
 0x52d   : > { %p4841_p6 = scmp.ne.s32.totalorder %s4762_s22, 0  ;;  %s2441_s21 = scalar_lea.sflag [#allocation10], %s2440_s12 }
 0x52f   : > { %p2966_p7 = pnand %p2975_p12, %p4841_p6 }
 0x531   : > { %3419 = dma.done.wait (!%p2966_p7), %s2441_s21, 2048  }
 0x532   : > { %3421 = vsyncadd (!%p2966_p7), %s2441_s21, 4294965248  ;;  %s25_s15 = sadd.s32 1, %s3452_s15   ;;  %s4842_s23 = sld [smem:[#allocation19_spill]] }
 0x533   : > { %p22_p9 = scmp.ge.s32.totalorder %s25_s15, 8   ;;  %s4843_s9 = smov %s3428_s10 }
 0x534   : > { %s4844_s10 = smov %s3432_s11  ;;  %s4845_s11 = smov %s3594_s30 }
 0x535   : > { %s4846_s12 = smov %s3444_s14  ;;  %s4847_s13 = smov %s3448_s0 }
 0x536   : > { %s4848_s14 = smov %s4851_s17  ;;  %24 = sbr.rel (!%p22_p9) target bundleno = 11 (0xb), region = 107 }
 0x538   : > { %s4849_s0 = smov %s4842_s23 }
 0x53d   :  { %2446 = vsyncpa [#allocation10], 1 }
 0x53e   :  { %2448 = vsyncpa [#allocation10 + $0x1], 1 }
 0x53f   :  { %2449 = vsyncpa [#allocation11], 1 }
 0x540   :  { %2451 = vsyncpa [#allocation11 + $0x1], 1 }
 0x541   :  { %2452 = vsyncpa [#allocation13], 1 }

</bundles_post_ra>
